<compile_context>
chip_gen: v7x
topology: tpu7x:2x2x1
jax: 0.10.0
libtpu: 0.0.40
codegen_flags: <defaults>
</compile_context>

<pallas_src>
import functools

import jax
import jax.numpy as jnp
from jax.experimental import pallas as pl
from jax.experimental.pallas import tpu as pltpu


def _round_up(x, m):
    return ((x + m - 1) // m) * m


def _upsample_rows_kernel(x_ref, o_ref, *, upscale):
    u = upscale
    x = x_ref[...]                                    # (R, W)
    R, W = x.shape
    # Lane-axis (W) replication: each element repeated u times consecutively.
    y = jnp.broadcast_to(x[:, :, None], (R, W, u)).reshape(R, W * u)
    # Row (H) replication: the u upsampled output rows generated by one input
    # row are contiguous in the flattened output, so they are just u copies of
    # `y` along the lane axis (a cheap lane concat, no sublane interleave).
    o_ref[...] = jnp.concatenate([y] * u, axis=-1)    # (R, u*u*W)


def upsample_deterministic(x, upscale=2, *, max_block_bytes=12 << 20):
    """Pallas equivalent of UpsampleDeterministic.forward.

    x: (B, C, H, W) -> (B, C, H*upscale, W*upscale), same dtype, bit-exact
    nearest-neighbour replication (matches the torch expand+reshape).
    """
    B, C, H, W = x.shape
    u = int(upscale)
    if u == 1:
        return x
    Ho, Wo = H * u, W * u
    N = B * C * H                   # independent input rows
    Wout = u * u * W                # output elements produced per input row

    # Free, contiguous reshapes: every input row maps to one lane-dense output
    # row of the flattened (N, u*u*W) output, which is itself a contiguous
    # view of the (B, C, Ho, Wo) result.
    xf = x.reshape(N, W)

    itemsize = jnp.dtype(x.dtype).itemsize
    # Padded per-row VMEM footprint ((8,128) lane tiling) of one in+out row.
    in_row = _round_up(W, 128) * itemsize
    out_row = _round_up(Wout, 128) * itemsize
    per_row = in_row + out_row

    # Rows per grid step: as many as the (in+out) block budget allows, but try
    # to keep >=8 grid steps (>=2 pipelined steps per v7x TensorCore) as long
    # as each step still moves >=2 MiB.
    rows_budget = max(1, int(max_block_bytes) // per_row)
    rows_min = max(1, (2 << 20) // per_row)
    rows_for_steps = pl.cdiv(N, 8)
    rows = min(rows_budget, max(rows_for_steps, rows_min))
    rows = min(rows, N)
    if rows < N:
        rows = max(8, (rows // 8) * 8)        # sublane-aligned block rows
        rows = min(rows, N)
    grid = (pl.cdiv(N, rows),)
    # TODO(synk): if a single output row ever exceeds the block budget
    # (u*u*W*itemsize > max_block_bytes), additionally tile along W.

    # Scoped-VMEM ask: double-buffered (in+out) blocks + slack, capped well
    # below v7x's 64 MiB physical VMEM (v5e default of 16 MiB is raised).
    block_bytes = _round_up(rows, 32) * per_row
    vmem_limit = int(min(48 << 20, max(32 << 20, 2 * block_bytes + (8 << 20))))

    kernel = functools.partial(_upsample_rows_kernel, upscale=u)

    out2d = pl.pallas_call(
        kernel,
        out_shape=jax.ShapeDtypeStruct((N, Wout), x.dtype),
        grid=grid,
        in_specs=[pl.BlockSpec((rows, W), lambda i: (i, 0))],
        out_specs=pl.BlockSpec((rows, Wout), lambda i: (i, 0)),
        compiler_params=pltpu.CompilerParams(
            dimension_semantics=("parallel",),
            vmem_limit_bytes=vmem_limit,
        ),
    )(xf)

    return out2d.reshape(B, C, Ho, Wo)


def _reference(x, upscale=2):
    # Pure-JAX reference mirroring the torch expand/reshape semantics.
    B, C, H, W = x.shape
    y = jnp.broadcast_to(x[:, :, :, None, :, None],
                         (B, C, H, upscale, W, upscale))
    return y.reshape(B, C, H * upscale, W * upscale)


if __name__ == "__main__":
    key = jax.random.PRNGKey(0)

    # Primary check: shape from the module spec (batch=2, channels=4, 16x16).
    x = jax.random.normal(key, (2, 4, 16, 16), dtype=jnp.float32)
    out = jax.block_until_ready(upsample_deterministic(x, upscale=2))
    ref = _reference(x, upscale=2)
    assert out.shape == (2, 4, 32, 32), out.shape
    assert out.dtype == x.dtype
    assert jnp.array_equal(out, ref), "mismatch vs reference (u=2)"

    # Secondary check: non-power-of-two upscale factor.
    x3 = jax.random.normal(jax.random.PRNGKey(0), (1, 3, 8, 8), dtype=jnp.float32)
    out3 = jax.block_until_ready(upsample_deterministic(x3, upscale=3))
    assert out3.shape == (1, 3, 24, 24), out3.shape
    assert jnp.array_equal(out3, _reference(x3, upscale=3)), "mismatch (u=3)"

    print("KERNEL_OK")
</pallas_src>

<mosaic_0001>
module attributes {stable_mosaic.version = 11 : i64} {
  func.func @_upsample_rows_kernel(%arg0: i32, %arg1: memref<128x16xf32, #tpu.memory_space<vmem>>, %arg2: memref<128x64xf32, #tpu.memory_space<vmem>>) attributes {dimension_semantics = [#tpu.dimension_semantics<parallel>], iteration_bounds = array<i64: 1>, scalar_prefetch = 0 : i64, scratch_operands = 0 : i64, tpu.core_type = #tpu.core_type<tc>, window_params = [{transform_indices = @transform_0, window_bounds = array<i64: 128, 16>}, {transform_indices = @transform_1, window_bounds = array<i64: 128, 64>}]} {
    %c0 = arith.constant 0 : index
    %c0_0 = arith.constant 0 : index
    %0 = vector.load %arg1[%c0, %c0_0] : memref<128x16xf32, #tpu.memory_space<vmem>>, vector<128x16xf32>
    %1 = vector.shape_cast %0 : vector<128x16xf32> to vector<128x16x1xf32>
    %2 = vector.shape_cast %1 : vector<128x16x1xf32> to vector<128x16x1xf32>
    %3 = vector.broadcast %2 : vector<128x16x1xf32> to vector<128x16x2xf32>
    %4 = vector.shape_cast %3 : vector<128x16x2xf32> to vector<128x32xf32>
    %5 = tpu.concatenate %4, %4 in 1 : vector<128x32xf32>, vector<128x32xf32> -> vector<128x64xf32>
    %c0_1 = arith.constant 0 : index
    %c0_2 = arith.constant 0 : index
    %6 = vector.load %arg2[%c0_1, %c0_2] : memref<128x64xf32, #tpu.memory_space<vmem>>, vector<128x64xf32>
    tpu.vector_store %arg2[%c0_1, %c0_2], %5 {strides = array<i32>} : memref<128x64xf32, #tpu.memory_space<vmem>>, vector<128x64xf32>,
    return
  }
  func.func @transform_0(%arg0: i32) -> (i32, i32) {
    %c0_i32 = arith.constant 0 : i32
    %c0_i32_0 = arith.constant 0 : i32
    return %arg0, %c0_i32 : i32, i32
  }
  func.func @transform_1(%arg0: i32) -> (i32, i32) {
    %c0_i32 = arith.constant 0 : i32
    %c0_i32_0 = arith.constant 0 : i32
    return %arg0, %c0_i32 : i32, i32
  }
}

</mosaic_0001>

<bundles_post_ra>
// kernel: tpu_custom_call.1
= control target key start
LH: loop header
LB: loop body
LE: loop exit
PB: predicated region body
PF: predicated region fallthrough
CT: control target
= control target key end

     0   :  { %v24_v0 = vlaneseq  ;;  %v7119_v46 = vmov 1983009808   ;;  %s7122_s9 = smov 4   ;;  %s7123_s10 = smov 6   ;;  %vm6744_vm0 = vcmask 15360   ;;  %vm6761_vm1 = vcmask 31744   ;;  %s11398_s0 = inlined_call_operand.vmem [shape: f32[128,16], index: 0, kind: input, shape index: {}]   ;;  %s11399_s1 = inlined_call_operand.vmem [shape: f32[128,64], index: 1, kind: output, shape index: {}]  }
   0x1   :  { %v8_v2 = vld [vmem:[%s11398_s0] sm:$0xff]  ;;  %v9_v19 = vld [vmem:[%s11398_s0 + $0x8] sm:$0xff]  ;;  %v10_v28 = vld [vmem:[%s11398_s0 + $0x10] sm:$0xff]  ;;  %v1435_v47 = vunpack.c.l.s4 %v7119_v46  ;;  %s7124_s11 = smov 8   ;;  %s7125_s12 = smov 10   ;;  %vm6778_vm2 = vcmask 48128  }
   0x2   :  { %v7147_v1 = vshrl.u32 %v24_v0, 7  ;;  %v11_v37 = vld [vmem:[%s11398_s0 + $0x18] sm:$0xff]  ;;  %v7220_v53 = vld [vmem:[%s11398_s0 + $0x20] sm:$0xff]  ;;  %s7126_s13 = smov 12   ;;  %s7127_s14 = smov 14   ;;  %vm6795_vm3 = vcmask 64512  }
   0x3   :  { %v1436_v51 = vunpack.c.0.s8 %v1435_v47  ;;  %s7128_s15 = smov 16   ;;  %s7129_s16 = smov 18   ;;  %vm6812_vm4 = vcmask 80896   ;;  %vm6829_vm5 = vcmask 97280   ;;  %vm6846_vm6 = vcmask 113664  }
   0x4   :  { %v7153_v3 = vsub.s32 1, %v7147_v1  ;;  %v7156_v4 = vsub.s32 0, %v7147_v1  ;;  %v7161_v7 = vsub.s32 2, %v7147_v1  ;;  %v7165_v9 = vsub.s32 3, %v7147_v1  ;;  %s7130_s17 = smov 20   ;;  %s7131_s18 = smov 22  }
   0x5   :  { %v7169_v11 = vsub.s32 4, %v7147_v1  ;;  %v7173_v13 = vsub.s32 5, %v7147_v1  ;;  %v7177_v15 = vsub.s32 6, %v7147_v1  ;;  %v7181_v17 = vsub.s32 7, %v7147_v1  ;;  %s7132_s19 = smov 24   ;;  %s7133_s20 = smov 26  }
   0x6   :  { %v38_v5 = vrot.slane %v8_v2, %v7153_v3  ;;  %v27_v6 = vrot.slane %v8_v2, %v7156_v4  ;;  %v49_v8 = vrot.slane %v8_v2, %v7161_v7  ;;  %v60_v10 = vrot.slane %v8_v2, %v7165_v9  ;;  %s7134_s21 = smov 28   ;;  %s7135_s22 = smov 30  }
   0x7   :  { %v71_v12 = vrot.slane %v8_v2, %v7169_v11  ;;  %v82_v14 = vrot.slane %v8_v2, %v7173_v13  ;;  %v93_v16 = vrot.slane %v8_v2, %v7177_v15  ;;  %v104_v18 = vrot.slane %v8_v2, %v7181_v17  ;;  %s7136_s23 = smov 32  }
   0x8   :  { %40 = vbcast.lane.b32.xlu1 %v38_v5, 256  ;;  %29 = vbcast.lane.b32.xlu0 %v27_v6, 256  ;;  %v115_v20 = vrot.slane %v9_v19, %v7156_v4  ;;  %v126_v21 = vrot.slane %v9_v19, %v7153_v3  ;;  %v137_v22 = vrot.slane %v9_v19, %v7161_v7  ;;  %vm6863_vm7 = vcmask 130048  }
   0x9   :  { %v148_v23 = vrot.slane %v9_v19, %v7165_v9  ;;  %v159_v24 = vrot.slane %v9_v19, %v7169_v11  ;;  %v170_v25 = vrot.slane %v9_v19, %v7173_v13  ;;  %v181_v26 = vrot.slane %v9_v19, %v7177_v15 }
   0xa   :  { %v192_v27 = vrot.slane %v9_v19, %v7181_v17  ;;  %v203_v29 = vrot.slane %v10_v28, %v7156_v4  ;;  %v214_v30 = vrot.slane %v10_v28, %v7153_v3  ;;  %v225_v31 = vrot.slane %v10_v28, %v7161_v7 }
   0xb   :  { %v236_v32 = vrot.slane %v10_v28, %v7165_v9  ;;  %v247_v33 = vrot.slane %v10_v28, %v7169_v11  ;;  %v258_v34 = vrot.slane %v10_v28, %v7173_v13  ;;  %v269_v35 = vrot.slane %v10_v28, %v7177_v15 }
   0xc   :  { %44 = vbcast.lane.b32.xlu1 %v38_v5, 264  ;;  %33 = vbcast.lane.b32.xlu0 %v27_v6, 264  ;;  %v280_v36 = vrot.slane %v10_v28, %v7181_v17  ;;  %v291_v38 = vrot.slane %v11_v37, %v7156_v4  ;;  %v302_v39 = vrot.slane %v11_v37, %v7153_v3  ;;  %vm6880_vm8 = vcmask 146432  }
   0xd   :  { %v313_v40 = vrot.slane %v11_v37, %v7161_v7  ;;  %v324_v41 = vrot.slane %v11_v37, %v7165_v9  ;;  %v335_v42 = vrot.slane %v11_v37, %v7169_v11  ;;  %v346_v43 = vrot.slane %v11_v37, %v7173_v13 }
   0xe   :  { %v357_v48 = vrot.slane %v11_v37, %v7177_v15  ;;  %v368_v52 = vrot.slane %v11_v37, %v7181_v17  ;;  %v7223_v56 = vsub.s32 %v1436_v51, %v7147_v1  ;;  %v379_v59 = vrot.slane %v7220_v53, %v7156_v4 }
   0xf   :  { %v401_v28 = vrot.slane %v7220_v53, %v7161_v7  ;;  %vm6897_vm9 = vcmask 162816   ;;  %vm6914_vm10 = vcmask 179200   ;;  %vm6931_vm11 = vcmask 195584  }
  0x10   :  { %55 = vbcast.lane.b32.xlu1 %v49_v8, 264  ;;  %51 = vbcast.lane.b32.xlu0 %v49_v8, 256  ;;  %vm6948_vm12 = vcmask 211968   ;;  %vm6965_vm13 = vcmask 228352   ;;  %vm6982_vm14 = vcmask 244736   ;;  %vm7063_vm15 = vcmask 261120  }
  0x14   :  { %66 = vbcast.lane.b32.xlu1 %v60_v10, 264  ;;  %62 = vbcast.lane.b32.xlu0 %v60_v10, 256 }
  0x18   :  { %77 = vbcast.lane.b32.xlu1 %v71_v12, 264  ;;  %73 = vbcast.lane.b32.xlu0 %v71_v12, 256  ;;  %v390_v12 = vrot.slane %v7220_v53, %v7153_v3 }
  0x1c   :  { %88 = vbcast.lane.b32.xlu1 %v82_v14, 264  ;;  %84 = vbcast.lane.b32.xlu0 %v82_v14, 256 }
  0x20   :  { %99 = vbcast.lane.b32.xlu1 %v93_v16, 264  ;;  %95 = vbcast.lane.b32.xlu0 %v93_v16, 256 }
  0x24   :  { %110 = vbcast.lane.b32.xlu1 %v104_v18, 264  ;;  %106 = vbcast.lane.b32.xlu0 %v104_v18, 256 }
  0x28   :  { %121 = vbcast.lane.b32.xlu1 %v115_v20, 264  ;;  %117 = vbcast.lane.b32.xlu0 %v115_v20, 256 }
  0x2c   :  { %132 = vbcast.lane.b32.xlu1 %v126_v21, 264  ;;  %128 = vbcast.lane.b32.xlu0 %v126_v21, 256 }
  0x30   :  { %143 = vbcast.lane.b32.xlu1 %v137_v22, 264  ;;  %139 = vbcast.lane.b32.xlu0 %v137_v22, 256 }
  0x34   :  { %154 = vbcast.lane.b32.xlu1 %v148_v23, 264  ;;  %150 = vbcast.lane.b32.xlu0 %v148_v23, 256 }
  0x38   :  { %165 = vbcast.lane.b32.xlu1 %v159_v24, 264  ;;  %161 = vbcast.lane.b32.xlu0 %v159_v24, 256 }
  0x3c   :  { %176 = vbcast.lane.b32.xlu1 %v170_v25, 264  ;;  %172 = vbcast.lane.b32.xlu0 %v170_v25, 256 }
  0x40   :  { %187 = vbcast.lane.b32.xlu1 %v181_v26, 264  ;;  %183 = vbcast.lane.b32.xlu0 %v181_v26, 256 }
  0x44   :  { %198 = vbcast.lane.b32.xlu1 %v192_v27, 264  ;;  %194 = vbcast.lane.b32.xlu0 %v192_v27, 256 }
  0x48   :  { %209 = vbcast.lane.b32.xlu1 %v203_v29, 264  ;;  %205 = vbcast.lane.b32.xlu0 %v203_v29, 256 }
  0x4c   :  { %220 = vbcast.lane.b32.xlu1 %v214_v30, 264  ;;  %216 = vbcast.lane.b32.xlu0 %v214_v30, 256 }
  0x50   :  { %231 = vbcast.lane.b32.xlu1 %v225_v31, 264  ;;  %227 = vbcast.lane.b32.xlu0 %v225_v31, 256  ;;  %v7120_v31 = vmov 1934713408  }
  0x54   :  { %242 = vbcast.lane.b32.xlu1 %v236_v32, 264  ;;  %238 = vbcast.lane.b32.xlu0 %v236_v32, 256  ;;  %v1499_v32 = vunpack.c.l.s4 %v7120_v31 }
  0x58   :  { %253 = vbcast.lane.b32.xlu1 %v247_v33, 264  ;;  %249 = vbcast.lane.b32.xlu0 %v247_v33, 256  ;;  %v412_v33 = vrot.slane %v7220_v53, %v7165_v9 }
  0x5c   :  { %264 = vbcast.lane.b32.xlu1 %v258_v34, 264  ;;  %260 = vbcast.lane.b32.xlu0 %v258_v34, 256 }
  0x60   :  { %275 = vbcast.lane.b32.xlu1 %v269_v35, 264  ;;  %271 = vbcast.lane.b32.xlu0 %v269_v35, 256 }
  0x64   :  { %286 = vbcast.lane.b32.xlu1 %v280_v36, 264  ;;  %282 = vbcast.lane.b32.xlu0 %v280_v36, 256 }
  0x68   :  { %297 = vbcast.lane.b32.xlu1 %v291_v38, 264  ;;  %293 = vbcast.lane.b32.xlu0 %v291_v38, 256  ;;  %v1500_v38 = vunpack.c.0.s8 %v1499_v32 }
  0x6c   :  { %308 = vbcast.lane.b32.xlu1 %v302_v39, 264  ;;  %304 = vbcast.lane.b32.xlu0 %v302_v39, 256  ;;  %v423_v39 = vrot.slane %v7220_v53, %v7169_v11 }
  0x70   :  { %319 = vbcast.lane.b32.xlu1 %v313_v40, 264  ;;  %315 = vbcast.lane.b32.xlu0 %v313_v40, 256 }
  0x74   :  { %330 = vbcast.lane.b32.xlu1 %v324_v41, 264  ;;  %326 = vbcast.lane.b32.xlu0 %v324_v41, 256 }
  0x78   :  { %341 = vbcast.lane.b32.xlu1 %v335_v42, 264  ;;  %337 = vbcast.lane.b32.xlu0 %v335_v42, 256 }
  0x7a   :  { %v41_v44 = vpop.permute.xlu1 %40  ;;  %v30_v45 = vpop.permute.xlu0 %29 }
  0x7c   :  { %352 = vbcast.lane.b32.xlu1 %v346_v43, 264  ;;  %348 = vbcast.lane.b32.xlu0 %v346_v43, 256 }
  0x7e   :  { %v45_v49 = vpop.permute.xlu1 %44  ;;  %v34_v50 = vpop.permute.xlu0 %33 }
  0x80   :  { %363 = vbcast.lane.b32.xlu1 %v357_v48, 264  ;;  %359 = vbcast.lane.b32.xlu0 %v357_v48, 256 }
  0x82   :  { %v56_v54 = vpop.permute.xlu1 %55  ;;  %v52_v55 = vpop.permute.xlu0 %51 }
  0x83   :  { %v3608_v57 = vcombine.low %v34_v50, %v56_v54  ;;  %v3609_v58 = vcombine.high %v34_v50, %v56_v54  ;;  %v1432_v60 = vcombine.low %v30_v45, %v52_v55  ;;  %v1433_v61 = vcombine.high %v30_v45, %v52_v55 }
  0x84   :  { %374 = vbcast.lane.b32.xlu1 %v368_v52, 264  ;;  %370 = vbcast.lane.b32.xlu0 %v368_v52, 256  ;;  %v7274_v50 = vsub.s32 %v1500_v38, %v7147_v1  ;;  %v434_v52 = vrot.slane %v7220_v53, %v7173_v13 }
  0x85   :  { %v7228_v8 = vrot.slane %v3608_v57, %v7223_v56  ;;  %v7231_v10 = vrot.slane %v3609_v58, %v7223_v56  ;;  %v7248_v20 = vrot.slane %v1432_v60, %v7223_v56  ;;  %v7251_v21 = vrot.slane %v1433_v61, %v7223_v56 }
  0x86   :  { %v67_v62 = vpop.permute.xlu1 %66  ;;  %v63_v63 = vpop.permute.xlu0 %62 }
  0x87   :  { %v3624_v0 = vcombine.low %v45_v49, %v67_v62  ;;  %v3625_v2 = vcombine.high %v45_v49, %v67_v62  ;;  %v1448_v5 = vcombine.low %v41_v44, %v63_v63  ;;  %v1449_v6 = vcombine.high %v41_v44, %v63_v63  ;;  %11809 = vst [vmem:[#allocation2_spill] sm:$0xff] %v7228_v8 }
  0x88   :  { %11810 = vst [vmem:[#allocation3_spill] sm:$0xff] %v7231_v10  ;;  %385 = vbcast.lane.b32.xlu1 %v379_v59, 264  ;;  %381 = vbcast.lane.b32.xlu0 %v379_v59, 256  ;;  %11814 = vst [vmem:[#allocation7_spill] sm:$0xff] %v7251_v21 }
  0x89   :  { %v7236_v14 = vrot.slane %v3624_v0, %v7223_v56  ;;  %v7239_v16 = vrot.slane %v3625_v2, %v7223_v56  ;;  %v7242_v18 = vrot.slane %v1448_v5, %v7223_v56  ;;  %v7245_v19 = vrot.slane %v1449_v6, %v7223_v56 }
  0x8a   :  { %v78_v22 = vpop.permute.xlu1 %77  ;;  %v74_v23 = vpop.permute.xlu0 %73  ;;  %v445_v6 = vrot.slane %v7220_v53, %v7177_v15 }
  0x8b   :  { %11811 = vst [vmem:[#allocation4_spill] sm:$0xff] %v7236_v14  ;;  %11812 = vst [vmem:[#allocation5_spill] sm:$0xff] %v7239_v16  ;;  %v3673_v24 = vcombine.high %v7228_v8, %v7236_v14  ;;  %v3689_v25 = vcombine.high %v7231_v10, %v7239_v16  ;;  %v1497_v26 = vcombine.high %v7248_v20, %v7242_v18 }
  0x8c   :  { %11813 = vst [vmem:[#allocation6_spill] sm:$0xff] %v7245_v19  ;;  %v1513_v27 = vcombine.high %v7251_v21, %v7245_v19  ;;  %396 = vbcast.lane.b32.xlu1 %v390_v12, 264  ;;  %392 = vbcast.lane.b32.xlu0 %v390_v12, 256  ;;  %v1496_v51 = vcombine.low %v7248_v20, %v7242_v18 }
  0x8d   :  { %v7306_v18 = vrot.slane %v3673_v24, %v7274_v50 }
  0x8e   :  { %v89_v29 = vpop.permute.xlu1 %88  ;;  %v85_v30 = vpop.permute.xlu0 %84  ;;  %v7303_v12 = vrot.slane %v1496_v51, %v7274_v50  ;;  %v7324_v24 = vrot.slane %v1513_v27, %v7274_v50  ;;  %v7339_v27 = vld [vmem:[%s11398_s0 + $0x28] sm:$0xff] }
  0x8f   :  { %11822 = vst [vmem:[#allocation15_spill] sm:$0xff] %v7306_v18 }
  0x90   :  { %407 = vbcast.lane.b32.xlu1 %v401_v28, 264  ;;  %403 = vbcast.lane.b32.xlu0 %v401_v28, 256  ;;  %11821 = vst [vmem:[#allocation14_spill] sm:$0xff] %v7303_v12  ;;  %11826 = vst [vmem:[#allocation19_spill] sm:$0xff] %v7324_v24 }
  0x92   :  { %v100_v34 = vpop.permute.xlu1 %99  ;;  %v96_v35 = vpop.permute.xlu0 %95 }
  0x93   :  { %v3640_v36 = vcombine.low %v78_v22, %v100_v34  ;;  %v3641_v37 = vcombine.high %v78_v22, %v100_v34  ;;  %v1464_v42 = vcombine.low %v74_v23, %v96_v35  ;;  %v1465_v43 = vcombine.high %v74_v23, %v96_v35 }
  0x94   :  { %418 = vbcast.lane.b32.xlu1 %v412_v33, 264  ;;  %414 = vbcast.lane.b32.xlu0 %v412_v33, 256  ;;  %v456_v33 = vrot.slane %v7220_v53, %v7181_v17  ;;  %v511_v34 = vrot.slane %v7339_v27, %v7169_v11 }
  0x95   :  { %v7268_v40 = vrot.slane %v3640_v36, %v7223_v56  ;;  %v7271_v41 = vrot.slane %v3641_v37, %v7223_v56  ;;  %v1472_v1 = vrot.slane %v1464_v42, %v7223_v56  ;;  %v7292_v59 = vrot.slane %v1465_v43, %v7223_v56 }
  0x96   :  { %v111_v44 = vpop.permute.xlu1 %110  ;;  %v107_v45 = vpop.permute.xlu0 %106  ;;  %v7351_v42 = vrot.slane %v3689_v25, %v7274_v50 }
  0x97   :  { %11815 = vst [vmem:[#allocation8_spill] sm:$0xff] %v7268_v40  ;;  %11816 = vst [vmem:[#allocation9_spill] sm:$0xff] %v7271_v41  ;;  %v3656_v46 = vcombine.low %v89_v29, %v111_v44  ;;  %v3657_v47 = vcombine.high %v89_v29, %v111_v44  ;;  %v1480_v48 = vcombine.low %v85_v30, %v107_v45 }
  0x98   :  { %v1481_v49 = vcombine.high %v85_v30, %v107_v45  ;;  %429 = vbcast.lane.b32.xlu1 %v423_v39, 264  ;;  %425 = vbcast.lane.b32.xlu0 %v423_v39, 256  ;;  %11820 = vst [vmem:[#allocation13_spill] sm:$0xff] %v7292_v59  ;;  %v7315_v29 = vrot.slane %v1497_v26, %v7274_v50  ;;  %11827 = vst [vmem:[#allocation20_spill] sm:$0xff] %v7351_v42 }
  0x99   :  { %v7281_v54 = vrot.slane %v3656_v46, %v7223_v56  ;;  %v7284_v55 = vrot.slane %v3657_v47, %v7223_v56  ;;  %v1488_v57 = vrot.slane %v1480_v48, %v7223_v56  ;;  %v467_v46 = vrot.slane %v7339_v27, %v7156_v4 }
  0x9a   :  { %v7288_v58 = vrot.slane %v1481_v49, %v7223_v56  ;;  %v122_v60 = vpop.permute.xlu1 %121  ;;  %v118_v61 = vpop.permute.xlu0 %117 }
  0x9b   :  { %11817 = vst [vmem:[#allocation10_spill] sm:$0xff] %v7281_v54  ;;  %11818 = vst [vmem:[#allocation11_spill] sm:$0xff] %v7284_v55  ;;  %v3705_v62 = vcombine.high %v7268_v40, %v7281_v54  ;;  %v3721_v63 = vcombine.high %v7271_v41, %v7284_v55  ;;  %v1528_v0 = vcombine.low %v1472_v1, %v1488_v57 }
  0x9c   :  { %11819 = vst [vmem:[#allocation12_spill] sm:$0xff] %v7288_v58  ;;  %v1529_v2 = vcombine.high %v1472_v1, %v1488_v57  ;;  %v1545_v5 = vcombine.high %v7292_v59, %v7288_v58  ;;  %440 = vbcast.lane.b32.xlu1 %v434_v52, 264  ;;  %436 = vbcast.lane.b32.xlu0 %v434_v52, 256 }
  0x9d   :  { %v7309_v20 = vrot.slane %v3705_v62, %v7274_v50  ;;  %v7312_v28 = vrot.slane %v1528_v0, %v7274_v50  ;;  %v7354_v43 = vrot.slane %v3721_v63, %v7274_v50 }
  0x9e   :  { %v133_v22 = vpop.permute.xlu1 %132  ;;  %v129_v23 = vpop.permute.xlu0 %128  ;;  %v7318_v30 = vrot.slane %v1529_v2, %v7274_v50  ;;  %v7321_v31 = vrot.slane %v1545_v5, %v7274_v50  ;;  %v478_v2 = vrot.slane %v7339_v27, %v7153_v3 }
  0x9f   :  { %11823 = vst [vmem:[#allocation16_spill] sm:$0xff] %v7309_v20  ;;  %11824 = vst [vmem:[#allocation17_spill] sm:$0xff] %v7312_v28 }
  0xa0   :  { %11825 = vst [vmem:[#allocation18_spill] sm:$0xff] %v7321_v31  ;;  %451 = vbcast.lane.b32.xlu1 %v445_v6, 264  ;;  %447 = vbcast.lane.b32.xlu0 %v445_v6, 256  ;;  %11828 = vst [vmem:[#allocation21_spill] sm:$0xff] %v7354_v43 }
  0xa2   :  { %v144_v37 = vpop.permute.xlu1 %143  ;;  %v140_v38 = vpop.permute.xlu0 %139 }
  0xa3   :  { %v3744_v44 = vcombine.low %v122_v60, %v144_v37  ;;  %v3745_v45 = vcombine.high %v122_v60, %v144_v37  ;;  %v1568_v51 = vcombine.low %v118_v61, %v140_v38  ;;  %v1569_v52 = vcombine.high %v118_v61, %v140_v38 }
  0xa4   :  { %462 = vbcast.lane.b32.xlu1 %v456_v33, 264  ;;  %458 = vbcast.lane.b32.xlu0 %v456_v33, 256 }
  0xa5   :  { %v7363_v49 = vrot.slane %v3744_v44, %v7223_v56  ;;  %v7366_v25 = vrot.slane %v3745_v45, %v7223_v56 }
  0xa6   :  { %v155_v57 = vpop.permute.xlu1 %154  ;;  %v151_v1 = vpop.permute.xlu0 %150 }
  0xa7   :  { %11829 = vst [vmem:[#allocation22_spill] sm:$0xff] %v7363_v49  ;;  %11830 = vst [vmem:[#allocation23_spill] sm:$0xff] %v7366_v25  ;;  %v3760_v60 = vcombine.low %v133_v22, %v155_v57  ;;  %v3761_v62 = vcombine.high %v133_v22, %v155_v57  ;;  %v1584_v63 = vcombine.low %v129_v23, %v151_v1 }
  0xa8   :  { %v1585_v0 = vcombine.high %v129_v23, %v151_v1  ;;  %473 = vbcast.lane.b32.xlu1 %v467_v46, 264  ;;  %469 = vbcast.lane.b32.xlu0 %v467_v46, 256  ;;  %v1576_v22 = vrot.slane %v1568_v51, %v7223_v56  ;;  %v7384_v23 = vrot.slane %v1569_v52, %v7223_v56 }
  0xa9   :  { %v7371_v5 = vrot.slane %v3760_v60, %v7223_v56  ;;  %v7374_v6 = vrot.slane %v3761_v62, %v7223_v56  ;;  %v7377_v33 = vrot.slane %v1584_v63, %v7223_v56  ;;  %v489_v46 = vrot.slane %v7339_v27, %v7161_v7 }
  0xaa   :  { %v7380_v61 = vrot.slane %v1585_v0, %v7223_v56  ;;  %11834 = vst [vmem:[#allocation27_spill] sm:$0xff] %v7384_v23  ;;  %v166_v37 = vpop.permute.xlu1 %165  ;;  %v162_v38 = vpop.permute.xlu0 %161  ;;  %v500_v60 = vrot.slane %v7339_v27, %v7165_v9 }
  0xab   :  { %11831 = vst [vmem:[#allocation24_spill] sm:$0xff] %v7371_v5  ;;  %11832 = vst [vmem:[#allocation25_spill] sm:$0xff] %v7374_v6  ;;  %v3809_v44 = vcombine.high %v7363_v49, %v7371_v5  ;;  %v1633_v57 = vcombine.high %v1576_v22, %v7377_v33 }
  0xac   :  { %11833 = vst [vmem:[#allocation26_spill] sm:$0xff] %v7380_v61  ;;  %v1649_v1 = vcombine.high %v7384_v23, %v7380_v61  ;;  %484 = vbcast.lane.b32.xlu1 %v478_v2, 264  ;;  %480 = vbcast.lane.b32.xlu0 %v478_v2, 256 }
  0xae   :  { %v177_v51 = vpop.permute.xlu1 %176  ;;  %v173_v52 = vpop.permute.xlu0 %172 }
  0xb0   :  { %495 = vbcast.lane.b32.xlu1 %v489_v46, 264  ;;  %491 = vbcast.lane.b32.xlu0 %v489_v46, 256 }
  0xb2   :  { %v188_v62 = vpop.permute.xlu1 %187  ;;  %v184_v63 = vpop.permute.xlu0 %183 }
  0xb3   :  { %v3776_v0 = vcombine.low %v166_v37, %v188_v62  ;;  %v3777_v48 = vcombine.high %v166_v37, %v188_v62  ;;  %v1600_v39 = vcombine.low %v162_v38, %v184_v63  ;;  %v1601_v32 = vcombine.high %v162_v38, %v184_v63 }
  0xb4   :  { %506 = vbcast.lane.b32.xlu1 %v500_v60, 264  ;;  %502 = vbcast.lane.b32.xlu0 %v500_v60, 256  ;;  %v1632_v37 = vcombine.low %v1576_v22, %v7377_v33  ;;  %v522_v60 = vrot.slane %v7339_v27, %v7173_v13 }
  0xb5   :  { %v7400_v47 = vrot.slane %v3776_v0, %v7223_v56  ;;  %v7403_v2 = vrot.slane %v3777_v48, %v7223_v56 }
  0xb6   :  { %v199_v53 = vpop.permute.xlu1 %198  ;;  %v195_v36 = vpop.permute.xlu0 %194 }
  0xb7   :  { %11835 = vst [vmem:[#allocation28_spill] sm:$0xff] %v7400_v47  ;;  %11836 = vst [vmem:[#allocation29_spill] sm:$0xff] %v7403_v2  ;;  %v3792_v46 = vcombine.low %v177_v51, %v199_v53  ;;  %v3793_v35 = vcombine.high %v177_v51, %v199_v53  ;;  %v1616_v26 = vcombine.low %v173_v52, %v195_v36 }
  0xb8   :  { %v1617_v45 = vcombine.high %v173_v52, %v195_v36  ;;  %517 = vbcast.lane.b32.xlu1 %v511_v34, 264  ;;  %513 = vbcast.lane.b32.xlu0 %v511_v34, 256  ;;  %v1608_v36 = vrot.slane %v1600_v39, %v7223_v56  ;;  %v7420_v53 = vrot.slane %v1601_v32, %v7223_v56 }
  0xb9   :  { %v7409_v62 = vrot.slane %v3792_v46, %v7223_v56  ;;  %v7412_v48 = vrot.slane %v3793_v35, %v7223_v56  ;;  %v1624_v38 = vrot.slane %v1616_v26, %v7223_v56  ;;  %v7427_v52 = vrot.slane %v3809_v44, %v7274_v50 }
  0xba   :  { %v7416_v63 = vrot.slane %v1617_v45, %v7223_v56  ;;  %11840 = vst [vmem:[#allocation33_spill] sm:$0xff] %v7420_v53  ;;  %v210_v33 = vpop.permute.xlu1 %209  ;;  %v206_v22 = vpop.permute.xlu0 %205  ;;  %v533_v32 = vrot.slane %v7339_v27, %v7177_v15  ;;  %v7434_v39 = vrot.slane %v1632_v37, %v7274_v50  ;;  %v544_v37 = vrot.slane %v7339_v27, %v7181_v17 }
  0xbb   :  { %11837 = vst [vmem:[#allocation30_spill] sm:$0xff] %v7409_v62  ;;  %11838 = vst [vmem:[#allocation31_spill] sm:$0xff] %v7412_v48  ;;  %v3841_v51 = vcombine.high %v7400_v47, %v7409_v62  ;;  %v3857_v35 = vcombine.high %v7403_v2, %v7412_v48  ;;  %v1664_v26 = vcombine.low %v1608_v36, %v1624_v38 }
  0xbc   :  { %11839 = vst [vmem:[#allocation32_spill] sm:$0xff] %v7416_v63  ;;  %11841 = vst [vmem:[#allocation34_spill] sm:$0xff] %v7427_v52  ;;  %v1665_v45 = vcombine.high %v1608_v36, %v1624_v38  ;;  %v1681_v34 = vcombine.high %v7420_v53, %v7416_v63  ;;  %528 = vbcast.lane.b32.xlu1 %v522_v60, 264  ;;  %524 = vbcast.lane.b32.xlu0 %v522_v60, 256 }
  0xbd   :  { %11842 = vst [vmem:[#allocation35_spill] sm:$0xff] %v7434_v39  ;;  %v7437_v0 = vrot.slane %v3841_v51, %v7274_v50  ;;  %v7440_v44 = vrot.slane %v1664_v26, %v7274_v50  ;;  %v7443_v38 = vrot.slane %v1633_v57, %v7274_v50  ;;  %v7454_v60 = vrot.slane %v1649_v1, %v7274_v50  ;;  %v7473_v1 = vld [vmem:[%s11398_s0 + $0x30] sm:$0xff] }
  0xbe   :  { %v221_v46 = vpop.permute.xlu1 %220  ;;  %v217_v43 = vpop.permute.xlu0 %216  ;;  %v7446_v36 = vrot.slane %v1665_v45, %v7274_v50  ;;  %v7449_v42 = vrot.slane %v1681_v34, %v7274_v50  ;;  %v11849_v27 = vcombine.high %v7366_v25, %v7374_v6  ;;  %v555_v25 = vrot.slane %v7473_v1, %v7156_v4 }
  0xbf   :  { %11843 = vst [vmem:[#allocation36_spill] sm:$0xff] %v7437_v0  ;;  %11844 = vst [vmem:[#allocation37_spill] sm:$0xff] %v7440_v44  ;;  %v566_v57 = vrot.slane %v7473_v1, %v7153_v3  ;;  %v599_v52 = vrot.slane %v7473_v1, %v7169_v11 }
  0xc0   :  { %11845 = vst [vmem:[#allocation38_spill] sm:$0xff] %v7443_v38  ;;  %11846 = vst [vmem:[#allocation39_spill] sm:$0xff] %v7446_v36  ;;  %539 = vbcast.lane.b32.xlu1 %v533_v32, 264  ;;  %v7468_v34 = vrot.slane %v11849_v27, %v7274_v50  ;;  %535 = vbcast.lane.b32.xlu0 %v533_v32, 256  ;;  %v7482_v27 = vrot.slane %v3857_v35, %v7274_v50 }
  0xc1   :  { %11847 = vst [vmem:[#allocation40_spill] sm:$0xff] %v7449_v42  ;;  %11848 = vst [vmem:[#allocation41_spill] sm:$0xff] %v7454_v60 }
  0xc2   :  { %11850 = vst [vmem:[#allocation42_spill] sm:$0xff] %v7468_v34  ;;  %v232_v26 = vpop.permute.xlu1 %231  ;;  %v228_v45 = vpop.permute.xlu0 %227  ;;  %11851 = vst [vmem:[#allocation43_spill] sm:$0xff] %v7482_v27 }
  0xc3   :  { %v3880_v32 = vcombine.low %v210_v33, %v232_v26  ;;  %v3881_v48 = vcombine.high %v210_v33, %v232_v26  ;;  %v1704_v35 = vcombine.low %v206_v22, %v228_v45  ;;  %v1705_v10 = vcombine.high %v206_v22, %v228_v45 }
  0xc4   :  { %550 = vbcast.lane.b32.xlu1 %v544_v37, 264  ;;  %546 = vbcast.lane.b32.xlu0 %v544_v37, 256 }
  0xc5   :  { %v7491_v6 = vrot.slane %v3880_v32, %v7223_v56  ;;  %v7494_v2 = vrot.slane %v3881_v48, %v7223_v56 }
  0xc6   :  { %v243_v33 = vpop.permute.xlu1 %242  ;;  %v239_v26 = vpop.permute.xlu0 %238 }
  0xc7   :  { %11852 = vst [vmem:[#allocation44_spill] sm:$0xff] %v7491_v6  ;;  %11853 = vst [vmem:[#allocation45_spill] sm:$0xff] %v7494_v2  ;;  %v3896_v16 = vcombine.low %v221_v46, %v243_v33  ;;  %v3897_v41 = vcombine.high %v221_v46, %v243_v33  ;;  %v1720_v55 = vcombine.low %v217_v43, %v239_v26 }
  0xc8   :  { %v1721_v0 = vcombine.high %v217_v43, %v239_v26  ;;  %561 = vbcast.lane.b32.xlu1 %v555_v25, 264  ;;  %557 = vbcast.lane.b32.xlu0 %v555_v25, 256  ;;  %v1712_v46 = vrot.slane %v1704_v35, %v7223_v56  ;;  %v7512_v43 = vrot.slane %v1705_v10, %v7223_v56 }
  0xc9   :  { %v7499_v37 = vrot.slane %v3896_v16, %v7223_v56  ;;  %v7502_v32 = vrot.slane %v3897_v41, %v7223_v56  ;;  %v7505_v48 = vrot.slane %v1720_v55, %v7223_v56  ;;  %v577_v25 = vrot.slane %v7473_v1, %v7161_v7 }
  0xca   :  { %v7508_v22 = vrot.slane %v1721_v0, %v7223_v56  ;;  %11857 = vst [vmem:[#allocation49_spill] sm:$0xff] %v7512_v43  ;;  %v254_v45 = vpop.permute.xlu1 %253  ;;  %v250_v33 = vpop.permute.xlu0 %249  ;;  %v588_v26 = vrot.slane %v7473_v1, %v7165_v9 }
  0xcb   :  { %11854 = vst [vmem:[#allocation46_spill] sm:$0xff] %v7499_v37  ;;  %11855 = vst [vmem:[#allocation47_spill] sm:$0xff] %v7502_v32  ;;  %v3945_v16 = vcombine.high %v7491_v6, %v7499_v37  ;;  %v1769_v55 = vcombine.high %v1712_v46, %v7505_v48 }
  0xcc   :  { %11856 = vst [vmem:[#allocation48_spill] sm:$0xff] %v7508_v22  ;;  %v1785_v0 = vcombine.high %v7512_v43, %v7508_v22  ;;  %572 = vbcast.lane.b32.xlu1 %v566_v57, 264  ;;  %568 = vbcast.lane.b32.xlu0 %v566_v57, 256 }
  0xce   :  { %v265_v10 = vpop.permute.xlu1 %264  ;;  %v261_v35 = vpop.permute.xlu0 %260 }
  0xd0   :  { %583 = vbcast.lane.b32.xlu1 %v577_v25, 264  ;;  %579 = vbcast.lane.b32.xlu0 %v577_v25, 256 }
  0xd2   :  { %v276_v51 = vpop.permute.xlu1 %275  ;;  %v272_v27 = vpop.permute.xlu0 %271 }
  0xd3   :  { %v3912_v41 = vcombine.low %v254_v45, %v276_v51  ;;  %v3913_v34 = vcombine.high %v254_v45, %v276_v51  ;;  %v1736_v18 = vcombine.low %v250_v33, %v272_v27  ;;  %v1737_v47 = vcombine.high %v250_v33, %v272_v27 }
  0xd4   :  { %594 = vbcast.lane.b32.xlu1 %v588_v26, 264  ;;  %590 = vbcast.lane.b32.xlu0 %v588_v26, 256  ;;  %v1768_v51 = vcombine.low %v1712_v46, %v7505_v48  ;;  %v610_v45 = vrot.slane %v7473_v1, %v7173_v13 }
  0xd5   :  { %v7528_v20 = vrot.slane %v3912_v41, %v7223_v56  ;;  %v7531_v57 = vrot.slane %v3913_v34, %v7223_v56 }
  0xd6   :  { %v287_v62 = vpop.permute.xlu1 %286  ;;  %v283_v49 = vpop.permute.xlu0 %282 }
  0xd7   :  { %11858 = vst [vmem:[#allocation50_spill] sm:$0xff] %v7528_v20  ;;  %11859 = vst [vmem:[#allocation51_spill] sm:$0xff] %v7531_v57  ;;  %v3928_v25 = vcombine.low %v265_v10, %v287_v62  ;;  %v3929_v5 = vcombine.high %v265_v10, %v287_v62  ;;  %v1752_v6 = vcombine.low %v261_v35, %v283_v49 }
  0xd8   :  { %v1753_v37 = vcombine.high %v261_v35, %v283_v49  ;;  %605 = vbcast.lane.b32.xlu1 %v599_v52, 264  ;;  %601 = vbcast.lane.b32.xlu0 %v599_v52, 256  ;;  %v1744_v49 = vrot.slane %v1736_v18, %v7223_v56  ;;  %v7548_v62 = vrot.slane %v1737_v47, %v7223_v56 }
  0xd9   :  { %v7537_v41 = vrot.slane %v3928_v25, %v7223_v56  ;;  %v7540_v34 = vrot.slane %v3929_v5, %v7223_v56  ;;  %v1760_v27 = vrot.slane %v1752_v6, %v7223_v56  ;;  %v7555_v35 = vrot.slane %v3945_v16, %v7274_v50 }
  0xda   :  { %v7544_v33 = vrot.slane %v1753_v37, %v7223_v56  ;;  %11863 = vst [vmem:[#allocation55_spill] sm:$0xff] %v7548_v62  ;;  %v298_v48 = vpop.permute.xlu1 %297  ;;  %v294_v46 = vpop.permute.xlu0 %293  ;;  %v621_v18 = vrot.slane %v7473_v1, %v7177_v15  ;;  %v7562_v47 = vrot.slane %v1768_v51, %v7274_v50  ;;  %v632_v51 = vrot.slane %v7473_v1, %v7181_v17 }
  0xdb   :  { %11860 = vst [vmem:[#allocation52_spill] sm:$0xff] %v7537_v41  ;;  %11861 = vst [vmem:[#allocation53_spill] sm:$0xff] %v7540_v34  ;;  %v3977_v10 = vcombine.high %v7528_v20, %v7537_v41  ;;  %v3993_v5 = vcombine.high %v7531_v57, %v7540_v34  ;;  %v1800_v6 = vcombine.low %v1744_v49, %v1760_v27 }
  0xdc   :  { %11862 = vst [vmem:[#allocation54_spill] sm:$0xff] %v7544_v33  ;;  %11864 = vst [vmem:[#allocation56_spill] sm:$0xff] %v7555_v35  ;;  %v1801_v37 = vcombine.high %v1744_v49, %v1760_v27  ;;  %v1817_v52 = vcombine.high %v7548_v62, %v7544_v33  ;;  %616 = vbcast.lane.b32.xlu1 %v610_v45, 264  ;;  %612 = vbcast.lane.b32.xlu0 %v610_v45, 256 }
  0xdd   :  { %11865 = vst [vmem:[#allocation57_spill] sm:$0xff] %v7562_v47  ;;  %v7565_v26 = vrot.slane %v3977_v10, %v7274_v50  ;;  %v7568_v16 = vrot.slane %v1800_v6, %v7274_v50  ;;  %v7571_v27 = vrot.slane %v1769_v55, %v7274_v50  ;;  %v7582_v45 = vrot.slane %v1785_v0, %v7274_v50  ;;  %v7601_v0 = vld [vmem:[%s11398_s0 + $0x38] sm:$0xff] }
  0xde   :  { %v309_v25 = vpop.permute.xlu1 %308  ;;  %v305_v57 = vpop.permute.xlu0 %304  ;;  %v7574_v49 = vrot.slane %v1801_v37, %v7274_v50  ;;  %v7577_v34 = vrot.slane %v1817_v52, %v7274_v50  ;;  %v11870_v1 = vcombine.high %v7494_v2, %v7502_v32  ;;  %v643_v32 = vrot.slane %v7601_v0, %v7156_v4 }
  0xdf   :  { %11866 = vst [vmem:[#allocation58_spill] sm:$0xff] %v7565_v26  ;;  %11867 = vst [vmem:[#allocation59_spill] sm:$0xff] %v7568_v16  ;;  %v654_v10 = vrot.slane %v7601_v0, %v7153_v3 }
  0xe0   :  { %11868 = vst [vmem:[#allocation60_spill] sm:$0xff] %v7577_v34  ;;  %11869 = vst [vmem:[#allocation61_spill] sm:$0xff] %v7582_v45  ;;  %627 = vbcast.lane.b32.xlu1 %v621_v18, 264  ;;  %v7596_v52 = vrot.slane %v11870_v1, %v7274_v50  ;;  %623 = vbcast.lane.b32.xlu0 %v621_v18, 256  ;;  %v7610_v1 = vrot.slane %v3993_v5, %v7274_v50 }
  0xe2   :  { %11871 = vst [vmem:[#allocation62_spill] sm:$0xff] %v7596_v52  ;;  %v320_v55 = vpop.permute.xlu1 %319  ;;  %v316_v37 = vpop.permute.xlu0 %315  ;;  %11872 = vst [vmem:[#allocation63_spill] sm:$0xff] %v7610_v1 }
  0xe3   :  { %v4016_v18 = vcombine.low %v298_v48, %v320_v55  ;;  %v4017_v2 = vcombine.high %v298_v48, %v320_v55  ;;  %v1840_v5 = vcombine.low %v294_v46, %v316_v37  ;;  %v1841_v26 = vcombine.high %v294_v46, %v316_v37 }
  0xe4   :  { %638 = vbcast.lane.b32.xlu1 %v632_v51, 264  ;;  %634 = vbcast.lane.b32.xlu0 %v632_v51, 256 }
  0xe5   :  { %v7619_v41 = vrot.slane %v4016_v18, %v7223_v56  ;;  %v7622_v20 = vrot.slane %v4017_v2, %v7223_v56 }
  0xe6   :  { %v331_v48 = vpop.permute.xlu1 %330  ;;  %v327_v55 = vpop.permute.xlu0 %326 }
  0xe7   :  { %11873 = vst [vmem:[#allocation64_spill] sm:$0xff] %v7619_v41  ;;  %11874 = vst [vmem:[#allocation65_spill] sm:$0xff] %v7622_v20  ;;  %v4032_v35 = vcombine.low %v309_v25, %v331_v48  ;;  %v4033_v8 = vcombine.high %v309_v25, %v331_v48  ;;  %v1856_v14 = vcombine.low %v305_v57, %v327_v55 }
  0xe8   :  { %v1857_v40 = vcombine.high %v305_v57, %v327_v55  ;;  %649 = vbcast.lane.b32.xlu1 %v643_v32, 264  ;;  %645 = vbcast.lane.b32.xlu0 %v643_v32, 256  ;;  %v1848_v25 = vrot.slane %v1840_v5, %v7223_v56  ;;  %v7638_v57 = vrot.slane %v1841_v26, %v7223_v56 }
  0xe9   :  { %v7627_v51 = vrot.slane %v4032_v35, %v7223_v56  ;;  %v7630_v18 = vrot.slane %v4033_v8, %v7223_v56  ;;  %v1864_v2 = vrot.slane %v1856_v14, %v7223_v56  ;;  %v676_v5 = vrot.slane %v7601_v0, %v7165_v9 }
  0xea   :  { %v7634_v46 = vrot.slane %v1857_v40, %v7223_v56  ;;  %11878 = vst [vmem:[#allocation69_spill] sm:$0xff] %v7638_v57  ;;  %v342_v37 = vpop.permute.xlu1 %341  ;;  %v338_v48 = vpop.permute.xlu0 %337  ;;  %v665_v40 = vrot.slane %v7601_v0, %v7161_v7 }
  0xeb   :  { %11875 = vst [vmem:[#allocation66_spill] sm:$0xff] %v7627_v51  ;;  %11876 = vst [vmem:[#allocation67_spill] sm:$0xff] %v7630_v18  ;;  %v4081_v35 = vcombine.high %v7619_v41, %v7627_v51  ;;  %v1905_v55 = vcombine.high %v1848_v25, %v1864_v2  ;;  %v687_v41 = vrot.slane %v7601_v0, %v7169_v11 }
  0xec   :  { %11877 = vst [vmem:[#allocation68_spill] sm:$0xff] %v7634_v46  ;;  %v1921_v14 = vcombine.high %v7638_v57, %v7634_v46  ;;  %660 = vbcast.lane.b32.xlu1 %v654_v10, 264  ;;  %656 = vbcast.lane.b32.xlu0 %v654_v10, 256 }
  0xee   :  { %v353_v32 = vpop.permute.xlu1 %352  ;;  %v349_v26 = vpop.permute.xlu0 %348 }
  0xf0   :  { %671 = vbcast.lane.b32.xlu1 %v665_v40, 264  ;;  %667 = vbcast.lane.b32.xlu0 %v665_v40, 256 }
  0xf2   :  { %v364_v6 = vpop.permute.xlu1 %363  ;;  %v360_v1 = vpop.permute.xlu0 %359 }
  0xf3   :  { %v4048_v52 = vcombine.low %v342_v37, %v364_v6  ;;  %v4049_v8 = vcombine.high %v342_v37, %v364_v6  ;;  %v1872_v54 = vcombine.low %v338_v48, %v360_v1  ;;  %v1873_v42 = vcombine.high %v338_v48, %v360_v1 }
  0xf4   :  { %682 = vbcast.lane.b32.xlu1 %v676_v5, 264  ;;  %678 = vbcast.lane.b32.xlu0 %v676_v5, 256  ;;  %v1904_v6 = vcombine.low %v1848_v25, %v1864_v2  ;;  %v698_v37 = vrot.slane %v7601_v0, %v7173_v13 }
  0xf5   :  { %v7653_v51 = vrot.slane %v4048_v52, %v7223_v56  ;;  %v7656_v10 = vrot.slane %v4049_v8, %v7223_v56 }
  0xf6   :  { %v375_v60 = vpop.permute.xlu1 %374  ;;  %v371_v34 = vpop.permute.xlu0 %370 }
  0xf7   :  { %11879 = vst [vmem:[#allocation70_spill] sm:$0xff] %v7653_v51  ;;  %11880 = vst [vmem:[#allocation71_spill] sm:$0xff] %v7656_v10  ;;  %v4064_v40 = vcombine.low %v353_v32, %v375_v60  ;;  %v4065_v45 = vcombine.high %v353_v32, %v375_v60  ;;  %v1888_v31 = vcombine.low %v349_v26, %v371_v34 }
  0xf8   :  { %v1889_v24 = vcombine.high %v349_v26, %v371_v34  ;;  %693 = vbcast.lane.b32.xlu1 %v687_v41, 264  ;;  %689 = vbcast.lane.b32.xlu0 %v687_v41, 256  ;;  %v1880_v60 = vrot.slane %v1872_v54, %v7223_v56  ;;  %v7672_v34 = vrot.slane %v1873_v42, %v7223_v56 }
  0xf9   :  { %v7661_v5 = vrot.slane %v4064_v40, %v7223_v56  ;;  %v7664_v52 = vrot.slane %v4065_v45, %v7223_v56  ;;  %v1896_v8 = vrot.slane %v1888_v31, %v7223_v56  ;;  %v7679_v32 = vrot.slane %v4081_v35, %v7274_v50 }
  0xfa   :  { %v7668_v1 = vrot.slane %v1889_v24, %v7223_v56  ;;  %11884 = vst [vmem:[#allocation75_spill] sm:$0xff] %v7672_v34  ;;  %v386_v2 = vpop.permute.xlu1 %385  ;;  %v382_v25 = vpop.permute.xlu0 %381  ;;  %v709_v54 = vrot.slane %v7601_v0, %v7177_v15  ;;  %v7686_v42 = vrot.slane %v1904_v6, %v7274_v50  ;;  %v720_v6 = vrot.slane %v7601_v0, %v7181_v17 }
  0xfb   :  { %11881 = vst [vmem:[#allocation72_spill] sm:$0xff] %v7661_v5  ;;  %11882 = vst [vmem:[#allocation73_spill] sm:$0xff] %v7664_v52  ;;  %v4113_v48 = vcombine.high %v7653_v51, %v7661_v5  ;;  %v4129_v45 = vcombine.high %v7656_v10, %v7664_v52  ;;  %v1936_v31 = vcombine.low %v1880_v60, %v1896_v8 }
  0xfc   :  { %11883 = vst [vmem:[#allocation74_spill] sm:$0xff] %v7668_v1  ;;  %11885 = vst [vmem:[#allocation76_spill] sm:$0xff] %v7679_v32  ;;  %v1937_v24 = vcombine.high %v1880_v60, %v1896_v8  ;;  %v1953_v41 = vcombine.high %v7672_v34, %v7668_v1  ;;  %704 = vbcast.lane.b32.xlu1 %v698_v37, 264  ;;  %700 = vbcast.lane.b32.xlu0 %v698_v37, 256 }
  0xfd   :  { %11886 = vst [vmem:[#allocation77_spill] sm:$0xff] %v7686_v42  ;;  %v7689_v26 = vrot.slane %v4113_v48, %v7274_v50  ;;  %v7692_v35 = vrot.slane %v1936_v31, %v7274_v50  ;;  %v7695_v8 = vrot.slane %v1905_v55, %v7274_v50  ;;  %v7706_v48 = vrot.slane %v1921_v14, %v7274_v50  ;;  %v7725_v14 = vld [vmem:[%s11398_s0 + $0x40] sm:$0xff] }
  0xfe   :  { %v397_v40 = vpop.permute.xlu1 %396  ;;  %v7698_v60 = vrot.slane %v1937_v24, %v7274_v50  ;;  %v7701_v10 = vrot.slane %v1953_v41, %v7274_v50  ;;  %v393_v37 = vpop.permute.xlu0 %392  ;;  %v11893_v0 = vcombine.high %v7622_v20, %v7630_v18  ;;  %v7734_v20 = vrot.slane %v4129_v45, %v7274_v50 }
  0xff   :  { %11887 = vst [vmem:[#allocation78_spill] sm:$0xff] %v7689_v26  ;;  %11888 = vst [vmem:[#allocation79_spill] sm:$0xff] %v7692_v35  ;;  %v731_v51 = vrot.slane %v7725_v14, %v7156_v4  ;;  %v742_v55 = vrot.slane %v7725_v14, %v7153_v3 }
 0x100   :  { %11889 = vst [vmem:[#allocation80_spill] sm:$0xff] %v7695_v8  ;;  %11890 = vst [vmem:[#allocation81_spill] sm:$0xff] %v7698_v60  ;;  %715 = vbcast.lane.b32.xlu1 %v709_v54, 264  ;;  %v7720_v52 = vrot.slane %v11893_v0, %v7274_v50  ;;  %711 = vbcast.lane.b32.xlu0 %v709_v54, 256 }
 0x101   :  { %11891 = vst [vmem:[#allocation82_spill] sm:$0xff] %v7701_v10  ;;  %11892 = vst [vmem:[#allocation83_spill] sm:$0xff] %v7706_v48 }
 0x102   :  { %11894 = vst [vmem:[#allocation84_spill] sm:$0xff] %v7720_v52  ;;  %v408_v24 = vpop.permute.xlu1 %407  ;;  %11895 = vst [vmem:[#allocation85_spill] sm:$0xff] %v7734_v20  ;;  %v404_v18 = vpop.permute.xlu0 %403 }
 0x103   :  { %v4152_v0 = vcombine.low %v386_v2, %v408_v24  ;;  %v4153_v54 = vcombine.high %v386_v2, %v408_v24  ;;  %v1976_v5 = vcombine.low %v382_v25, %v404_v18  ;;  %v1977_v10 = vcombine.high %v382_v25, %v404_v18 }
 0x104   :  { %726 = vbcast.lane.b32.xlu1 %v720_v6, 264  ;;  %722 = vbcast.lane.b32.xlu0 %v720_v6, 256 }
 0x105   :  { %v7743_v45 = vrot.slane %v4152_v0, %v7223_v56  ;;  %v7746_v2 = vrot.slane %v4153_v54, %v7223_v56  ;;  %v1984_v25 = vrot.slane %v1976_v5, %v7223_v56  ;;  %v7758_v0 = vrot.slane %v1977_v10, %v7223_v56 }
 0x106   :  { %v419_v41 = vpop.permute.xlu1 %418  ;;  %v415_v32 = vpop.permute.xlu0 %414  ;;  %v753_v10 = vrot.slane %v7725_v14, %v7161_v7 }
 0x107   :  { %11896 = vst [vmem:[#allocation86_spill] sm:$0xff] %v7743_v45  ;;  %11897 = vst [vmem:[#allocation87_spill] sm:$0xff] %v7746_v2  ;;  %v4168_v24 = vcombine.low %v397_v40, %v419_v41  ;;  %v4169_v26 = vcombine.high %v397_v40, %v419_v41  ;;  %v1992_v48 = vcombine.low %v393_v37, %v415_v32 }
 0x108   :  { %v1993_v57 = vcombine.high %v393_v37, %v415_v32  ;;  %737 = vbcast.lane.b32.xlu1 %v731_v51, 264  ;;  %733 = vbcast.lane.b32.xlu0 %v731_v51, 256  ;;  %11900 = vst [vmem:[#allocation90_spill] sm:$0xff] %v7758_v0 }
 0x109   :  { %v7751_v6 = vrot.slane %v4168_v24, %v7223_v56  ;;  %v7754_v18 = vrot.slane %v4169_v26, %v7223_v56  ;;  %v2000_v40 = vrot.slane %v1992_v48, %v7223_v56  ;;  %v764_v48 = vrot.slane %v7725_v14, %v7165_v9 }
 0x10a   :  { %v7762_v32 = vrot.slane %v1993_v57, %v7223_v56  ;;  %v430_v37 = vpop.permute.xlu1 %429  ;;  %v426_v26 = vpop.permute.xlu0 %425 }
 0x10b   :  { %11898 = vst [vmem:[#allocation88_spill] sm:$0xff] %v7751_v6  ;;  %11899 = vst [vmem:[#allocation89_spill] sm:$0xff] %v7754_v18  ;;  %v4217_v41 = vcombine.high %v7743_v45, %v7751_v6  ;;  %v2041_v24 = vcombine.high %v1984_v25, %v2000_v40  ;;  %v775_v45 = vrot.slane %v7725_v14, %v7169_v11 }
 0x10c   :  { %11901 = vst [vmem:[#allocation91_spill] sm:$0xff] %v7762_v32  ;;  %v2057_v51 = vcombine.high %v7758_v0, %v7762_v32  ;;  %748 = vbcast.lane.b32.xlu1 %v742_v55, 264  ;;  %744 = vbcast.lane.b32.xlu0 %v742_v55, 256  ;;  %v2040_v63 = vcombine.low %v1984_v25, %v2000_v40 }
 0x10e   :  { %v441_v5 = vpop.permute.xlu1 %440  ;;  %v437_v57 = vpop.permute.xlu0 %436 }
 0x110   :  { %759 = vbcast.lane.b32.xlu1 %v753_v10, 264  ;;  %755 = vbcast.lane.b32.xlu0 %v753_v10, 256 }
 0x112   :  { %v452_v31 = vpop.permute.xlu1 %451  ;;  %v448_v52 = vpop.permute.xlu0 %447 }
 0x113   :  { %v4184_v20 = vcombine.low %v430_v37, %v452_v31  ;;  %v4185_v54 = vcombine.high %v430_v37, %v452_v31  ;;  %v2008_v6 = vcombine.low %v426_v26, %v448_v52  ;;  %v2009_v46 = vcombine.high %v426_v26, %v448_v52 }
 0x114   :  { %770 = vbcast.lane.b32.xlu1 %v764_v48, 264  ;;  %766 = vbcast.lane.b32.xlu0 %v764_v48, 256  ;;  %v786_v37 = vrot.slane %v7725_v14, %v7173_v13 }
 0x115   :  { %v7777_v55 = vrot.slane %v4184_v20, %v7223_v56  ;;  %v7780_v1 = vrot.slane %v4185_v54, %v7223_v56  ;;  %v2016_v20 = vrot.slane %v2008_v6, %v7223_v56  ;;  %v7792_v54 = vrot.slane %v2009_v46, %v7223_v56 }
 0x116   :  { %v463_v34 = vpop.permute.xlu1 %462  ;;  %v459_v61 = vpop.permute.xlu0 %458 }
 0x117   :  { %11902 = vst [vmem:[#allocation92_spill] sm:$0xff] %v7777_v55  ;;  %11903 = vst [vmem:[#allocation93_spill] sm:$0xff] %v7780_v1  ;;  %v4200_v23 = vcombine.low %v441_v5, %v463_v34  ;;  %v4201_v10 = vcombine.high %v441_v5, %v463_v34  ;;  %v2024_v53 = vcombine.low %v437_v57, %v459_v61 }
 0x118   :  { %v2025_v31 = vcombine.high %v437_v57, %v459_v61  ;;  %781 = vbcast.lane.b32.xlu1 %v775_v45, 264  ;;  %777 = vbcast.lane.b32.xlu0 %v775_v45, 256  ;;  %11906 = vst [vmem:[#allocation96_spill] sm:$0xff] %v7792_v54  ;;  %v7803_v45 = vrot.slane %v4217_v41, %v7274_v50 }
 0x119   :  { %v7785_v48 = vrot.slane %v4200_v23, %v7223_v56  ;;  %v7788_v52 = vrot.slane %v4201_v10, %v7223_v56  ;;  %v2032_v34 = vrot.slane %v2024_v53, %v7223_v56  ;;  %v797_v53 = vrot.slane %v7725_v14, %v7177_v15 }
 0x11a   :  { %v7796_v61 = vrot.slane %v2025_v31, %v7223_v56  ;;  %v474_v26 = vpop.permute.xlu1 %473  ;;  %v470_v40 = vpop.permute.xlu0 %469  ;;  %11908 = vst [vmem:[#allocation98_spill] sm:$0xff] %v7803_v45  ;;  %v7810_v57 = vrot.slane %v2040_v63, %v7274_v50  ;;  %v808_v63 = vrot.slane %v7725_v14, %v7181_v17  ;;  %v11914_v14 = vcombine.high %v7746_v2, %v7754_v18 }
 0x11b   :  { %11904 = vst [vmem:[#allocation94_spill] sm:$0xff] %v7785_v48  ;;  %11905 = vst [vmem:[#allocation95_spill] sm:$0xff] %v7788_v52  ;;  %v4249_v25 = vcombine.high %v7777_v55, %v7785_v48  ;;  %v4265_v23 = vcombine.high %v7780_v1, %v7788_v52  ;;  %v2072_v6 = vcombine.low %v2016_v20, %v2032_v34 }
 0x11c   :  { %11907 = vst [vmem:[#allocation97_spill] sm:$0xff] %v7796_v61  ;;  %v2073_v5 = vcombine.high %v2016_v20, %v2032_v34  ;;  %v2089_v46 = vcombine.high %v7792_v54, %v7796_v61  ;;  %792 = vbcast.lane.b32.xlu1 %v786_v37, 264  ;;  %788 = vbcast.lane.b32.xlu0 %v786_v37, 256  ;;  %11909 = vst [vmem:[#allocation99_spill] sm:$0xff] %v7810_v57 }
 0x11d   :  { %v7813_v10 = vrot.slane %v4249_v25, %v7274_v50  ;;  %v7816_v41 = vrot.slane %v2072_v6, %v7274_v50  ;;  %v7819_v20 = vrot.slane %v2041_v24, %v7274_v50  ;;  %v7830_v25 = vrot.slane %v2057_v51, %v7274_v50  ;;  %v7849_v51 = vld [vmem:[%s11398_s0 + $0x48] sm:$0xff] }
 0x11e   :  { %v485_v31 = vpop.permute.xlu1 %484  ;;  %v7822_v34 = vrot.slane %v2073_v5, %v7274_v50  ;;  %v7825_v1 = vrot.slane %v2089_v46, %v7274_v50  ;;  %v481_v37 = vpop.permute.xlu0 %480  ;;  %v7844_v52 = vrot.slane %v11914_v14, %v7274_v50  ;;  %v7858_v2 = vrot.slane %v4265_v23, %v7274_v50 }
 0x11f   :  { %11910 = vst [vmem:[#allocation100_spill] sm:$0xff] %v7813_v10  ;;  %11911 = vst [vmem:[#allocation101_spill] sm:$0xff] %v7816_v41  ;;  %v819_v55 = vrot.slane %v7849_v51, %v7156_v4  ;;  %v830_v6 = vrot.slane %v7849_v51, %v7153_v3 }
 0x120   :  { %11912 = vst [vmem:[#allocation102_spill] sm:$0xff] %v7825_v1  ;;  %11913 = vst [vmem:[#allocation103_spill] sm:$0xff] %v7830_v25  ;;  %803 = vbcast.lane.b32.xlu1 %v797_v53, 264  ;;  %799 = vbcast.lane.b32.xlu0 %v797_v53, 256 }
 0x121   :  { %11915 = vst [vmem:[#allocation104_spill] sm:$0xff] %v7844_v52  ;;  %11916 = vst [vmem:[#allocation105_spill] sm:$0xff] %v7858_v2 }
 0x122   :  { %v496_v24 = vpop.permute.xlu1 %495  ;;  %v492_v18 = vpop.permute.xlu0 %491 }
 0x123   :  { %v4288_v14 = vcombine.low %v474_v26, %v496_v24  ;;  %v4289_v53 = vcombine.high %v474_v26, %v496_v24  ;;  %v2112_v48 = vcombine.low %v470_v40, %v492_v18  ;;  %v2113_v1 = vcombine.high %v470_v40, %v492_v18 }
 0x124   :  { %814 = vbcast.lane.b32.xlu1 %v808_v63, 264  ;;  %810 = vbcast.lane.b32.xlu0 %v808_v63, 256 }
 0x125   :  { %v7867_v23 = vrot.slane %v4288_v14, %v7223_v56  ;;  %v7870_v26 = vrot.slane %v4289_v53, %v7223_v56  ;;  %v2120_v40 = vrot.slane %v2112_v48, %v7223_v56  ;;  %v7882_v14 = vrot.slane %v2113_v1, %v7223_v56 }
 0x126   :  { %v507_v46 = vpop.permute.xlu1 %506  ;;  %v503_v45 = vpop.permute.xlu0 %502  ;;  %v841_v1 = vrot.slane %v7849_v51, %v7161_v7 }
 0x127   :  { %11917 = vst [vmem:[#allocation106_spill] sm:$0xff] %v7867_v23  ;;  %11918 = vst [vmem:[#allocation107_spill] sm:$0xff] %v7870_v26  ;;  %v4304_v24 = vcombine.low %v485_v31, %v507_v46  ;;  %v4305_v10 = vcombine.high %v485_v31, %v507_v46  ;;  %v2128_v25 = vcombine.low %v481_v37, %v503_v45 }
 0x128   :  { %v2129_v0 = vcombine.high %v481_v37, %v503_v45  ;;  %825 = vbcast.lane.b32.xlu1 %v819_v55, 264  ;;  %821 = vbcast.lane.b32.xlu0 %v819_v55, 256  ;;  %11921 = vst [vmem:[#allocation110_spill] sm:$0xff] %v7882_v14 }
 0x129   :  { %v7875_v63 = vrot.slane %v4304_v24, %v7223_v56  ;;  %v7878_v18 = vrot.slane %v4305_v10, %v7223_v56  ;;  %v2136_v31 = vrot.slane %v2128_v25, %v7223_v56  ;;  %v852_v25 = vrot.slane %v7849_v51, %v7165_v9 }
 0x12a   :  { %v7886_v45 = vrot.slane %v2129_v0, %v7223_v56  ;;  %v518_v37 = vpop.permute.xlu1 %517  ;;  %v514_v10 = vpop.permute.xlu0 %513 }
 0x12b   :  { %11919 = vst [vmem:[#allocation108_spill] sm:$0xff] %v7875_v63  ;;  %11920 = vst [vmem:[#allocation109_spill] sm:$0xff] %v7878_v18  ;;  %v4353_v46 = vcombine.high %v7867_v23, %v7875_v63  ;;  %v2177_v24 = vcombine.high %v2120_v40, %v2136_v31  ;;  %v863_v23 = vrot.slane %v7849_v51, %v7169_v11 }
 0x12c   :  { %11922 = vst [vmem:[#allocation111_spill] sm:$0xff] %v7886_v45  ;;  %v2193_v55 = vcombine.high %v7882_v14, %v7886_v45  ;;  %836 = vbcast.lane.b32.xlu1 %v830_v6, 264  ;;  %832 = vbcast.lane.b32.xlu0 %v830_v6, 256  ;;  %v2176_v22 = vcombine.low %v2120_v40, %v2136_v31 }
 0x12e   :  { %v529_v48 = vpop.permute.xlu1 %528  ;;  %v525_v0 = vpop.permute.xlu0 %524 }
 0x130   :  { %847 = vbcast.lane.b32.xlu1 %v841_v1, 264  ;;  %843 = vbcast.lane.b32.xlu0 %v841_v1, 256 }
 0x132   :  { %v540_v5 = vpop.permute.xlu1 %539  ;;  %v536_v52 = vpop.permute.xlu0 %535 }
 0x133   :  { %v4320_v2 = vcombine.low %v518_v37, %v540_v5  ;;  %v4321_v53 = vcombine.high %v518_v37, %v540_v5  ;;  %v2144_v63 = vcombine.low %v514_v10, %v536_v52  ;;  %v2145_v14 = vcombine.high %v514_v10, %v536_v52 }
 0x134   :  { %858 = vbcast.lane.b32.xlu1 %v852_v25, 264  ;;  %854 = vbcast.lane.b32.xlu0 %v852_v25, 256  ;;  %v874_v37 = vrot.slane %v7849_v51, %v7173_v13 }
 0x135   :  { %v7901_v6 = vrot.slane %v4320_v2, %v7223_v56  ;;  %v7904_v32 = vrot.slane %v4321_v53, %v7223_v56  ;;  %v2152_v2 = vrot.slane %v2144_v63, %v7223_v56  ;;  %v7916_v53 = vrot.slane %v2145_v14, %v7223_v56 }
 0x136   :  { %v551_v45 = vpop.permute.xlu1 %550  ;;  %v547_v61 = vpop.permute.xlu0 %546 }
 0x137   :  { %11923 = vst [vmem:[#allocation112_spill] sm:$0xff] %v7901_v6  ;;  %11924 = vst [vmem:[#allocation113_spill] sm:$0xff] %v7904_v32  ;;  %v4336_v54 = vcombine.low %v529_v48, %v551_v45  ;;  %v4337_v1 = vcombine.high %v529_v48, %v551_v45  ;;  %v2160_v43 = vcombine.low %v525_v0, %v547_v61 }
 0x138   :  { %v2161_v5 = vcombine.high %v525_v0, %v547_v61  ;;  %869 = vbcast.lane.b32.xlu1 %v863_v23, 264  ;;  %865 = vbcast.lane.b32.xlu0 %v863_v23, 256  ;;  %11927 = vst [vmem:[#allocation116_spill] sm:$0xff] %v7916_v53  ;;  %v7927_v23 = vrot.slane %v4353_v46, %v7274_v50 }
 0x139   :  { %v7909_v25 = vrot.slane %v4336_v54, %v7223_v56  ;;  %v7912_v52 = vrot.slane %v4337_v1, %v7223_v56  ;;  %v2168_v45 = vrot.slane %v2160_v43, %v7223_v56  ;;  %v885_v43 = vrot.slane %v7849_v51, %v7177_v15 }
 0x13a   :  { %v7920_v61 = vrot.slane %v2161_v5, %v7223_v56  ;;  %v562_v10 = vpop.permute.xlu1 %561  ;;  %v558_v31 = vpop.permute.xlu0 %557  ;;  %11929 = vst [vmem:[#allocation118_spill] sm:$0xff] %v7927_v23  ;;  %v7934_v0 = vrot.slane %v2176_v22, %v7274_v50  ;;  %v896_v22 = vrot.slane %v7849_v51, %v7181_v17  ;;  %v11937_v51 = vcombine.high %v7870_v26, %v7878_v18 }
 0x13b   :  { %11925 = vst [vmem:[#allocation114_spill] sm:$0xff] %v7909_v25  ;;  %11926 = vst [vmem:[#allocation115_spill] sm:$0xff] %v7912_v52  ;;  %v4385_v40 = vcombine.high %v7901_v6, %v7909_v25  ;;  %v4401_v54 = vcombine.high %v7904_v32, %v7912_v52  ;;  %v2208_v63 = vcombine.low %v2152_v2, %v2168_v45 }
 0x13c   :  { %11928 = vst [vmem:[#allocation117_spill] sm:$0xff] %v7920_v61  ;;  %v2209_v48 = vcombine.high %v2152_v2, %v2168_v45  ;;  %v2225_v14 = vcombine.high %v7916_v53, %v7920_v61  ;;  %880 = vbcast.lane.b32.xlu1 %v874_v37, 264  ;;  %876 = vbcast.lane.b32.xlu0 %v874_v37, 256  ;;  %11930 = vst [vmem:[#allocation119_spill] sm:$0xff] %v7934_v0 }
 0x13d   :  { %v7937_v1 = vrot.slane %v4385_v40, %v7274_v50  ;;  %v7940_v46 = vrot.slane %v2208_v63, %v7274_v50  ;;  %v7943_v2 = vrot.slane %v2177_v24, %v7274_v50  ;;  %v7954_v40 = vrot.slane %v2193_v55, %v7274_v50  ;;  %v7973_v55 = vld [vmem:[%s11398_s0 + $0x50] sm:$0xff] }
 0x13e   :  { %v573_v5 = vpop.permute.xlu1 %572  ;;  %v7946_v45 = vrot.slane %v2209_v48, %v7274_v50  ;;  %v7949_v32 = vrot.slane %v2225_v14, %v7274_v50  ;;  %v569_v37 = vpop.permute.xlu0 %568  ;;  %v7968_v52 = vrot.slane %v11937_v51, %v7274_v50  ;;  %v7982_v26 = vrot.slane %v4401_v54, %v7274_v50 }
 0x13f   :  { %11931 = vst [vmem:[#allocation120_spill] sm:$0xff] %v7937_v1  ;;  %11932 = vst [vmem:[#allocation121_spill] sm:$0xff] %v7940_v46  ;;  %v907_v6 = vrot.slane %v7973_v55, %v7156_v4  ;;  %v918_v24 = vrot.slane %v7973_v55, %v7153_v3 }
 0x140   :  { %11933 = vst [vmem:[#allocation122_spill] sm:$0xff] %v7943_v2  ;;  %11934 = vst [vmem:[#allocation123_spill] sm:$0xff] %v7946_v45  ;;  %891 = vbcast.lane.b32.xlu1 %v885_v43, 264  ;;  %887 = vbcast.lane.b32.xlu0 %v885_v43, 256 }
 0x141   :  { %11935 = vst [vmem:[#allocation124_spill] sm:$0xff] %v7949_v32  ;;  %11936 = vst [vmem:[#allocation125_spill] sm:$0xff] %v7954_v40 }
 0x142   :  { %11938 = vst [vmem:[#allocation126_spill] sm:$0xff] %v7968_v52  ;;  %v584_v48 = vpop.permute.xlu1 %583  ;;  %11939 = vst [vmem:[#allocation127_spill] sm:$0xff] %v7982_v26  ;;  %v580_v18 = vpop.permute.xlu0 %579 }
 0x143   :  { %v4424_v51 = vcombine.low %v562_v10, %v584_v48  ;;  %v4425_v43 = vcombine.high %v562_v10, %v584_v48  ;;  %v2248_v25 = vcombine.low %v558_v31, %v580_v18  ;;  %v2249_v32 = vcombine.high %v558_v31, %v580_v18 }
 0x144   :  { %902 = vbcast.lane.b32.xlu1 %v896_v22, 264  ;;  %898 = vbcast.lane.b32.xlu0 %v896_v22, 256 }
 0x145   :  { %v7991_v54 = vrot.slane %v4424_v51, %v7223_v56  ;;  %v7994_v10 = vrot.slane %v4425_v43, %v7223_v56  ;;  %v2256_v31 = vrot.slane %v2248_v25, %v7223_v56  ;;  %v8006_v51 = vrot.slane %v2249_v32, %v7223_v56 }
 0x146   :  { %v595_v14 = vpop.permute.xlu1 %594  ;;  %v591_v23 = vpop.permute.xlu0 %590  ;;  %v929_v32 = vrot.slane %v7973_v55, %v7161_v7 }
 0x147   :  { %11940 = vst [vmem:[#allocation128_spill] sm:$0xff] %v7991_v54  ;;  %11941 = vst [vmem:[#allocation129_spill] sm:$0xff] %v7994_v10  ;;  %v4440_v48 = vcombine.low %v573_v5, %v595_v14  ;;  %v4441_v1 = vcombine.high %v573_v5, %v595_v14  ;;  %v2264_v40 = vcombine.low %v569_v37, %v591_v23 }
 0x148   :  { %v2265_v53 = vcombine.high %v569_v37, %v591_v23  ;;  %913 = vbcast.lane.b32.xlu1 %v907_v6, 264  ;;  %909 = vbcast.lane.b32.xlu0 %v907_v6, 256  ;;  %11944 = vst [vmem:[#allocation132_spill] sm:$0xff] %v8006_v51 }
 0x149   :  { %v7999_v22 = vrot.slane %v4440_v48, %v7223_v56  ;;  %v8002_v18 = vrot.slane %v4441_v1, %v7223_v56  ;;  %v2272_v5 = vrot.slane %v2264_v40, %v7223_v56  ;;  %v940_v40 = vrot.slane %v7973_v55, %v7165_v9 }
 0x14a   :  { %v8010_v23 = vrot.slane %v2265_v53, %v7223_v56  ;;  %v606_v37 = vpop.permute.xlu1 %605  ;;  %v602_v1 = vpop.permute.xlu0 %601 }
 0x14b   :  { %11942 = vst [vmem:[#allocation130_spill] sm:$0xff] %v7999_v22  ;;  %11943 = vst [vmem:[#allocation131_spill] sm:$0xff] %v8002_v18  ;;  %v4489_v14 = vcombine.high %v7991_v54, %v7999_v22  ;;  %v2313_v48 = vcombine.high %v2256_v31, %v2272_v5  ;;  %v951_v54 = vrot.slane %v7973_v55, %v7169_v11 }
 0x14c   :  { %11945 = vst [vmem:[#allocation133_spill] sm:$0xff] %v8010_v23  ;;  %v2329_v6 = vcombine.high %v8006_v51, %v8010_v23  ;;  %924 = vbcast.lane.b32.xlu1 %v918_v24, 264  ;;  %920 = vbcast.lane.b32.xlu0 %v918_v24, 256  ;;  %v2312_v19 = vcombine.low %v2256_v31, %v2272_v5 }
 0x14e   :  { %v617_v25 = vpop.permute.xlu1 %616  ;;  %v613_v53 = vpop.permute.xlu0 %612 }
 0x150   :  { %935 = vbcast.lane.b32.xlu1 %v929_v32, 264  ;;  %931 = vbcast.lane.b32.xlu0 %v929_v32, 256 }
 0x152   :  { %v628_v63 = vpop.permute.xlu1 %627  ;;  %v624_v52 = vpop.permute.xlu0 %623 }
 0x153   :  { %v4456_v26 = vcombine.low %v606_v37, %v628_v63  ;;  %v4457_v43 = vcombine.high %v606_v37, %v628_v63  ;;  %v2280_v22 = vcombine.low %v602_v1, %v624_v52  ;;  %v2281_v61 = vcombine.high %v602_v1, %v624_v52 }
 0x154   :  { %946 = vbcast.lane.b32.xlu1 %v940_v40, 264  ;;  %942 = vbcast.lane.b32.xlu0 %v940_v40, 256  ;;  %v962_v37 = vrot.slane %v7973_v55, %v7173_v13 }
 0x155   :  { %v8025_v24 = vrot.slane %v4456_v26, %v7223_v56  ;;  %v8028_v23 = vrot.slane %v4457_v43, %v7223_v56  ;;  %v2288_v26 = vrot.slane %v2280_v22, %v7223_v56  ;;  %v8040_v43 = vrot.slane %v2281_v61, %v7223_v56 }
 0x156   :  { %v639_v51 = vpop.permute.xlu1 %638  ;;  %v635_v33 = vpop.permute.xlu0 %634 }
 0x157   :  { %11946 = vst [vmem:[#allocation134_spill] sm:$0xff] %v8025_v24  ;;  %11947 = vst [vmem:[#allocation135_spill] sm:$0xff] %v8028_v23  ;;  %v4472_v62 = vcombine.low %v617_v25, %v639_v51  ;;  %v4473_v32 = vcombine.high %v617_v25, %v639_v51  ;;  %v2296_v21 = vcombine.low %v613_v53, %v635_v33 }
 0x158   :  { %v2297_v63 = vcombine.high %v613_v53, %v635_v33  ;;  %957 = vbcast.lane.b32.xlu1 %v951_v54, 264  ;;  %953 = vbcast.lane.b32.xlu0 %v951_v54, 256  ;;  %11950 = vst [vmem:[#allocation138_spill] sm:$0xff] %v8040_v43  ;;  %v8051_v54 = vrot.slane %v4489_v14, %v7274_v50 }
 0x159   :  { %v8033_v40 = vrot.slane %v4472_v62, %v7223_v56  ;;  %v8036_v52 = vrot.slane %v4473_v32, %v7223_v56  ;;  %v2304_v51 = vrot.slane %v2296_v21, %v7223_v56  ;;  %v973_v21 = vrot.slane %v7973_v55, %v7177_v15 }
 0x15a   :  { %v8044_v33 = vrot.slane %v2297_v63, %v7223_v56  ;;  %v650_v1 = vpop.permute.xlu1 %649  ;;  %v646_v5 = vpop.permute.xlu0 %645  ;;  %11952 = vst [vmem:[#allocation140_spill] sm:$0xff] %v8051_v54  ;;  %v8058_v53 = vrot.slane %v2312_v19, %v7274_v50  ;;  %v984_v19 = vrot.slane %v7973_v55, %v7181_v17  ;;  %v11959_v55 = vcombine.high %v7994_v10, %v8002_v18 }
 0x15b   :  { %11948 = vst [vmem:[#allocation136_spill] sm:$0xff] %v8033_v40  ;;  %11949 = vst [vmem:[#allocation137_spill] sm:$0xff] %v8036_v52  ;;  %v4521_v31 = vcombine.high %v8025_v24, %v8033_v40  ;;  %v4537_v62 = vcombine.high %v8028_v23, %v8036_v52  ;;  %v2344_v22 = vcombine.low %v2288_v26, %v2304_v51 }
 0x15c   :  { %11951 = vst [vmem:[#allocation139_spill] sm:$0xff] %v8044_v33  ;;  %v2345_v25 = vcombine.high %v2288_v26, %v2304_v51  ;;  %v2361_v61 = vcombine.high %v8040_v43, %v8044_v33  ;;  %968 = vbcast.lane.b32.xlu1 %v962_v37, 264  ;;  %964 = vbcast.lane.b32.xlu0 %v962_v37, 256  ;;  %11953 = vst [vmem:[#allocation141_spill] sm:$0xff] %v8058_v53 }
 0x15d   :  { %v8061_v32 = vrot.slane %v4521_v31, %v7274_v50  ;;  %v8064_v14 = vrot.slane %v2344_v22, %v7274_v50  ;;  %v8067_v26 = vrot.slane %v2313_v48, %v7274_v50  ;;  %v8078_v31 = vrot.slane %v2329_v6, %v7274_v50  ;;  %v8097_v6 = vld [vmem:[%s11398_s0 + $0x58] sm:$0xff] }
 0x15e   :  { %v661_v63 = vpop.permute.xlu1 %660  ;;  %v8070_v51 = vrot.slane %v2345_v25, %v7274_v50  ;;  %v8073_v23 = vrot.slane %v2361_v61, %v7274_v50  ;;  %v657_v37 = vpop.permute.xlu0 %656  ;;  %v8092_v52 = vrot.slane %v11959_v55, %v7274_v50  ;;  %v8106_v10 = vrot.slane %v4537_v62, %v7274_v50 }
 0x15f   :  { %11954 = vst [vmem:[#allocation142_spill] sm:$0xff] %v8061_v32  ;;  %11955 = vst [vmem:[#allocation143_spill] sm:$0xff] %v8064_v14  ;;  %v995_v24 = vrot.slane %v8097_v6, %v7156_v4  ;;  %v1006_v22 = vrot.slane %v8097_v6, %v7153_v3 }
 0x160   :  { %11956 = vst [vmem:[#allocation144_spill] sm:$0xff] %v8070_v51  ;;  %11957 = vst [vmem:[#allocation145_spill] sm:$0xff] %v8073_v23  ;;  %979 = vbcast.lane.b32.xlu1 %v973_v21, 264  ;;  %975 = vbcast.lane.b32.xlu0 %v973_v21, 256 }
 0x161   :  { %11958 = vst [vmem:[#allocation146_spill] sm:$0xff] %v8078_v31  ;;  %11960 = vst [vmem:[#allocation147_spill] sm:$0xff] %v8092_v52 }
 0x162   :  { %v672_v48 = vpop.permute.xlu1 %671  ;;  %11961 = vst [vmem:[#allocation148_spill] sm:$0xff] %v8106_v10  ;;  %v668_v18 = vpop.permute.xlu0 %667 }
 0x163   :  { %v4560_v55 = vcombine.low %v650_v1, %v672_v48  ;;  %v4561_v21 = vcombine.high %v650_v1, %v672_v48  ;;  %v2384_v40 = vcombine.low %v646_v5, %v668_v18  ;;  %v2385_v23 = vcombine.high %v646_v5, %v668_v18 }
 0x164   :  { %990 = vbcast.lane.b32.xlu1 %v984_v19, 264  ;;  %986 = vbcast.lane.b32.xlu0 %v984_v19, 256 }
 0x165   :  { %v8115_v62 = vrot.slane %v4560_v55, %v7223_v56  ;;  %v8118_v1 = vrot.slane %v4561_v21, %v7223_v56  ;;  %v2392_v5 = vrot.slane %v2384_v40, %v7223_v56  ;;  %v8130_v55 = vrot.slane %v2385_v23, %v7223_v56 }
 0x166   :  { %v683_v61 = vpop.permute.xlu1 %682  ;;  %v679_v54 = vpop.permute.xlu0 %678  ;;  %v1017_v23 = vrot.slane %v8097_v6, %v7161_v7 }
 0x167   :  { %11962 = vst [vmem:[#allocation149_spill] sm:$0xff] %v8115_v62  ;;  %11963 = vst [vmem:[#allocation150_spill] sm:$0xff] %v8118_v1  ;;  %v4576_v48 = vcombine.low %v661_v63, %v683_v61  ;;  %v4577_v32 = vcombine.high %v661_v63, %v683_v61  ;;  %v2400_v31 = vcombine.low %v657_v37, %v679_v54 }
 0x168   :  { %v2401_v43 = vcombine.high %v657_v37, %v679_v54  ;;  %1001 = vbcast.lane.b32.xlu1 %v995_v24, 264  ;;  %997 = vbcast.lane.b32.xlu0 %v995_v24, 256  ;;  %11966 = vst [vmem:[#allocation153_spill] sm:$0xff] %v8130_v55 }
 0x169   :  { %v8123_v19 = vrot.slane %v4576_v48, %v7223_v56  ;;  %v8126_v18 = vrot.slane %v4577_v32, %v7223_v56  ;;  %v2408_v63 = vrot.slane %v2400_v31, %v7223_v56  ;;  %v1028_v31 = vrot.slane %v8097_v6, %v7165_v9 }
 0x16a   :  { %v8134_v54 = vrot.slane %v2401_v43, %v7223_v56  ;;  %v694_v37 = vpop.permute.xlu1 %693  ;;  %v690_v32 = vpop.permute.xlu0 %689 }
 0x16b   :  { %11964 = vst [vmem:[#allocation151_spill] sm:$0xff] %v8123_v19  ;;  %11965 = vst [vmem:[#allocation152_spill] sm:$0xff] %v8126_v18  ;;  %v4625_v61 = vcombine.high %v8115_v62, %v8123_v19  ;;  %v2449_v48 = vcombine.high %v2392_v5, %v2408_v63  ;;  %v1039_v62 = vrot.slane %v8097_v6, %v7169_v11 }
 0x16c   :  { %11967 = vst [vmem:[#allocation154_spill] sm:$0xff] %v8134_v54  ;;  %v2465_v24 = vcombine.high %v8130_v55, %v8134_v54  ;;  %1012 = vbcast.lane.b32.xlu1 %v1006_v22, 264  ;;  %1008 = vbcast.lane.b32.xlu0 %v1006_v22, 256  ;;  %v2448_v2 = vcombine.low %v2392_v5, %v2408_v63 }
 0x16e   :  { %v705_v40 = vpop.permute.xlu1 %704  ;;  %v701_v43 = vpop.permute.xlu0 %700 }
 0x170   :  { %1023 = vbcast.lane.b32.xlu1 %v1017_v23, 264  ;;  %1019 = vbcast.lane.b32.xlu0 %v1017_v23, 256 }
 0x172   :  { %v716_v25 = vpop.permute.xlu1 %715  ;;  %v712_v52 = vpop.permute.xlu0 %711 }
 0x173   :  { %v4592_v10 = vcombine.low %v694_v37, %v716_v25  ;;  %v4593_v21 = vcombine.high %v694_v37, %v716_v25  ;;  %v2416_v19 = vcombine.low %v690_v32, %v712_v52  ;;  %v2417_v55 = vcombine.high %v690_v32, %v712_v52 }
 0x174   :  { %1034 = vbcast.lane.b32.xlu1 %v1028_v31, 264  ;;  %1030 = vbcast.lane.b32.xlu0 %v1028_v31, 256  ;;  %v1050_v37 = vrot.slane %v8097_v6, %v7173_v13 }
 0x175   :  { %v8149_v22 = vrot.slane %v4592_v10, %v7223_v56  ;;  %v8152_v33 = vrot.slane %v4593_v21, %v7223_v56  ;;  %v2424_v10 = vrot.slane %v2416_v19, %v7223_v56  ;;  %v8164_v21 = vrot.slane %v2417_v55, %v7223_v56 }
 0x176   :  { %v727_v54 = vpop.permute.xlu1 %726  ;;  %v723_v58 = vpop.permute.xlu0 %722 }
 0x177   :  { %11968 = vst [vmem:[#allocation155_spill] sm:$0xff] %v8149_v22  ;;  %11969 = vst [vmem:[#allocation156_spill] sm:$0xff] %v8152_v33  ;;  %v4608_v59 = vcombine.low %v705_v40, %v727_v54  ;;  %v4609_v23 = vcombine.high %v705_v40, %v727_v54  ;;  %v2432_v45 = vcombine.low %v701_v43, %v723_v58 }
 0x178   :  { %v2433_v25 = vcombine.high %v701_v43, %v723_v58  ;;  %1045 = vbcast.lane.b32.xlu1 %v1039_v62, 264  ;;  %1041 = vbcast.lane.b32.xlu0 %v1039_v62, 256  ;;  %11972 = vst [vmem:[#allocation159_spill] sm:$0xff] %v8164_v21  ;;  %v8175_v62 = vrot.slane %v4625_v61, %v7274_v50 }
 0x179   :  { %v8157_v31 = vrot.slane %v4608_v59, %v7223_v56  ;;  %v8160_v52 = vrot.slane %v4609_v23, %v7223_v56  ;;  %v2440_v54 = vrot.slane %v2432_v45, %v7223_v56  ;;  %v1061_v45 = vrot.slane %v8097_v6, %v7177_v15 }
 0x17a   :  { %v8168_v58 = vrot.slane %v2433_v25, %v7223_v56  ;;  %v738_v32 = vpop.permute.xlu1 %737  ;;  %v734_v63 = vpop.permute.xlu0 %733  ;;  %11974 = vst [vmem:[#allocation161_spill] sm:$0xff] %v8175_v62  ;;  %v8182_v43 = vrot.slane %v2448_v2, %v7274_v50  ;;  %v1072_v2 = vrot.slane %v8097_v6, %v7181_v17  ;;  %v11982_v6 = vcombine.high %v8118_v1, %v8126_v18 }
 0x17b   :  { %11970 = vst [vmem:[#allocation157_spill] sm:$0xff] %v8157_v31  ;;  %11971 = vst [vmem:[#allocation158_spill] sm:$0xff] %v8160_v52  ;;  %v4657_v5 = vcombine.high %v8149_v22, %v8157_v31  ;;  %v4673_v59 = vcombine.high %v8152_v33, %v8160_v52  ;;  %v2480_v19 = vcombine.low %v2424_v10, %v2440_v54 }
 0x17c   :  { %11973 = vst [vmem:[#allocation160_spill] sm:$0xff] %v8168_v58  ;;  %v2481_v40 = vcombine.high %v2424_v10, %v2440_v54  ;;  %v2497_v55 = vcombine.high %v8164_v21, %v8168_v58  ;;  %1056 = vbcast.lane.b32.xlu1 %v1050_v37, 264  ;;  %1052 = vbcast.lane.b32.xlu0 %v1050_v37, 256  ;;  %11975 = vst [vmem:[#allocation162_spill] sm:$0xff] %v8182_v43 }
 0x17d   :  { %v8185_v23 = vrot.slane %v4657_v5, %v7274_v50  ;;  %v8188_v61 = vrot.slane %v2480_v19, %v7274_v50  ;;  %v8191_v10 = vrot.slane %v2449_v48, %v7274_v50  ;;  %v8202_v5 = vrot.slane %v2465_v24, %v7274_v50  ;;  %v8221_v24 = vld [vmem:[%s11398_s0 + $0x60] sm:$0xff] }
 0x17e   :  { %v749_v25 = vpop.permute.xlu1 %748  ;;  %v8194_v54 = vrot.slane %v2481_v40, %v7274_v50  ;;  %v8197_v33 = vrot.slane %v2497_v55, %v7274_v50  ;;  %v745_v37 = vpop.permute.xlu0 %744  ;;  %v8216_v52 = vrot.slane %v11982_v6, %v7274_v50  ;;  %v8230_v1 = vrot.slane %v4673_v59, %v7274_v50 }
 0x17f   :  { %11976 = vst [vmem:[#allocation163_spill] sm:$0xff] %v8185_v23  ;;  %11977 = vst [vmem:[#allocation164_spill] sm:$0xff] %v8188_v61  ;;  %v1083_v22 = vrot.slane %v8221_v24, %v7156_v4  ;;  %v1094_v48 = vrot.slane %v8221_v24, %v7153_v3 }
 0x180   :  { %11978 = vst [vmem:[#allocation165_spill] sm:$0xff] %v8191_v10  ;;  %11979 = vst [vmem:[#allocation166_spill] sm:$0xff] %v8194_v54  ;;  %1067 = vbcast.lane.b32.xlu1 %v1061_v45, 264  ;;  %1063 = vbcast.lane.b32.xlu0 %v1061_v45, 256 }
 0x181   :  { %11980 = vst [vmem:[#allocation167_spill] sm:$0xff] %v8197_v33  ;;  %11981 = vst [vmem:[#allocation168_spill] sm:$0xff] %v8202_v5 }
 0x182   :  { %11983 = vst [vmem:[#allocation169_spill] sm:$0xff] %v8216_v52  ;;  %v760_v40 = vpop.permute.xlu1 %759  ;;  %11984 = vst [vmem:[#allocation170_spill] sm:$0xff] %v8230_v1  ;;  %v756_v18 = vpop.permute.xlu0 %755 }
 0x183   :  { %v4696_v6 = vcombine.low %v738_v32, %v760_v40  ;;  %v4697_v45 = vcombine.high %v738_v32, %v760_v40  ;;  %v2520_v31 = vcombine.low %v734_v63, %v756_v18  ;;  %v2521_v33 = vcombine.high %v734_v63, %v756_v18 }
 0x184   :  { %1078 = vbcast.lane.b32.xlu1 %v1072_v2, 264  ;;  %1074 = vbcast.lane.b32.xlu0 %v1072_v2, 256 }
 0x185   :  { %v8239_v59 = vrot.slane %v4696_v6, %v7223_v56  ;;  %v8242_v32 = vrot.slane %v4697_v45, %v7223_v56  ;;  %v2528_v63 = vrot.slane %v2520_v31, %v7223_v56  ;;  %v8254_v6 = vrot.slane %v2521_v33, %v7223_v56 }
 0x186   :  { %v771_v55 = vpop.permute.xlu1 %770  ;;  %v767_v62 = vpop.permute.xlu0 %766  ;;  %v1105_v33 = vrot.slane %v8221_v24, %v7161_v7 }
 0x187   :  { %11985 = vst [vmem:[#allocation171_spill] sm:$0xff] %v8239_v59  ;;  %11986 = vst [vmem:[#allocation172_spill] sm:$0xff] %v8242_v32  ;;  %v4712_v40 = vcombine.low %v749_v25, %v771_v55  ;;  %v4713_v23 = vcombine.high %v749_v25, %v771_v55  ;;  %v2536_v5 = vcombine.low %v745_v37, %v767_v62 }
 0x188   :  { %v2537_v21 = vcombine.high %v745_v37, %v767_v62  ;;  %1089 = vbcast.lane.b32.xlu1 %v1083_v22, 264  ;;  %1085 = vbcast.lane.b32.xlu0 %v1083_v22, 256  ;;  %11989 = vst [vmem:[#allocation175_spill] sm:$0xff] %v8254_v6 }
 0x189   :  { %v8247_v2 = vrot.slane %v4712_v40, %v7223_v56  ;;  %v8250_v18 = vrot.slane %v4713_v23, %v7223_v56  ;;  %v2544_v25 = vrot.slane %v2536_v5, %v7223_v56  ;;  %v1116_v5 = vrot.slane %v8221_v24, %v7165_v9 }
 0x18a   :  { %v8258_v62 = vrot.slane %v2537_v21, %v7223_v56  ;;  %v782_v37 = vpop.permute.xlu1 %781  ;;  %v778_v23 = vpop.permute.xlu0 %777 }
 0x18b   :  { %11987 = vst [vmem:[#allocation173_spill] sm:$0xff] %v8247_v2  ;;  %11988 = vst [vmem:[#allocation174_spill] sm:$0xff] %v8250_v18  ;;  %v4761_v55 = vcombine.high %v8239_v59, %v8247_v2  ;;  %v4777_v45 = vcombine.high %v8242_v32, %v8250_v18  ;;  %v2585_v40 = vcombine.high %v2528_v63, %v2544_v25 }
 0x18c   :  { %11990 = vst [vmem:[#allocation176_spill] sm:$0xff] %v8258_v62  ;;  %v2601_v22 = vcombine.high %v8254_v6, %v8258_v62  ;;  %1100 = vbcast.lane.b32.xlu1 %v1094_v48, 264  ;;  %1096 = vbcast.lane.b32.xlu0 %v1094_v48, 256  ;;  %v1127_v18 = vrot.slane %v8221_v24, %v7169_v11 }
 0x18d   :  { %v2584_v60 = vcombine.low %v2528_v63, %v2544_v25 }
 0x18e   :  { %v793_v31 = vpop.permute.xlu1 %792  ;;  %v789_v21 = vpop.permute.xlu0 %788 }
 0x190   :  { %1111 = vbcast.lane.b32.xlu1 %v1105_v33, 264  ;;  %1107 = vbcast.lane.b32.xlu0 %v1105_v33, 256 }
 0x192   :  { %v804_v19 = vpop.permute.xlu1 %803  ;;  %v800_v32 = vpop.permute.xlu0 %799 }
 0x193   :  { %v4728_v1 = vcombine.low %v782_v37, %v804_v19  ;;  %v4729_v52 = vcombine.high %v782_v37, %v804_v19  ;;  %v2552_v59 = vcombine.low %v778_v23, %v800_v32  ;;  %v2553_v2 = vcombine.high %v778_v23, %v800_v32 }
 0x194   :  { %1122 = vbcast.lane.b32.xlu1 %v1116_v5, 264  ;;  %1118 = vbcast.lane.b32.xlu0 %v1116_v5, 256  ;;  %v1138_v37 = vrot.slane %v8221_v24, %v7173_v13 }
 0x195   :  { %v8273_v48 = vrot.slane %v4728_v1, %v7223_v56  ;;  %v8276_v6 = vrot.slane %v4729_v52, %v7223_v56  ;;  %v2560_v1 = vrot.slane %v2552_v59, %v7223_v56  ;;  %v8288_v52 = vrot.slane %v2553_v2, %v7223_v56 }
 0x196   :  { %v815_v58 = vpop.permute.xlu1 %814  ;;  %v811_v54 = vpop.permute.xlu0 %810 }
 0x197   :  { %11991 = vst [vmem:[#allocation177_spill] sm:$0xff] %v8273_v48  ;;  %11992 = vst [vmem:[#allocation178_spill] sm:$0xff] %v8276_v6  ;;  %v4744_v62 = vcombine.low %v793_v31, %v815_v58  ;;  %v4745_v33 = vcombine.high %v793_v31, %v815_v58  ;;  %v2568_v10 = vcombine.low %v789_v21, %v811_v54 }
 0x198   :  { %v2569_v19 = vcombine.high %v789_v21, %v811_v54  ;;  %1133 = vbcast.lane.b32.xlu1 %v1127_v18, 264  ;;  %1129 = vbcast.lane.b32.xlu0 %v1127_v18, 256  ;;  %11995 = vst [vmem:[#allocation181_spill] sm:$0xff] %v8288_v52  ;;  %v8299_v18 = vrot.slane %v4761_v55, %v7274_v50 }
 0x199   :  { %v8281_v5 = vrot.slane %v4744_v62, %v7223_v56  ;;  %v8284_v32 = vrot.slane %v4745_v33, %v7223_v56  ;;  %v2576_v58 = vrot.slane %v2568_v10, %v7223_v56  ;;  %v1149_v10 = vrot.slane %v8221_v24, %v7177_v15 }
 0x19a   :  { %v8292_v54 = vrot.slane %v2569_v19, %v7223_v56  ;;  %v826_v23 = vpop.permute.xlu1 %825  ;;  %v822_v62 = vpop.permute.xlu0 %821  ;;  %11997 = vst [vmem:[#allocation183_spill] sm:$0xff] %v8299_v18  ;;  %v8306_v21 = vrot.slane %v2584_v60, %v7274_v50  ;;  %v8309_v33 = vrot.slane %v2585_v40, %v7274_v50  ;;  %v8315_v55 = vrot.slane %v4777_v45, %v7274_v50  ;;  %v8347_v45 = vld [vmem:[%s11398_s0 + $0x68] sm:$0xff] }
 0x19b   :  { %11993 = vst [vmem:[#allocation179_spill] sm:$0xff] %v8281_v5  ;;  %11994 = vst [vmem:[#allocation180_spill] sm:$0xff] %v8284_v32  ;;  %v4793_v63 = vcombine.high %v8273_v48, %v8281_v5  ;;  %v4809_v25 = vcombine.high %v8276_v6, %v8284_v32  ;;  %v2616_v59 = vcombine.low %v2560_v1, %v2576_v58 }
 0x19c   :  { %11996 = vst [vmem:[#allocation182_spill] sm:$0xff] %v8292_v54  ;;  %v2617_v31 = vcombine.high %v2560_v1, %v2576_v58  ;;  %v2633_v2 = vcombine.high %v8288_v52, %v8292_v54  ;;  %1144 = vbcast.lane.b32.xlu1 %v1138_v37, 264  ;;  %1140 = vbcast.lane.b32.xlu0 %v1138_v37, 256  ;;  %11998 = vst [vmem:[#allocation184_spill] sm:$0xff] %v8306_v21 }
 0x19d   :  { %11999 = vst [vmem:[#allocation185_spill] sm:$0xff] %v8309_v33  ;;  %v8312_v19 = vrot.slane %v4793_v63, %v7274_v50  ;;  %12001 = vst [vmem:[#allocation187_spill] sm:$0xff] %v8315_v55  ;;  %v8318_v58 = vrot.slane %v2616_v59, %v7274_v50  ;;  %v8327_v60 = vrot.slane %v4809_v25, %v7274_v50 }
 0x19e   :  { %v837_v1 = vpop.permute.xlu1 %836  ;;  %v8321_v6 = vrot.slane %v2617_v31, %v7274_v50  ;;  %v8324_v37 = vrot.slane %v2633_v2, %v7274_v50  ;;  %v833_v40 = vpop.permute.xlu0 %832  ;;  %v8330_v63 = vrot.slane %v2601_v22, %v7274_v50  ;;  %v1160_v31 = vrot.slane %v8221_v24, %v7181_v17 }
 0x19f   :  { %12000 = vst [vmem:[#allocation186_spill] sm:$0xff] %v8312_v19  ;;  %12002 = vst [vmem:[#allocation188_spill] sm:$0xff] %v8318_v58  ;;  %v1171_v18 = vrot.slane %v8347_v45, %v7156_v4 }
 0x1a0   :  { %12003 = vst [vmem:[#allocation189_spill] sm:$0xff] %v8321_v6  ;;  %12004 = vst [vmem:[#allocation190_spill] sm:$0xff] %v8324_v37  ;;  %1155 = vbcast.lane.b32.xlu1 %v1149_v10, 264  ;;  %1151 = vbcast.lane.b32.xlu0 %v1149_v10, 256 }
 0x1a1   :  { %12005 = vst [vmem:[#allocation191_spill] sm:$0xff] %v8327_v60  ;;  %12006 = vst [vmem:[#allocation192_spill] sm:$0xff] %v8330_v63 }
 0x1a2   :  { %v848_v32 = vpop.permute.xlu1 %847  ;;  %v844_v19 = vpop.permute.xlu0 %843 }
 0x1a3   :  { %v4832_v22 = vcombine.low %v826_v23, %v848_v32  ;;  %v4833_v10 = vcombine.high %v826_v23, %v848_v32  ;;  %v2656_v48 = vcombine.low %v822_v62, %v844_v19  ;;  %v2657_v59 = vcombine.high %v822_v62, %v844_v19 }
 0x1a4   :  { %1166 = vbcast.lane.b32.xlu1 %v1160_v31, 264  ;;  %1162 = vbcast.lane.b32.xlu0 %v1160_v31, 256  ;;  %v1182_v23 = vrot.slane %v8347_v45, %v7153_v3 }
 0x1a5   :  { %v8360_v24 = vrot.slane %v4832_v22, %v7223_v56  ;;  %v8363_v37 = vrot.slane %v4833_v10, %v7223_v56  ;;  %v2664_v19 = vrot.slane %v2656_v48, %v7223_v56  ;;  %v8375_v22 = vrot.slane %v2657_v59, %v7223_v56 }
 0x1a6   :  { %v859_v5 = vpop.permute.xlu1 %858  ;;  %v855_v25 = vpop.permute.xlu0 %854 }
 0x1a7   :  { %12007 = vst [vmem:[#allocation193_spill] sm:$0xff] %v8360_v24  ;;  %12008 = vst [vmem:[#allocation194_spill] sm:$0xff] %v8363_v37  ;;  %v4848_v2 = vcombine.low %v837_v1, %v859_v5  ;;  %v4849_v63 = vcombine.high %v837_v1, %v859_v5  ;;  %v2672_v60 = vcombine.low %v833_v40, %v855_v25 }
 0x1a8   :  { %v2673_v32 = vcombine.high %v833_v40, %v855_v25  ;;  %1177 = vbcast.lane.b32.xlu1 %v1171_v18, 264  ;;  %1173 = vbcast.lane.b32.xlu0 %v1171_v18, 256  ;;  %12011 = vst [vmem:[#allocation197_spill] sm:$0xff] %v8375_v22  ;;  %v1193_v18 = vrot.slane %v8347_v45, %v7161_v7 }
 0x1a9   :  { %v8368_v31 = vrot.slane %v4848_v2, %v7223_v56  ;;  %v8371_v62 = vrot.slane %v4849_v63, %v7223_v56  ;;  %v2680_v5 = vrot.slane %v2672_v60, %v7223_v56 }
 0x1aa   :  { %v8379_v1 = vrot.slane %v2673_v32, %v7223_v56  ;;  %v870_v40 = vpop.permute.xlu1 %869  ;;  %v866_v63 = vpop.permute.xlu0 %865  ;;  %v1204_v32 = vrot.slane %v8347_v45, %v7165_v9 }
 0x1ab   :  { %12009 = vst [vmem:[#allocation195_spill] sm:$0xff] %v8368_v31  ;;  %12010 = vst [vmem:[#allocation196_spill] sm:$0xff] %v8371_v62  ;;  %v4897_v25 = vcombine.high %v8360_v24, %v8368_v31  ;;  %v4913_v2 = vcombine.high %v8363_v37, %v8371_v62  ;;  %v2721_v10 = vcombine.high %v2664_v19, %v2680_v5 }
 0x1ac   :  { %12012 = vst [vmem:[#allocation198_spill] sm:$0xff] %v8379_v1  ;;  %v2737_v48 = vcombine.high %v8375_v22, %v8379_v1  ;;  %1188 = vbcast.lane.b32.xlu1 %v1182_v23, 264  ;;  %1184 = vbcast.lane.b32.xlu0 %v1182_v23, 256  ;;  %v1215_v31 = vrot.slane %v8347_v45, %v7169_v11 }
 0x1ad   :  { %v2720_v6 = vcombine.low %v2664_v19, %v2680_v5 }
 0x1ae   :  { %v881_v60 = vpop.permute.xlu1 %880  ;;  %v877_v59 = vpop.permute.xlu0 %876 }
 0x1b0   :  { %1199 = vbcast.lane.b32.xlu1 %v1193_v18, 264  ;;  %1195 = vbcast.lane.b32.xlu0 %v1193_v18, 256 }
 0x1b2   :  { %v892_v55 = vpop.permute.xlu1 %891  ;;  %v888_v62 = vpop.permute.xlu0 %887 }
 0x1b3   :  { %v4864_v24 = vcombine.low %v870_v40, %v892_v55  ;;  %v4865_v37 = vcombine.high %v870_v40, %v892_v55  ;;  %v2688_v22 = vcombine.low %v866_v63, %v888_v62  ;;  %v2689_v1 = vcombine.high %v866_v63, %v888_v62 }
 0x1b4   :  { %1210 = vbcast.lane.b32.xlu1 %v1204_v32, 264  ;;  %1206 = vbcast.lane.b32.xlu0 %v1204_v32, 256  ;;  %v1226_v40 = vrot.slane %v8347_v45, %v7173_v13 }
 0x1b5   :  { %v8394_v23 = vrot.slane %v4864_v24, %v7223_v56  ;;  %v8397_v54 = vrot.slane %v4865_v37, %v7223_v56  ;;  %v2696_v37 = vrot.slane %v2688_v22, %v7223_v56  ;;  %v8409_v24 = vrot.slane %v2689_v1, %v7223_v56 }
 0x1b6   :  { %v903_v52 = vpop.permute.xlu1 %902  ;;  %v899_v36 = vpop.permute.xlu0 %898 }
 0x1b7   :  { %12013 = vst [vmem:[#allocation199_spill] sm:$0xff] %v8394_v23  ;;  %12014 = vst [vmem:[#allocation200_spill] sm:$0xff] %v8397_v54  ;;  %v4880_v8 = vcombine.low %v881_v60, %v903_v52  ;;  %v4881_v18 = vcombine.high %v881_v60, %v903_v52  ;;  %v2704_v38 = vcombine.low %v877_v59, %v899_v36 }
 0x1b8   :  { %v2705_v55 = vcombine.high %v877_v59, %v899_v36  ;;  %1221 = vbcast.lane.b32.xlu1 %v1215_v31, 264  ;;  %1217 = vbcast.lane.b32.xlu0 %v1215_v31, 256  ;;  %12017 = vst [vmem:[#allocation203_spill] sm:$0xff] %v8409_v24  ;;  %v8420_v31 = vrot.slane %v4897_v25, %v7274_v50 }
 0x1b9   :  { %v8402_v32 = vrot.slane %v4880_v8, %v7223_v56  ;;  %v8405_v62 = vrot.slane %v4881_v18, %v7223_v56  ;;  %v2712_v52 = vrot.slane %v2704_v38, %v7223_v56  ;;  %v1237_v38 = vrot.slane %v8347_v45, %v7177_v15 }
 0x1ba   :  { %v8413_v36 = vrot.slane %v2705_v55, %v7223_v56  ;;  %v914_v63 = vpop.permute.xlu1 %913  ;;  %v910_v5 = vpop.permute.xlu0 %909  ;;  %12019 = vst [vmem:[#allocation205_spill] sm:$0xff] %v8420_v31  ;;  %v8427_v59 = vrot.slane %v2720_v6, %v7274_v50  ;;  %v8430_v18 = vrot.slane %v2721_v10, %v7274_v50  ;;  %v8436_v25 = vrot.slane %v4913_v2, %v7274_v50  ;;  %v8468_v2 = vld [vmem:[%s11398_s0 + $0x70] sm:$0xff] }
 0x1bb   :  { %12015 = vst [vmem:[#allocation201_spill] sm:$0xff] %v8402_v32  ;;  %12016 = vst [vmem:[#allocation202_spill] sm:$0xff] %v8405_v62  ;;  %v4929_v19 = vcombine.high %v8394_v23, %v8402_v32  ;;  %v4945_v8 = vcombine.high %v8397_v54, %v8405_v62  ;;  %v2752_v22 = vcombine.low %v2696_v37, %v2712_v52 }
 0x1bc   :  { %12018 = vst [vmem:[#allocation204_spill] sm:$0xff] %v8413_v36  ;;  %v2753_v60 = vcombine.high %v2696_v37, %v2712_v52  ;;  %v2769_v1 = vcombine.high %v8409_v24, %v8413_v36  ;;  %1232 = vbcast.lane.b32.xlu1 %v1226_v40, 264  ;;  %1228 = vbcast.lane.b32.xlu0 %v1226_v40, 256  ;;  %12020 = vst [vmem:[#allocation206_spill] sm:$0xff] %v8427_v59 }
 0x1bd   :  { %12021 = vst [vmem:[#allocation207_spill] sm:$0xff] %v8430_v18  ;;  %v8433_v55 = vrot.slane %v4929_v19, %v7274_v50  ;;  %12023 = vst [vmem:[#allocation209_spill] sm:$0xff] %v8436_v25  ;;  %v8439_v52 = vrot.slane %v2752_v22, %v7274_v50  ;;  %v8448_v6 = vrot.slane %v4945_v8, %v7274_v50 }
 0x1be   :  { %v925_v37 = vpop.permute.xlu1 %924  ;;  %v8442_v54 = vrot.slane %v2753_v60, %v7274_v50  ;;  %v8445_v40 = vrot.slane %v2769_v1, %v7274_v50  ;;  %v921_v10 = vpop.permute.xlu0 %920  ;;  %v8451_v19 = vrot.slane %v2737_v48, %v7274_v50  ;;  %v1248_v60 = vrot.slane %v8347_v45, %v7181_v17 }
 0x1bf   :  { %12022 = vst [vmem:[#allocation208_spill] sm:$0xff] %v8433_v55  ;;  %12024 = vst [vmem:[#allocation210_spill] sm:$0xff] %v8439_v52  ;;  %v1259_v31 = vrot.slane %v8468_v2, %v7156_v4 }
 0x1c0   :  { %12025 = vst [vmem:[#allocation211_spill] sm:$0xff] %v8442_v54  ;;  %12026 = vst [vmem:[#allocation212_spill] sm:$0xff] %v8445_v40  ;;  %1243 = vbcast.lane.b32.xlu1 %v1237_v38, 264  ;;  %1239 = vbcast.lane.b32.xlu0 %v1237_v38, 256 }
 0x1c1   :  { %12027 = vst [vmem:[#allocation213_spill] sm:$0xff] %v8448_v6  ;;  %12028 = vst [vmem:[#allocation214_spill] sm:$0xff] %v8451_v19 }
 0x1c2   :  { %v936_v62 = vpop.permute.xlu1 %935  ;;  %v932_v55 = vpop.permute.xlu0 %931 }
 0x1c3   :  { %v4968_v48 = vcombine.low %v914_v63, %v936_v62  ;;  %v4969_v38 = vcombine.high %v914_v63, %v936_v62  ;;  %v2792_v23 = vcombine.low %v910_v5, %v932_v55  ;;  %v2793_v22 = vcombine.high %v910_v5, %v932_v55 }
 0x1c4   :  { %1254 = vbcast.lane.b32.xlu1 %v1248_v60, 264  ;;  %1250 = vbcast.lane.b32.xlu0 %v1248_v60, 256  ;;  %v1270_v63 = vrot.slane %v8468_v2, %v7153_v3 }
 0x1c5   :  { %v8481_v45 = vrot.slane %v4968_v48, %v7223_v56  ;;  %v8484_v40 = vrot.slane %v4969_v38, %v7223_v56  ;;  %v2800_v55 = vrot.slane %v2792_v23, %v7223_v56  ;;  %v8496_v48 = vrot.slane %v2793_v22, %v7223_v56 }
 0x1c6   :  { %v947_v32 = vpop.permute.xlu1 %946  ;;  %v943_v8 = vpop.permute.xlu0 %942 }
 0x1c7   :  { %12029 = vst [vmem:[#allocation215_spill] sm:$0xff] %v8481_v45  ;;  %12030 = vst [vmem:[#allocation216_spill] sm:$0xff] %v8484_v40  ;;  %v4984_v1 = vcombine.low %v925_v37, %v947_v32  ;;  %v4985_v19 = vcombine.high %v925_v37, %v947_v32  ;;  %v2808_v6 = vcombine.low %v921_v10, %v943_v8 }
 0x1c8   :  { %v2809_v62 = vcombine.high %v921_v10, %v943_v8  ;;  %1265 = vbcast.lane.b32.xlu1 %v1259_v31, 264  ;;  %1261 = vbcast.lane.b32.xlu0 %v1259_v31, 256  ;;  %12033 = vst [vmem:[#allocation219_spill] sm:$0xff] %v8496_v48  ;;  %v1281_v31 = vrot.slane %v8468_v2, %v7161_v7 }
 0x1c9   :  { %v8489_v60 = vrot.slane %v4984_v1, %v7223_v56  ;;  %v8492_v5 = vrot.slane %v4985_v19, %v7223_v56  ;;  %v2816_v32 = vrot.slane %v2808_v6, %v7223_v56 }
 0x1ca   :  { %v8500_v37 = vrot.slane %v2809_v62, %v7223_v56  ;;  %v958_v10 = vpop.permute.xlu1 %957  ;;  %v954_v19 = vpop.permute.xlu0 %953  ;;  %v1292_v62 = vrot.slane %v8468_v2, %v7165_v9 }
 0x1cb   :  { %12031 = vst [vmem:[#allocation217_spill] sm:$0xff] %v8489_v60  ;;  %12032 = vst [vmem:[#allocation218_spill] sm:$0xff] %v8492_v5  ;;  %v5033_v8 = vcombine.high %v8481_v45, %v8489_v60  ;;  %v5049_v1 = vcombine.high %v8484_v40, %v8492_v5  ;;  %v2857_v38 = vcombine.high %v2800_v55, %v2816_v32 }
 0x1cc   :  { %12034 = vst [vmem:[#allocation220_spill] sm:$0xff] %v8500_v37  ;;  %v2873_v23 = vcombine.high %v8496_v48, %v8500_v37  ;;  %1276 = vbcast.lane.b32.xlu1 %v1270_v63, 264  ;;  %1272 = vbcast.lane.b32.xlu0 %v1270_v63, 256  ;;  %v1303_v60 = vrot.slane %v8468_v2, %v7169_v11 }
 0x1cd   :  { %v2856_v51 = vcombine.low %v2800_v55, %v2816_v32 }
 0x1ce   :  { %v969_v6 = vpop.permute.xlu1 %968  ;;  %v965_v22 = vpop.permute.xlu0 %964 }
 0x1d0   :  { %1287 = vbcast.lane.b32.xlu1 %v1281_v31, 264  ;;  %1283 = vbcast.lane.b32.xlu0 %v1281_v31, 256 }
 0x1d2   :  { %v980_v25 = vpop.permute.xlu1 %979  ;;  %v976_v5 = vpop.permute.xlu0 %975 }
 0x1d3   :  { %v5000_v45 = vcombine.low %v958_v10, %v980_v25  ;;  %v5001_v40 = vcombine.high %v958_v10, %v980_v25  ;;  %v2824_v24 = vcombine.low %v954_v19, %v976_v5  ;;  %v2825_v36 = vcombine.high %v954_v19, %v976_v5 }
 0x1d4   :  { %1298 = vbcast.lane.b32.xlu1 %v1292_v62, 264  ;;  %1294 = vbcast.lane.b32.xlu0 %v1292_v62, 256  ;;  %v1314_v10 = vrot.slane %v8468_v2, %v7173_v13 }
 0x1d5   :  { %v8515_v63 = vrot.slane %v5000_v45, %v7223_v56  ;;  %v8518_v37 = vrot.slane %v5001_v40, %v7223_v56  ;;  %v2832_v40 = vrot.slane %v2824_v24, %v7223_v56  ;;  %v8530_v45 = vrot.slane %v2825_v36, %v7223_v56 }
 0x1d6   :  { %v991_v48 = vpop.permute.xlu1 %990  ;;  %v987_v18 = vpop.permute.xlu0 %986 }
 0x1d7   :  { %12035 = vst [vmem:[#allocation221_spill] sm:$0xff] %v8515_v63  ;;  %12036 = vst [vmem:[#allocation222_spill] sm:$0xff] %v8518_v37  ;;  %v5016_v54 = vcombine.low %v969_v6, %v991_v48  ;;  %v5017_v31 = vcombine.high %v969_v6, %v991_v48  ;;  %v2840_v33 = vcombine.low %v965_v22, %v987_v18 }
 0x1d8   :  { %v2841_v25 = vcombine.high %v965_v22, %v987_v18  ;;  %1309 = vbcast.lane.b32.xlu1 %v1303_v60, 264  ;;  %1305 = vbcast.lane.b32.xlu0 %v1303_v60, 256  ;;  %12039 = vst [vmem:[#allocation225_spill] sm:$0xff] %v8530_v45  ;;  %v8541_v60 = vrot.slane %v5033_v8, %v7274_v50 }
 0x1d9   :  { %v8523_v62 = vrot.slane %v5016_v54, %v7223_v56  ;;  %v8526_v5 = vrot.slane %v5017_v31, %v7223_v56  ;;  %v2848_v48 = vrot.slane %v2840_v33, %v7223_v56  ;;  %v1325_v33 = vrot.slane %v8468_v2, %v7177_v15 }
 0x1da   :  { %v8534_v18 = vrot.slane %v2841_v25, %v7223_v56  ;;  %v1002_v19 = vpop.permute.xlu1 %1001  ;;  %v998_v32 = vpop.permute.xlu0 %997  ;;  %12041 = vst [vmem:[#allocation227_spill] sm:$0xff] %v8541_v60  ;;  %v8548_v22 = vrot.slane %v2856_v51, %v7274_v50  ;;  %v8551_v31 = vrot.slane %v2857_v38, %v7274_v50  ;;  %v8557_v8 = vrot.slane %v5049_v1, %v7274_v50  ;;  %v8589_v1 = vld [vmem:[%s11398_s0 + $0x78] sm:$0xff]  ;;  %s7121_s0 = smov 2  }
 0x1db   :  { %12037 = vst [vmem:[#allocation223_spill] sm:$0xff] %v8523_v62  ;;  %12038 = vst [vmem:[#allocation224_spill] sm:$0xff] %v8526_v5  ;;  %v5065_v55 = vcombine.high %v8515_v63, %v8523_v62  ;;  %v5081_v54 = vcombine.high %v8518_v37, %v8526_v5  ;;  %v2888_v24 = vcombine.low %v2832_v40, %v2848_v48 }
 0x1dc   :  { %12040 = vst [vmem:[#allocation226_spill] sm:$0xff] %v8534_v18  ;;  %v2889_v6 = vcombine.high %v2832_v40, %v2848_v48  ;;  %v2905_v36 = vcombine.high %v8530_v45, %v8534_v18  ;;  %1320 = vbcast.lane.b32.xlu1 %v1314_v10, 264  ;;  %1316 = vbcast.lane.b32.xlu0 %v1314_v10, 256  ;;  %12042 = vst [vmem:[#allocation228_spill] sm:$0xff] %v8548_v22 }
 0x1dd   :  { %v8554_v25 = vrot.slane %v5065_v55, %v7274_v50  ;;  %12044 = vst [vmem:[#allocation230_spill] sm:$0xff] %v8557_v8  ;;  %v8560_v48 = vrot.slane %v2888_v24, %v7274_v50  ;;  %v8569_v51 = vrot.slane %v5081_v54, %v7274_v50  ;;  %v8572_v55 = vrot.slane %v2873_v23, %v7274_v50 }
 0x1de   :  { %v1013_v40 = vpop.permute.xlu1 %1012  ;;  %v8563_v37 = vrot.slane %v2889_v6, %v7274_v50  ;;  %v8566_v10 = vrot.slane %v2905_v36, %v7274_v50  ;;  %v1009_v38 = vpop.permute.xlu0 %1008  ;;  %v1336_v6 = vrot.slane %v8468_v2, %v7181_v17  ;;  %v1347_v60 = vrot.slane %v8589_v1, %v7156_v4 }
 0x1df   :  { %12043 = vst [vmem:[#allocation229_spill] sm:$0xff] %v8554_v25  ;;  %12045 = vst [vmem:[#allocation231_spill] sm:$0xff] %v8560_v48 }
 0x1e0   :  { %12046 = vst [vmem:[#allocation232_spill] sm:$0xff] %v8566_v10  ;;  %12047 = vst [vmem:[#allocation233_spill] sm:$0xff] %v8569_v51  ;;  %1331 = vbcast.lane.b32.xlu1 %v1325_v33, 264  ;;  %1327 = vbcast.lane.b32.xlu0 %v1325_v33, 256 }
 0x1e1   :  { %12048 = vst [vmem:[#allocation234_spill] sm:$0xff] %v8572_v55 }
 0x1e2   :  { %v1024_v5 = vpop.permute.xlu1 %1023  ;;  %v1020_v25 = vpop.permute.xlu0 %1019 }
 0x1e3   :  { %v5104_v23 = vcombine.low %v1002_v19, %v1024_v5  ;;  %v5105_v33 = vcombine.high %v1002_v19, %v1024_v5  ;;  %v2928_v63 = vcombine.low %v998_v32, %v1020_v25  ;;  %v2929_v24 = vcombine.high %v998_v32, %v1020_v25 }
 0x1e4   :  { %1342 = vbcast.lane.b32.xlu1 %v1336_v6, 264  ;;  %1338 = vbcast.lane.b32.xlu0 %v1336_v6, 256  ;;  %v1358_v19 = vrot.slane %v8589_v1, %v7153_v3 }
 0x1e5   :  { %v8602_v2 = vrot.slane %v5104_v23, %v7223_v56  ;;  %v8605_v10 = vrot.slane %v5105_v33, %v7223_v56  ;;  %v2936_v25 = vrot.slane %v2928_v63, %v7223_v56  ;;  %v8617_v6 = vrot.slane %v2929_v24, %v7223_v56 }
 0x1e6   :  { %v1035_v62 = vpop.permute.xlu1 %1034  ;;  %v1031_v54 = vpop.permute.xlu0 %1030  ;;  %v1380_v23 = vrot.slane %v8589_v1, %v7165_v9 }
 0x1e7   :  { %12049 = vst [vmem:[#allocation235_spill] sm:$0xff] %v8602_v2  ;;  %12050 = vst [vmem:[#allocation236_spill] sm:$0xff] %v8605_v10  ;;  %v5120_v36 = vcombine.low %v1013_v40, %v1035_v62  ;;  %v5121_v55 = vcombine.high %v1013_v40, %v1035_v62  ;;  %v2944_v51 = vcombine.low %v1009_v38, %v1031_v54 }
 0x1e8   :  { %v2945_v5 = vcombine.high %v1009_v38, %v1031_v54  ;;  %1353 = vbcast.lane.b32.xlu1 %v1347_v60, 264  ;;  %1349 = vbcast.lane.b32.xlu0 %v1347_v60, 256  ;;  %12053 = vst [vmem:[#allocation239_spill] sm:$0xff] %v8617_v6  ;;  %v1369_v60 = vrot.slane %v8589_v1, %v7161_v7 }
 0x1e9   :  { %v8610_v4 = vrot.slane %v5120_v36, %v7223_v56  ;;  %v8613_v32 = vrot.slane %v5121_v55, %v7223_v56  ;;  %v2952_v62 = vrot.slane %v2944_v51, %v7223_v56 }
 0x1ea   :  { %v8621_v40 = vrot.slane %v2945_v5, %v7223_v56  ;;  %v1046_v38 = vpop.permute.xlu1 %1045  ;;  %v1042_v55 = vpop.permute.xlu0 %1041 }
 0x1eb   :  { %12051 = vst [vmem:[#allocation237_spill] sm:$0xff] %v8610_v4  ;;  %12052 = vst [vmem:[#allocation238_spill] sm:$0xff] %v8613_v32  ;;  %v5169_v3 = vcombine.high %v8602_v2, %v8610_v4  ;;  %v2993_v54 = vcombine.high %v2936_v25, %v2952_v62  ;;  %v1391_v2 = vrot.slane %v8589_v1, %v7169_v11 }
 0x1ec   :  { %12054 = vst [vmem:[#allocation240_spill] sm:$0xff] %v8621_v40  ;;  %v3009_v63 = vcombine.high %v8617_v6, %v8621_v40  ;;  %1364 = vbcast.lane.b32.xlu1 %v1358_v19, 264  ;;  %1360 = vbcast.lane.b32.xlu0 %v1358_v19, 256  ;;  %v2992_v11 = vcombine.low %v2936_v25, %v2952_v62 }
 0x1ee   :  { %v1057_v51 = vpop.permute.xlu1 %1056  ;;  %v1053_v24 = vpop.permute.xlu0 %1052 }
 0x1f0   :  { %1375 = vbcast.lane.b32.xlu1 %v1369_v60, 264  ;;  %1371 = vbcast.lane.b32.xlu0 %v1369_v60, 256 }
 0x1f2   :  { %v1068_v33 = vpop.permute.xlu1 %1067  ;;  %v1064_v8 = vpop.permute.xlu0 %1063 }
 0x1f3   :  { %v5136_v5 = vcombine.low %v1046_v38, %v1068_v33  ;;  %v5137_v36 = vcombine.high %v1046_v38, %v1068_v33  ;;  %v2960_v4 = vcombine.low %v1042_v55, %v1064_v8  ;;  %v2961_v6 = vcombine.high %v1042_v55, %v1064_v8 }
 0x1f4   :  { %1386 = vbcast.lane.b32.xlu1 %v1380_v23, 264  ;;  %1382 = vbcast.lane.b32.xlu0 %v1380_v23, 256  ;;  %v1402_v33 = vrot.slane %v8589_v1, %v7173_v13 }
 0x1f5   :  { %v8636_v19 = vrot.slane %v5136_v5, %v7223_v56  ;;  %v8639_v40 = vrot.slane %v5137_v36, %v7223_v56  ;;  %v2968_v36 = vrot.slane %v2960_v4, %v7223_v56  ;;  %v8651_v55 = vrot.slane %v2961_v6, %v7223_v56 }
 0x1f6   :  { %v1079_v7 = vpop.permute.xlu1 %1078  ;;  %v1075_v45 = vpop.permute.xlu0 %1074 }
 0x1f7   :  { %12055 = vst [vmem:[#allocation241_spill] sm:$0xff] %v8636_v19  ;;  %12056 = vst [vmem:[#allocation242_spill] sm:$0xff] %v8639_v40  ;;  %v5152_v9 = vcombine.low %v1057_v51, %v1079_v7  ;;  %v5153_v60 = vcombine.high %v1057_v51, %v1079_v7  ;;  %v2976_v18 = vcombine.low %v1053_v24, %v1075_v45 }
 0x1f8   :  { %v2977_v38 = vcombine.high %v1053_v24, %v1075_v45  ;;  %1397 = vbcast.lane.b32.xlu1 %v1391_v2, 264  ;;  %1393 = vbcast.lane.b32.xlu0 %v1391_v2, 256  ;;  %v8662_v2 = vrot.slane %v5169_v3, %v7274_v50  ;;  %v8669_v7 = vrot.slane %v2992_v11, %v7274_v50 }
 0x1f9   :  { %v8644_v23 = vrot.slane %v5152_v9, %v7223_v56  ;;  %v8647_v8 = vrot.slane %v5153_v60, %v7223_v56  ;;  %v2984_v51 = vrot.slane %v2976_v18, %v7223_v56  ;;  %v1413_v18 = vrot.slane %v8589_v1, %v7177_v15 }
 0x1fa   :  { %v8655_v45 = vrot.slane %v2977_v38, %v7223_v56  ;;  %v1090_v24 = vpop.permute.xlu1 %1089  ;;  %v1086_v62 = vpop.permute.xlu0 %1085  ;;  %12059 = vst [vmem:[#allocation245_spill] sm:$0xff] %v8662_v2  ;;  %12060 = vst [vmem:[#allocation246_spill] sm:$0xff] %v8669_v7  ;;  %v8678_v38 = vrot.slane %v2993_v54, %v7274_v50  ;;  %v8689_v11 = vrot.slane %v3009_v63, %v7274_v50 }
 0x1fb   :  { %12057 = vst [vmem:[#allocation243_spill] sm:$0xff] %v8644_v23  ;;  %12058 = vst [vmem:[#allocation244_spill] sm:$0xff] %v8647_v8  ;;  %v5201_v13 = vcombine.high %v8636_v19, %v8644_v23  ;;  %v5217_v25 = vcombine.high %v8639_v40, %v8647_v8  ;;  %v3024_v4 = vcombine.low %v2968_v36, %v2984_v51 }
 0x1fc   :  { %v3025_v5 = vcombine.high %v2968_v36, %v2984_v51  ;;  %v3041_v6 = vcombine.high %v8651_v55, %v8655_v45  ;;  %1408 = vbcast.lane.b32.xlu1 %v1402_v33, 264  ;;  %1404 = vbcast.lane.b32.xlu0 %v1402_v33, 256  ;;  %v1424_v33 = vrot.slane %v8589_v1, %v7181_v17 }
 0x1fd   :  { %v8672_v9 = vrot.slane %v5201_v13, %v7274_v50  ;;  %v8675_v3 = vrot.slane %v3024_v4, %v7274_v50  ;;  %12064 = vst [vmem:[#allocation250_spill] sm:$0xff] %v8689_v11  ;;  %v12065_v17 = vcombine.high %v8605_v10, %v8613_v32  ;;  %v8712_v13 = vrot.slane %v5217_v25, %v7274_v50 }
 0x1fe   :  { %v1101_v60 = vpop.permute.xlu1 %1100  ;;  %v8681_v36 = vrot.slane %v3025_v5, %v7274_v50  ;;  %v8684_v51 = vrot.slane %v3041_v6, %v7274_v50  ;;  %v1097_v15 = vpop.permute.xlu0 %1096  ;;  %v1697_v54 = vcombine.high %v7434_v39, %v7440_v44  ;;  %v1561_v25 = vcombine.high %v7303_v12, %v7312_v28 }
 0x1ff   :  { %12061 = vst [vmem:[#allocation247_spill] sm:$0xff] %v8672_v9  ;;  %12062 = vst [vmem:[#allocation248_spill] sm:$0xff] %v8675_v3  ;;  %v8705_v1 = vrot.slane %v12065_v17, %v7274_v50 }
 0x200   :  { %12063 = vst [vmem:[#allocation249_spill] sm:$0xff] %v8684_v51  ;;  %1419 = vbcast.lane.b32.xlu1 %v1413_v18, 264  ;;  %1415 = vbcast.lane.b32.xlu0 %v1413_v18, 256  ;;  %12067 = vst [vmem:[#allocation252_spill] sm:$0xff] %v8712_v13 }
 0x201   :  { %12066 = vst [vmem:[#allocation251_spill] sm:$0xff] %v8705_v1  ;;  %v2105_v1 = vcombine.high %v7810_v57, %v7816_v41 }
 0x202   :  { %v1112_v4 = vpop.permute.xlu1 %1111  ;;  %v1108_v6 = vpop.permute.xlu0 %1107 }
 0x203   :  { %v5240_v5 = vcombine.low %v1090_v24, %v1112_v4  ;;  %v5241_v40 = vcombine.high %v1090_v24, %v1112_v4  ;;  %v3064_v17 = vcombine.low %v1086_v62, %v1108_v6  ;;  %v3065_v63 = vcombine.high %v1086_v62, %v1108_v6 }
 0x204   :  { %1430 = vbcast.lane.b32.xlu1 %v1424_v33, 264  ;;  %1426 = vbcast.lane.b32.xlu0 %v1424_v33, 256 }
 0x205   :  { %v8723_v24 = vrot.slane %v5240_v5, %v7223_v56  ;;  %v8726_v4 = vrot.slane %v5241_v40, %v7223_v56  ;;  %v1969_v40 = vcombine.high %v7686_v42, %v7692_v35  ;;  %v3072_v5 = vrot.slane %v3064_v17, %v7223_v56 }
 0x206   :  { %v1123_v10 = vpop.permute.xlu1 %1122  ;;  %v1119_v9 = vpop.permute.xlu0 %1118  ;;  %v2513_v42 = vcombine.high %v8182_v43, %v8188_v61 }
 0x207   :  { %12068 = vst [vmem:[#allocation253_spill] sm:$0xff] %v8723_v24  ;;  %12069 = vst [vmem:[#allocation254_spill] sm:$0xff] %v8726_v4  ;;  %v5256_v8 = vcombine.low %v1101_v60, %v1123_v10  ;;  %v5257_v32 = vcombine.high %v1101_v60, %v1123_v10  ;;  %v3080_v18 = vcombine.low %v1097_v15, %v1119_v9 }
 0x208   :  { %v3081_v33 = vcombine.high %v1097_v15, %v1119_v9  ;;  %5802 = vrot.lane.b32.xlu1 %v1697_v54, %s7121_s0  ;;  %5800 = vrot.lane.b32.xlu0 %v1561_v25, %s7121_s0  ;;  %v8740_v10 = vrot.slane %v3065_v63, %v7223_v56  ;;  %v1833_v25 = vcombine.high %v7562_v47, %v7568_v16 }
 0x209   :  { %v8730_v62 = vrot.slane %v5256_v8, %v7223_v56  ;;  %v8733_v6 = vrot.slane %v5257_v32, %v7223_v56  ;;  %v3088_v9 = vrot.slane %v3080_v18, %v7223_v56 }
 0x20a   :  { %v8744_v60 = vrot.slane %v3081_v33, %v7223_v56  ;;  %v1134_v8 = vpop.permute.xlu1 %1133  ;;  %v1130_v54 = vpop.permute.xlu0 %1129  ;;  %v2241_v33 = vcombine.high %v7934_v0, %v7940_v46 }
 0x20b   :  { %12070 = vst [vmem:[#allocation255_spill] sm:$0xff] %v8730_v62  ;;  %12071 = vst [vmem:[#allocation256_spill] sm:$0xff] %v8733_v6  ;;  %v5305_v32 = vcombine.high %v8723_v24, %v8730_v62  ;;  %v5321_v15 = vcombine.high %v8726_v4, %v8733_v6  ;;  %v3129_v17 = vcombine.high %v3072_v5, %v3088_v9  ;;  %v12121_v62 = vld [vmem:[#allocation144_spill] sm:$0xff] }
 0x20c   :  { %v3145_v63 = vcombine.high %v8740_v10, %v8744_v60  ;;  %5806 = vrot.lane.b32.xlu1 %v1969_v40, %s7121_s0  ;;  %5804 = vrot.lane.b32.xlu0 %v1833_v25, %s7121_s0  ;;  %v2377_v25 = vcombine.high %v8058_v53, %v8064_v14 }
 0x20e   :  { %v1145_v18 = vpop.permute.xlu1 %1144  ;;  %v1141_v13 = vpop.permute.xlu0 %1140 }
 0x210   :  { %5810 = vrot.lane.b32.xlu1 %v2241_v33, %s7121_s0  ;;  %5808 = vrot.lane.b32.xlu0 %v2105_v1, %s7121_s0  ;;  %v2785_v1 = vcombine.high %v8427_v59, %v8439_v52  ;;  %v2649_v33 = vcombine.high %v8306_v21, %v8318_v58 }
 0x212   :  { %v1156_v35 = vpop.permute.xlu1 %1155  ;;  %v1152_v39 = vpop.permute.xlu0 %1151 }
 0x213   :  { %v5272_v44 = vcombine.low %v1134_v8, %v1156_v35  ;;  %v5273_v40 = vcombine.high %v1134_v8, %v1156_v35  ;;  %v3096_v46 = vcombine.low %v1130_v54, %v1152_v39  ;;  %v3097_v0 = vcombine.high %v1130_v54, %v1152_v39 }
 0x214   :  { %5814 = vrot.lane.b32.xlu1 %v2513_v42, %s7121_s0  ;;  %5812 = vrot.lane.b32.xlu0 %v2377_v25, %s7121_s0  ;;  %v3128_v39 = vcombine.low %v3072_v5, %v3088_v9 }
 0x215   :  { %v8773_v61 = vrot.slane %v5272_v44, %v7223_v56  ;;  %v8776_v35 = vrot.slane %v5273_v40, %v7223_v56  ;;  %v3057_v44 = vcombine.high %v8669_v7, %v8675_v3  ;;  %v3104_v40 = vrot.slane %v3096_v46, %v7223_v56 }
 0x216   :  { %v1167_v41 = vpop.permute.xlu1 %1166  ;;  %v1163_v42 = vpop.permute.xlu0 %1162  ;;  %v8803_v46 = vrot.slane %v5305_v32, %v7274_v50  ;;  %v8819_v32 = vrot.slane %v5321_v15, %v7274_v50 }
 0x217   :  { %12072 = vst [vmem:[#allocation257_spill] sm:$0xff] %v8773_v61  ;;  %12073 = vst [vmem:[#allocation258_spill] sm:$0xff] %v8776_v35  ;;  %v5288_v8 = vcombine.low %v1145_v18, %v1167_v41  ;;  %v5289_v43 = vcombine.high %v1145_v18, %v1167_v41  ;;  %v3112_v14 = vcombine.low %v1141_v13, %v1163_v42 }
 0x218   :  { %v3113_v25 = vcombine.high %v1141_v13, %v1163_v42  ;;  %5818 = vrot.lane.b32.xlu1 %v2785_v1, %s7121_s0  ;;  %5816 = vrot.lane.b32.xlu0 %v2649_v33, %s7121_s0  ;;  %v8790_v41 = vrot.slane %v3097_v0, %v7223_v56  ;;  %v2921_v33 = vcombine.high %v8548_v22, %v8560_v48 }
 0x219   :  { %v8780_v54 = vrot.slane %v5288_v8, %v7223_v56  ;;  %v8783_v52 = vrot.slane %v5289_v43, %v7223_v56  ;;  %v3120_v13 = vrot.slane %v3112_v14, %v7223_v56  ;;  %12076 = vst [vmem:[#allocation261_spill] sm:$0xff] %v8803_v46  ;;  %v8810_v42 = vrot.slane %v3128_v39, %v7274_v50 }
 0x21a   :  { %v8794_v5 = vrot.slane %v3113_v25, %v7223_v56  ;;  %v1178_v9 = vpop.permute.xlu1 %1177  ;;  %v1174_v1 = vpop.permute.xlu0 %1173  ;;  %v8813_v25 = vrot.slane %v3129_v17, %v7274_v50  ;;  %12079 = vst [vmem:[#allocation264_spill] sm:$0xff] %v8819_v32 }
 0x21b   :  { %12074 = vst [vmem:[#allocation259_spill] sm:$0xff] %v8780_v54  ;;  %12075 = vst [vmem:[#allocation260_spill] sm:$0xff] %v8783_v52  ;;  %v5337_v43 = vcombine.high %v8773_v61, %v8780_v54  ;;  %v5353_v18 = vcombine.high %v8776_v35, %v8783_v52  ;;  %v3160_v0 = vcombine.low %v3104_v40, %v3120_v13 }
 0x21c   :  { %v3161_v8 = vcombine.high %v3104_v40, %v3120_v13  ;;  %v3177_v14 = vcombine.high %v8790_v41, %v8794_v5  ;;  %5822 = vrot.lane.b32.xlu1 %v3057_v44, %s7121_s0  ;;  %5820 = vrot.lane.b32.xlu0 %v2921_v33, %s7121_s0  ;;  %12077 = vst [vmem:[#allocation262_spill] sm:$0xff] %v8810_v42 }
 0x21d   :  { %v8816_v3 = vrot.slane %v5337_v43, %v7274_v50  ;;  %v8822_v13 = vrot.slane %v3160_v0, %v7274_v50  ;;  %v8831_v39 = vrot.slane %v5353_v18, %v7274_v50  ;;  %v8834_v43 = vrot.slane %v3145_v63, %v7274_v50 }
 0x21e   :  { %v1189_v40 = vpop.permute.xlu1 %1188  ;;  %v8825_v44 = vrot.slane %v3161_v8, %v7274_v50  ;;  %v8828_v33 = vrot.slane %v3177_v14, %v7274_v50  ;;  %v1185_v17 = vpop.permute.xlu0 %1184 }
 0x21f   :  { %12078 = vst [vmem:[#allocation263_spill] sm:$0xff] %v8816_v3  ;;  %12080 = vst [vmem:[#allocation265_spill] sm:$0xff] %v8822_v13  ;;  %v3193_v8 = vcombine.high %v8810_v42, %v8822_v13 }
 0x220   :  { %12081 = vst [vmem:[#allocation266_spill] sm:$0xff] %v8831_v39 }
 0x221   :  { %5824 = vrot.lane.b32.xlu0 %v3193_v8, %s7121_s0 }
 0x222   :  { %v1200_v0 = vpop.permute.xlu1 %1199  ;;  %v1196_v13 = vpop.permute.xlu0 %1195 }
 0x223   :  { %v5376_v48 = vcombine.low %v1178_v9, %v1200_v0  ;;  %v5377_v18 = vcombine.high %v1178_v9, %v1200_v0  ;;  %v3200_v42 = vcombine.low %v1174_v1, %v1196_v13  ;;  %v3201_v7 = vcombine.high %v1174_v1, %v1196_v13 }
 0x225   :  { %v8858_v63 = vrot.slane %v5376_v48, %v7223_v56  ;;  %v8861_v15 = vrot.slane %v5377_v18, %v7223_v56  ;;  %v3208_v1 = vrot.slane %v3200_v42, %v7223_v56  ;;  %v8871_v13 = vrot.slane %v3201_v7, %v7223_v56 }
 0x226   :  { %v1211_v22 = vpop.permute.xlu1 %1210  ;;  %v1207_v21 = vpop.permute.xlu0 %1206 }
 0x227   :  { %12082 = vst [vmem:[#allocation267_spill] sm:$0xff] %v8858_v63  ;;  %12083 = vst [vmem:[#allocation268_spill] sm:$0xff] %v8861_v15  ;;  %v5392_v8 = vcombine.low %v1189_v40, %v1211_v22  ;;  %v5393_v58 = vcombine.high %v1189_v40, %v1211_v22  ;;  %v3216_v53 = vcombine.low %v1185_v17, %v1207_v21 }
 0x228   :  { %v3217_v59 = vcombine.high %v1185_v17, %v1207_v21 }
 0x229   :  { %v8864_v57 = vrot.slane %v5392_v8, %v7223_v56  ;;  %v8867_v9 = vrot.slane %v5393_v58, %v7223_v56  ;;  %v3224_v48 = vrot.slane %v3216_v53, %v7223_v56 }
 0x22a   :  { %v8875_v0 = vrot.slane %v3217_v59, %v7223_v56  ;;  %v1222_v22 = vpop.permute.xlu1 %1221  ;;  %v1218_v17 = vpop.permute.xlu0 %1217 }
 0x22b   :  { %12084 = vst [vmem:[#allocation269_spill] sm:$0xff] %v8864_v57  ;;  %12085 = vst [vmem:[#allocation270_spill] sm:$0xff] %v8867_v9  ;;  %v5441_v21 = vcombine.high %v8858_v63, %v8864_v57  ;;  %v5457_v40 = vcombine.high %v8861_v15, %v8867_v9  ;;  %v3265_v58 = vcombine.high %v3208_v1, %v3224_v48 }
 0x22c   :  { %v3281_v42 = vcombine.high %v8871_v13, %v8875_v0  ;;  %v3264_v4 = vcombine.low %v3208_v1, %v3224_v48 }
 0x22e   :  { %v1233_v18 = vpop.permute.xlu1 %1232  ;;  %v1229_v7 = vpop.permute.xlu0 %1228 }
 0x232   :  { %v1244_v8 = vpop.permute.xlu1 %1243  ;;  %v1240_v39 = vpop.permute.xlu0 %1239 }
 0x233   :  { %v5408_v14 = vcombine.low %v1222_v22, %v1244_v8  ;;  %v5409_v53 = vcombine.high %v1222_v22, %v1244_v8  ;;  %v3232_v59 = vcombine.low %v1218_v17, %v1240_v39  ;;  %v3233_v32 = vcombine.high %v1218_v17, %v1240_v39 }
 0x235   :  { %v8884_v47 = vrot.slane %v5408_v14, %v7223_v56  ;;  %v8887_v28 = vrot.slane %v5409_v53, %v7223_v56  ;;  %v3240_v39 = vrot.slane %v3232_v59, %v7223_v56  ;;  %v8897_v14 = vrot.slane %v3233_v32, %v7223_v56 }
 0x236   :  { %v1255_v16 = vpop.permute.xlu1 %1254  ;;  %v1251_v9 = vpop.permute.xlu0 %1250  ;;  %v8922_v53 = vrot.slane %v5457_v40, %v7274_v50 }
 0x237   :  { %12086 = vst [vmem:[#allocation271_spill] sm:$0xff] %v8884_v47  ;;  %12087 = vst [vmem:[#allocation272_spill] sm:$0xff] %v8887_v28  ;;  %v5424_v12 = vcombine.low %v1233_v18, %v1255_v16  ;;  %v5425_v15 = vcombine.high %v1233_v18, %v1255_v16  ;;  %v3248_v35 = vcombine.low %v1229_v7, %v1251_v9 }
 0x238   :  { %v3249_v52 = vcombine.high %v1229_v7, %v1251_v9  ;;  %12093 = vst [vmem:[#allocation278_spill] sm:$0xff] %v8922_v53 }
 0x239   :  { %v8890_v6 = vrot.slane %v5424_v12, %v7223_v56  ;;  %v8893_v22 = vrot.slane %v5425_v15, %v7223_v56  ;;  %v3256_v17 = vrot.slane %v3248_v35, %v7223_v56  ;;  %v8908_v15 = vrot.slane %v5441_v21, %v7274_v50 }
 0x23a   :  { %v8901_v8 = vrot.slane %v3249_v52, %v7223_v56  ;;  %v1266_v16 = vpop.permute.xlu1 %1265  ;;  %v1262_v1 = vpop.permute.xlu0 %1261  ;;  %v8913_v35 = vrot.slane %v3264_v4, %v7274_v50  ;;  %v8916_v52 = vrot.slane %v3265_v58, %v7274_v50 }
 0x23b   :  { %12088 = vst [vmem:[#allocation273_spill] sm:$0xff] %v8890_v6  ;;  %12089 = vst [vmem:[#allocation274_spill] sm:$0xff] %v8893_v22  ;;  %v5473_v9 = vcombine.high %v8884_v47, %v8890_v6  ;;  %v5489_v12 = vcombine.high %v8887_v28, %v8893_v22  ;;  %v3296_v48 = vcombine.low %v3240_v39, %v3256_v17 }
 0x23c   :  { %12090 = vst [vmem:[#allocation275_spill] sm:$0xff] %v8908_v15  ;;  %v3297_v18 = vcombine.high %v3240_v39, %v3256_v17  ;;  %v3313_v32 = vcombine.high %v8897_v14, %v8901_v8  ;;  %12091 = vst [vmem:[#allocation276_spill] sm:$0xff] %v8913_v35 }
 0x23d   :  { %v8919_v7 = vrot.slane %v5473_v9, %v7274_v50  ;;  %v8925_v21 = vrot.slane %v3296_v48, %v7274_v50  ;;  %v8934_v4 = vrot.slane %v5489_v12, %v7274_v50  ;;  %v8937_v9 = vrot.slane %v3281_v42, %v7274_v50 }
 0x23e   :  { %v1277_v59 = vpop.permute.xlu1 %1276  ;;  %v8928_v39 = vrot.slane %v3297_v18, %v7274_v50  ;;  %v8931_v17 = vrot.slane %v3313_v32, %v7274_v50  ;;  %v1273_v58 = vpop.permute.xlu0 %1272 }
 0x23f   :  { %12092 = vst [vmem:[#allocation277_spill] sm:$0xff] %v8919_v7  ;;  %12094 = vst [vmem:[#allocation279_spill] sm:$0xff] %v8925_v21  ;;  %v3329_v18 = vcombine.high %v8913_v35, %v8925_v21 }
 0x240   :  { %12095 = vst [vmem:[#allocation280_spill] sm:$0xff] %v8931_v17  ;;  %12096 = vst [vmem:[#allocation281_spill] sm:$0xff] %v8934_v4 }
 0x241   :  { %12097 = vst [vmem:[#allocation282_spill] sm:$0xff] %v8937_v9  ;;  %5826 = vrot.lane.b32.xlu1 %v3329_v18, %s7121_s0 }
 0x242   :  { %v1288_v48 = vpop.permute.xlu1 %1287  ;;  %v1284_v21 = vpop.permute.xlu0 %1283 }
 0x243   :  { %v5512_v7 = vcombine.low %v1266_v16, %v1288_v48  ;;  %v5513_v12 = vcombine.high %v1266_v16, %v1288_v48  ;;  %v3337_v35 = vcombine.high %v1262_v1, %v1284_v21  ;;  %v3336_v46 = vcombine.low %v1262_v1, %v1284_v21 }
 0x245   :  { %v8961_v15 = vrot.slane %v5512_v7, %v7223_v56  ;;  %v8964_v42 = vrot.slane %v5513_v12, %v7223_v56  ;;  %v8973_v16 = vrot.slane %v3337_v35, %v7223_v56  ;;  %v8988_v57 = vrot.slane %v3336_v46, %v7223_v56 }
 0x246   :  { %v1299_v28 = vpop.permute.xlu1 %1298  ;;  %v1295_v2 = vpop.permute.xlu0 %1294 }
 0x247   :  { %12098 = vst [vmem:[#allocation283_spill] sm:$0xff] %v8961_v15  ;;  %12099 = vst [vmem:[#allocation284_spill] sm:$0xff] %v8964_v42  ;;  %v5528_v40 = vcombine.low %v1277_v59, %v1299_v28  ;;  %v5529_v18 = vcombine.high %v1277_v59, %v1299_v28  ;;  %v3353_v3 = vcombine.high %v1273_v58, %v1295_v2 }
 0x248   :  { %v3352_v53 = vcombine.low %v1273_v58, %v1295_v2 }
 0x249   :  { %v8967_v22 = vrot.slane %v5528_v40, %v7223_v56  ;;  %v8970_v32 = vrot.slane %v5529_v18, %v7223_v56  ;;  %v8976_v48 = vrot.slane %v3353_v3, %v7223_v56 }
 0x24a   :  { %v1310_v7 = vpop.permute.xlu1 %1309  ;;  %v1306_v59 = vpop.permute.xlu0 %1305  ;;  %v8985_v63 = vrot.slane %v3352_v53, %v7223_v56 }
 0x24b   :  { %12100 = vst [vmem:[#allocation285_spill] sm:$0xff] %v8967_v22  ;;  %12101 = vst [vmem:[#allocation286_spill] sm:$0xff] %v8970_v32  ;;  %v5577_v12 = vcombine.high %v8961_v15, %v8967_v22  ;;  %v5593_v28 = vcombine.high %v8964_v42, %v8970_v32  ;;  %v3417_v40 = vcombine.high %v8973_v16, %v8976_v48 }
 0x24c   :  { %v3400_v53 = vcombine.low %v8988_v57, %v8985_v63 }
 0x24e   :  { %v1321_v4 = vpop.permute.xlu1 %1320  ;;  %v1317_v18 = vpop.permute.xlu0 %1316 }
 0x252   :  { %v1332_v35 = vpop.permute.xlu1 %1331  ;;  %v1328_v3 = vpop.permute.xlu0 %1327 }
 0x253   :  { %v5544_v47 = vcombine.low %v1310_v7, %v1332_v35  ;;  %v5545_v6 = vcombine.high %v1310_v7, %v1332_v35  ;;  %v3368_v19 = vcombine.low %v1306_v59, %v1328_v3  ;;  %v3369_v42 = vcombine.high %v1306_v59, %v1328_v3 }
 0x255   :  { %v8991_v23 = vrot.slane %v5544_v47, %v7223_v56  ;;  %v8994_v15 = vrot.slane %v5545_v6, %v7223_v56  ;;  %v9005_v47 = vrot.slane %v3368_v19, %v7223_v56  ;;  %v9008_v6 = vrot.slane %v3369_v42, %v7223_v56 }
 0x256   :  { %v1343_v32 = vpop.permute.xlu1 %1342  ;;  %v1339_v21 = vpop.permute.xlu0 %1338  ;;  %v9021_v19 = vrot.slane %v5577_v12, %v7274_v50 }
 0x257   :  { %12102 = vst [vmem:[#allocation287_spill] sm:$0xff] %v8991_v23  ;;  %12103 = vst [vmem:[#allocation288_spill] sm:$0xff] %v8994_v15  ;;  %v5560_v2 = vcombine.low %v1321_v4, %v1343_v32  ;;  %v5561_v1 = vcombine.high %v1321_v4, %v1343_v32  ;;  %v3384_v58 = vcombine.low %v1317_v18, %v1339_v21 }
 0x258   :  { %v3385_v7 = vcombine.high %v1317_v18, %v1339_v21  ;;  %12106 = vst [vmem:[#allocation291_spill] sm:$0xff] %v9021_v19 }
 0x259   :  { %v8999_v46 = vrot.slane %v5560_v2, %v7223_v56  ;;  %v9002_v59 = vrot.slane %v5561_v1, %v7223_v56  ;;  %v9011_v4 = vrot.slane %v3384_v58, %v7223_v56  ;;  %v9031_v58 = vrot.slane %v5593_v28, %v7274_v50 }
 0x25a   :  { %v9014_v32 = vrot.slane %v3385_v7, %v7223_v56  ;;  %v1354_v18 = vpop.permute.xlu1 %1353  ;;  %v1350_v2 = vpop.permute.xlu0 %1349 }
 0x25b   :  { %12104 = vst [vmem:[#allocation289_spill] sm:$0xff] %v8999_v46  ;;  %12105 = vst [vmem:[#allocation290_spill] sm:$0xff] %v9002_v59  ;;  %v5609_v35 = vcombine.high %v8991_v23, %v8999_v46  ;;  %v5625_v3 = vcombine.high %v8994_v15, %v9002_v59  ;;  %v3432_v42 = vcombine.low %v9005_v47, %v9011_v4 }
 0x25c   :  { %v3449_v1 = vcombine.high %v9008_v6, %v9014_v32  ;;  %12108 = vst [vmem:[#allocation293_spill] sm:$0xff] %v9031_v58  ;;  %v9034_v23 = vrot.slane %v3400_v53, %v7274_v50 }
 0x25d   :  { %v9028_v21 = vrot.slane %v5609_v35, %v7274_v50  ;;  %v9037_v15 = vrot.slane %v3432_v42, %v7274_v50  ;;  %v9043_v59 = vrot.slane %v5625_v3, %v7274_v50  ;;  %v9046_v35 = vrot.slane %v3417_v40, %v7274_v50 }
 0x25e   :  { %v1365_v7 = vpop.permute.xlu1 %1364  ;;  %12109 = vst [vmem:[#allocation294_spill] sm:$0xff] %v9034_v23  ;;  %v9040_v12 = vrot.slane %v3449_v1, %v7274_v50  ;;  %v1361_v46 = vpop.permute.xlu0 %1360  ;;  %v12114_v1 = vcombine.low %v7315_v29, %v7318_v30 }
 0x25f   :  { %12107 = vst [vmem:[#allocation292_spill] sm:$0xff] %v9028_v21  ;;  %12110 = vst [vmem:[#allocation295_spill] sm:$0xff] %v9037_v15  ;;  %v3465_v42 = vcombine.high %v9034_v23, %v9037_v15 }
 0x260   :  { %12111 = vst [vmem:[#allocation296_spill] sm:$0xff] %v9040_v12  ;;  %12112 = vst [vmem:[#allocation297_spill] sm:$0xff] %v9043_v59 }
 0x261   :  { %12113 = vst [vmem:[#allocation298_spill] sm:$0xff] %v9046_v35  ;;  %5828 = vrot.lane.b32.xlu0 %v3465_v42, %s7121_s0 }
 0x262   :  { %v1376_v40 = vpop.permute.xlu1 %1375  ;;  %v1372_v61 = vpop.permute.xlu0 %1371 }
 0x263   :  { %v5648_v21 = vcombine.low %v1354_v18, %v1376_v40  ;;  %v5649_v19 = vcombine.high %v1354_v18, %v1376_v40  ;;  %v3473_v54 = vcombine.high %v1350_v2, %v1372_v61 }
 0x265   :  { %5864 = vrot.lane.b32.xlu0 %v12114_v1, %s7122_s9  ;;  %v9070_v42 = vrot.slane %v5648_v21, %v7223_v56  ;;  %v9073_v3 = vrot.slane %v5649_v19, %v7223_v56  ;;  %v9082_v58 = vrot.slane %v3473_v54, %v7223_v56  ;;  %v12119_v19 = vcombine.low %v7571_v27, %v7574_v49 }
 0x266   :  { %v1387_v22 = vpop.permute.xlu1 %1386  ;;  %v1383_v53 = vpop.permute.xlu0 %1382 }
 0x267   :  { %12115 = vst [vmem:[#allocation299_spill] sm:$0xff] %v9070_v42  ;;  %12116 = vst [vmem:[#allocation300_spill] sm:$0xff] %v9073_v3  ;;  %v5664_v28 = vcombine.low %v1365_v7, %v1387_v22  ;;  %v5665_v15 = vcombine.high %v1365_v7, %v1387_v22  ;;  %v3489_v59 = vcombine.high %v1361_v46, %v1383_v53 }
 0x268   :  { %v3488_v24 = vcombine.low %v1361_v46, %v1383_v53  ;;  %v12123_v46 = vld [vmem:[#allocation185_spill] sm:$0xff] }
 0x269   :  { %v9076_v18 = vrot.slane %v5664_v28, %v7223_v56  ;;  %v9079_v40 = vrot.slane %v5665_v15, %v7223_v56  ;;  %v9085_v1 = vrot.slane %v3489_v59, %v7223_v56  ;;  %5868 = vrot.lane.b32.xlu0 %v12119_v19, %s7122_s9  ;;  %v12120_v59 = vcombine.low %v7819_v20, %v7822_v34 }
 0x26a   :  { %v1398_v22 = vpop.permute.xlu1 %1397  ;;  %v1394_v15 = vpop.permute.xlu0 %1393  ;;  %v3472_v19 = vcombine.low %v1350_v2, %v1372_v61  ;;  %v9106_v9 = vrot.slane %v3488_v24, %v7223_v56  ;;  %v12124_v61 = vld [vmem:[#allocation189_spill] sm:$0xff] }
 0x26b   :  { %12117 = vst [vmem:[#allocation301_spill] sm:$0xff] %v9076_v18  ;;  %12118 = vst [vmem:[#allocation302_spill] sm:$0xff] %v9079_v40  ;;  %v5713_v21 = vcombine.high %v9070_v42, %v9076_v18  ;;  %v5729_v7 = vcombine.high %v9073_v3, %v9079_v40  ;;  %v3553_v54 = vcombine.high %v9082_v58, %v9085_v1 }
 0x26c   :  { %v12122_v42 = vcombine.low %v8067_v26, %v12121_v62  ;;  %v9109_v51 = vrot.slane %v3472_v19, %v7223_v56  ;;  %v12125_v2 = vcombine.low %v12123_v46, %v12124_v61  ;;  %v3433_v19 = vcombine.high %v9005_v47, %v9011_v4 }
 0x26d   :  { %5872 = vrot.lane.b32.xlu0 %v12120_v59, %s7122_s9 }
 0x26e   :  { %v1409_v28 = vpop.permute.xlu1 %1408  ;;  %v1405_v23 = vpop.permute.xlu0 %1404 }
 0x271   :  { %5876 = vrot.lane.b32.xlu0 %v12122_v42, %s7122_s9 }
 0x272   :  { %v1420_v18 = vpop.permute.xlu1 %1419  ;;  %v1416_v17 = vpop.permute.xlu0 %1415 }
 0x273   :  { %v5680_v3 = vcombine.low %v1398_v22, %v1420_v18  ;;  %v5681_v40 = vcombine.high %v1398_v22, %v1420_v18  ;;  %v3504_v59 = vcombine.low %v1394_v15, %v1416_v17  ;;  %v3505_v11 = vcombine.high %v1394_v15, %v1416_v17 }
 0x274   :  { %v3401_v15 = vcombine.high %v8988_v57, %v8985_v63  ;;  %v12127_v57 = vcombine.low %v8551_v31, %v8563_v37 }
 0x275   :  { %5880 = vrot.lane.b32.xlu0 %v12125_v2, %s7122_s9  ;;  %v9116_v42 = vrot.slane %v5680_v3, %v7223_v56  ;;  %v9119_v18 = vrot.slane %v5681_v40, %v7223_v56  ;;  %v3536_v2 = vcombine.low %v9109_v51, %v9106_v9 }
 0x276   :  { %v1431_v53 = vpop.permute.xlu1 %1430  ;;  %v1427_v12 = vpop.permute.xlu0 %1426 }
 0x277   :  { %12126 = vst [vmem:[#allocation144_spill] sm:$0xff] %v9119_v18  ;;  %v5696_v22 = vcombine.low %v1409_v28, %v1431_v53  ;;  %v5697_v24 = vcombine.high %v1409_v28, %v1431_v53  ;;  %v3520_v35 = vcombine.low %v1405_v23, %v1427_v12  ;;  %v3521_v17 = vcombine.high %v1405_v23, %v1427_v12 }
 0x278   :  { %v3512_v28 = vrot.slane %v3504_v59, %v7223_v56  ;;  %v9135_v53 = vrot.slane %v3505_v11, %v7223_v56  ;;  %v9150_v12 = vrot.slane %v5713_v21, %v7274_v50 }
 0x279   :  { %v9128_v3 = vrot.slane %v5696_v22, %v7223_v56  ;;  %v9131_v40 = vrot.slane %v5697_v24, %v7223_v56  ;;  %v3528_v47 = vrot.slane %v3520_v35, %v7223_v56  ;;  %v9139_v23 = vrot.slane %v3521_v17, %v7223_v56  ;;  %5884 = vrot.lane.b32.xlu0 %v12127_v57, %s7122_s9 }
 0x27a   :  { %v3447_v56 = vrot.slane %v3433_v19, %v7274_v50  ;;  %v12128_v22 = vcombine.low %v8813_v25, %v8825_v44  ;;  %v3415_v24 = vrot.slane %v3401_v15, %v7274_v50  ;;  %v9164_v17 = vrot.slane %v3536_v2, %v7274_v50  ;;  %v12138_v15 = vld [vmem:[#allocation80_spill] sm:$0xff] }
 0x27b   :  { %v5745_v63 = vcombine.high %v9116_v42, %v9128_v3  ;;  %v5761_v4 = vcombine.high %v9119_v18, %v9131_v40  ;;  %v3568_v11 = vcombine.low %v3512_v28, %v3528_v47  ;;  %v3585_v35 = vcombine.high %v9135_v53, %v9139_v23 }
 0x27c   :  { %12129 = vst [vmem:[#allocation185_spill] sm:$0xff] %v9164_v17  ;;  %v9173_v19 = vrot.slane %v3553_v54, %v7274_v50  ;;  %v3466_v18 = vcombine.low %v3415_v24, %v3447_v56  ;;  %v12135_v54 = vld [vmem:[#allocation39_spill] sm:$0xff] }
 0x27d   :  { %v9156_v59 = vrot.slane %v5745_v63, %v7274_v50  ;;  %5888 = vrot.lane.b32.xlu0 %v12128_v22, %s7122_s9  ;;  %v9167_v21 = vrot.slane %v3568_v11, %v7274_v50  ;;  %v9170_v57 = vrot.slane %v3585_v35, %v7274_v50  ;;  %v9184_v11 = vrot.slane %v5729_v7, %v7274_v50  ;;  %v12139_v35 = vld [vmem:[#allocation81_spill] sm:$0xff] }
 0x27e   :  { %v9193_v63 = vrot.slane %v5761_v4, %v7274_v50  ;;  %v12137_v4 = vcombine.high %v7571_v27, %v7574_v49  ;;  %v12140_v7 = vcombine.low %v12138_v15, %v12139_v35  ;;  %v12145_v27 = vcombine.high %v8067_v26, %v12121_v62  ;;  %v12146_v49 = vld [vmem:[#allocation165_spill] sm:$0xff] }
 0x27f   :  { %12130 = vst [vmem:[#allocation189_spill] sm:$0xff] %v9167_v21  ;;  %v3601_v22 = vcombine.high %v9164_v17, %v9167_v21  ;;  %12131 = vst [vmem:[#allocation303_spill] sm:$0xff] %v9184_v11  ;;  %v3537_v26 = vcombine.high %v9109_v51, %v9106_v9  ;;  %v12153_v62 = vcombine.high %v8551_v31, %v8563_v37  ;;  %v12161_v9 = vld [vmem:[#allocation54_spill] sm:$0xff]  ;;  %v12291_v17 = vld [vmem:[#allocation280_spill] sm:$0xff] }
 0x280   :  { %12132 = vst [vmem:[#allocation304_spill] sm:$0xff] %v9193_v63  ;;  %v12159_v51 = vcombine.high %v8813_v25, %v8825_v44  ;;  %v12160_v37 = vcombine.low %v8916_v52, %v8928_v39  ;;  %v12163_v25 = vld [vmem:[#allocation48_spill] sm:$0xff]  ;;  %v12164_v44 = vld [vmem:[#allocation49_spill] sm:$0xff]  ;;  %v12290_v21 = vld [vmem:[#allocation282_spill] sm:$0xff] }
 0x281   :  { %5892 = vrot.lane.b32.xlu0 %v3466_v18, %s7122_s9  ;;  %5830 = vrot.lane.b32.xlu1 %v3601_v22, %s7121_s0  ;;  %v12133_v18 = vcombine.high %v7315_v29, %v7318_v30  ;;  %v12134_v22 = vld [vmem:[#allocation38_spill] sm:$0xff]  ;;  %v12141_v29 = vcombine.high %v7819_v20, %v7822_v34  ;;  %v12149_v20 = vcombine.high %v12123_v46, %v12124_v61  ;;  %v12150_v34 = vld [vmem:[#allocation207_spill] sm:$0xff]  ;;  %v12155_v46 = vld [vmem:[#allocation12_spill] sm:$0xff] }
 0x282   :  { %v12136_v2 = vcombine.low %v12134_v22, %v12135_v54  ;;  %v12142_v30 = vld [vmem:[#allocation122_spill] sm:$0xff]  ;;  %v12156_v61 = vld [vmem:[#allocation13_spill] sm:$0xff]  ;;  %v9265_v31 = vrot.slane %v3537_v26, %v7274_v50 }
 0x285   :  { %5928 = vrot.lane.b32.xlu0 %v12133_v18, %s7123_s10  ;;  %5866 = vrot.lane.b32.xlu1 %v12136_v2, %s7122_s9  ;;  %v12143_v18 = vld [vmem:[#allocation123_spill] sm:$0xff]  ;;  %v12147_v2 = vld [vmem:[#allocation166_spill] sm:$0xff] }
 0x286   :  { %v12144_v63 = vcombine.low %v12142_v30, %v12143_v18 }
 0x289   :  { %5932 = vrot.lane.b32.xlu0 %v12137_v4, %s7123_s10  ;;  %5870 = vrot.lane.b32.xlu1 %v12140_v7, %s7122_s9  ;;  %v12148_v4 = vcombine.low %v12146_v49, %v12147_v2  ;;  %v12151_v7 = vld [vmem:[#allocation211_spill] sm:$0xff] }
 0x28d   :  { %5936 = vrot.lane.b32.xlu0 %v12141_v29, %s7123_s10  ;;  %5874 = vrot.lane.b32.xlu1 %v12144_v63, %s7122_s9  ;;  %v12152_v29 = vcombine.low %v12150_v34, %v12151_v7  ;;  %v3569_v63 = vcombine.high %v3512_v28, %v3528_v47  ;;  %v12157_v28 = vld [vmem:[#allocation6_spill] sm:$0xff]  ;;  %v12158_v47 = vld [vmem:[#allocation7_spill] sm:$0xff] }
 0x291   :  { %5940 = vrot.lane.b32.xlu0 %v12145_v27, %s7123_s10  ;;  %5878 = vrot.lane.b32.xlu1 %v12148_v4, %s7122_s9  ;;  %v12154_v27 = vcombine.low %v8678_v38, %v8681_v36  ;;  %v1544_v4 = vcombine.low %v12156_v61, %v12155_v46 }
 0x293   :  { %v9272_v61 = vrot.slane %v1544_v4, %v7274_v50  ;;  %v12167_v4 = vld [vmem:[#allocation91_spill] sm:$0xff] }
 0x295   :  { %5944 = vrot.lane.b32.xlu0 %v12149_v20, %s7123_s10  ;;  %5882 = vrot.lane.b32.xlu1 %v12152_v29, %s7122_s9  ;;  %v9252_v20 = vrot.slane %v3569_v63, %v7274_v50  ;;  %v1512_v29 = vcombine.low %v12158_v47, %v12157_v28  ;;  %v1784_v28 = vcombine.low %v12164_v44, %v12163_v25  ;;  %v12165_v47 = vld [vmem:[#allocation97_spill] sm:$0xff]  ;;  %v12171_v25 = vld [vmem:[#allocation138_spill] sm:$0xff] }
 0x297   :  { %v3602_v46 = vcombine.low %v9265_v31, %v9252_v20  ;;  %v9279_v26 = vrot.slane %v1512_v29, %v7274_v50  ;;  %v12169_v29 = vcombine.high %v12134_v22, %v12135_v54  ;;  %v12174_v54 = vcombine.high %v12138_v15, %v12139_v35 }
 0x298   :  { %v12179_v15 = vcombine.high %v12142_v30, %v12143_v18  ;;  %v12184_v30 = vcombine.high %v12146_v49, %v12147_v2  ;;  %v12185_v49 = vcombine.high %v12150_v34, %v12151_v7  ;;  %v12186_v34 = vcombine.high %v8678_v38, %v8681_v36  ;;  %v12188_v7 = vld [vmem:[#allocation33_spill] sm:$0xff] }
 0x299   :  { %5948 = vrot.lane.b32.xlu0 %v12153_v62, %s7123_s10  ;;  %5886 = vrot.lane.b32.xlu1 %v12154_v27, %s7122_s9  ;;  %v12162_v62 = vld [vmem:[#allocation55_spill] sm:$0xff]  ;;  %v3467_v27 = vcombine.high %v3415_v24, %v3447_v56  ;;  %v1564_v56 = vcombine.low %v9279_v26, %v9272_v61  ;;  %v12192_v38 = vcombine.high %v8916_v52, %v8928_v39  ;;  %v12197_v39 = vld [vmem:[#allocation117_spill] sm:$0xff] }
 0x29a   :  { %v1816_v63 = vcombine.low %v12162_v62, %v12161_v9  ;;  %v12168_v9 = vld [vmem:[#allocation90_spill] sm:$0xff] }
 0x29b   :  { %v2056_v62 = vcombine.low %v12168_v9, %v12167_v4  ;;  %v12173_v4 = vld [vmem:[#allocation132_spill] sm:$0xff]  ;;  %v12176_v9 = vld [vmem:[#allocation181_spill] sm:$0xff] }
 0x29c   :  { %v9286_v24 = vrot.slane %v1816_v63, %v7274_v50 }
 0x29d   :  { %5952 = vrot.lane.b32.xlu0 %v12159_v51, %s7123_s10  ;;  %5890 = vrot.lane.b32.xlu1 %v12160_v37, %s7122_s9  ;;  %v12166_v51 = vld [vmem:[#allocation96_spill] sm:$0xff]  ;;  %v9313_v22 = vrot.slane %v2056_v62, %v7274_v50  ;;  %v12180_v62 = vld [vmem:[#allocation226_spill] sm:$0xff] }
 0x29e   :  { %v2088_v37 = vcombine.low %v12166_v51, %v12165_v47  ;;  %v12172_v51 = vld [vmem:[#allocation133_spill] sm:$0xff] }
 0x2a0   :  { %v9303_v47 = vrot.slane %v2088_v37, %v7274_v50 }
 0x2a1   :  { %5956 = vrot.lane.b32.xlu0 %v3467_v27, %s7123_s10  ;;  %5894 = vrot.lane.b32.xlu1 %v3602_v46, %s7122_s9  ;;  %v9296_v27 = vrot.slane %v1784_v28, %v7274_v50  ;;  %v12170_v46 = vld [vmem:[#allocation139_spill] sm:$0xff]  ;;  %v12175_v28 = vld [vmem:[#allocation182_spill] sm:$0xff] }
 0x2a2   :  { %v2360_v44 = vcombine.low %v12171_v25, %v12170_v46  ;;  %v9317_v46 = vpop.permute.xlu0 %5800  ;;  %v2108_v37 = vcombine.low %v9313_v22, %v9303_v47 }
 0x2a3   :  { %v1836_v63 = vcombine.low %v9296_v27, %v9286_v24 }
 0x2a4   :  { %v9322_v25 = vrot.slane %v2360_v44, %v7274_v50 }
 0x2a5   :  { %5992 = vrot.lane.b32.xlu0 %v1564_v56, %s7124_s11  ;;  %5930 = vrot.lane.b32.xlu1 %v12169_v29, %s7123_s10  ;;  %v2328_v56 = vcombine.low %v12173_v4, %v12172_v51  ;;  %v2632_v29 = vcombine.low %v12176_v9, %v12175_v28  ;;  %v12178_v51 = vld [vmem:[#allocation175_spill] sm:$0xff] }
 0x2a6   :  { %v9343_v11 = vpop.permute.xlu0 %5804 }
 0x2a7   :  { %v9332_v35 = vrot.slane %v2328_v56, %v7274_v50  ;;  %v9339_v9 = vrot.slane %v2632_v29, %v7274_v50  ;;  %v3176_v56 = vcombine.low %v8790_v41, %v8794_v5  ;;  %v3448_v41 = vcombine.low %v9008_v6, %v9014_v32  ;;  %v12187_v32 = vld [vmem:[#allocation32_spill] sm:$0xff] }
 0x2a9   :  { %5996 = vrot.lane.b32.xlu0 %v1836_v63, %s7124_s11  ;;  %5934 = vrot.lane.b32.xlu1 %v12174_v54, %s7123_s10  ;;  %v12177_v63 = vld [vmem:[#allocation176_spill] sm:$0xff]  ;;  %v12181_v54 = vld [vmem:[#allocation225_spill] sm:$0xff]  ;;  %v2380_v44 = vcombine.low %v9332_v35, %v9322_v25 }
 0x2aa   :  { %v2600_v4 = vcombine.low %v12178_v51, %v12177_v63  ;;  %v2904_v28 = vcombine.low %v12181_v54, %v12180_v62  ;;  %v12182_v63 = vld [vmem:[#allocation220_spill] sm:$0xff]  ;;  %v12183_v51 = vld [vmem:[#allocation219_spill] sm:$0xff]  ;;  %v3144_v62 = vcombine.low %v8740_v10, %v8744_v60  ;;  %v9372_v5 = vpop.permute.xlu0 %5808  ;;  %v9377_v10 = vrot.slane %v3176_v56, %v7274_v50 }
 0x2ab   :  { %v3416_v60 = vcombine.low %v8973_v16, %v8976_v48  ;;  %v1680_v54 = vcombine.low %v12188_v7, %v12187_v32  ;;  %v12189_v16 = vld [vmem:[#allocation26_spill] sm:$0xff]  ;;  %v12190_v48 = vld [vmem:[#allocation27_spill] sm:$0xff] }
 0x2ac   :  { %v9351_v18 = vrot.slane %v2600_v4, %v7274_v50  ;;  %v9387_v6 = vrot.slane %v3144_v62, %v7274_v50  ;;  %v3603_v62 = vcombine.high %v9265_v31, %v9252_v20  ;;  %v1565_v20 = vcombine.high %v9279_v26, %v9272_v61 }
 0x2ad   :  { %6000 = vrot.lane.b32.xlu0 %v2108_v37, %s7124_s11  ;;  %5938 = vrot.lane.b32.xlu1 %v12179_v15, %s7123_s10  ;;  %v2872_v37 = vcombine.low %v12183_v51, %v12182_v63  ;;  %v9358_v15 = vrot.slane %v2904_v28, %v7274_v50  ;;  %v1648_v63 = vcombine.low %v12190_v48, %v12189_v16  ;;  %v12201_v16 = vld [vmem:[#allocation110_spill] sm:$0xff] }
 0x2ae   :  { %v2652_v29 = vcombine.low %v9351_v18, %v9339_v9  ;;  %v3196_v28 = vcombine.low %v9387_v6, %v9377_v10  ;;  %v9398_v51 = vpop.permute.xlu0 %5812  ;;  %v9406_v36 = vrot.slane %v3416_v60, %v7274_v50  ;;  %v12198_v60 = vld [vmem:[#allocation116_spill] sm:$0xff]  ;;  %v1837_v26 = vcombine.high %v9296_v27, %v9286_v24  ;;  %v12208_v24 = vld [vmem:[#allocation203_spill] sm:$0xff] }
 0x2af   :  { %v9368_v2 = vrot.slane %v2872_v37, %v7274_v50  ;;  %12191 = vst [vmem:[#allocation38_spill] sm:$0xff] %v9398_v51  ;;  %v12193_v37 = vld [vmem:[#allocation74_spill] sm:$0xff]  ;;  %v9422_v52 = vrot.slane %v1648_v63, %v7274_v50  ;;  %v2224_v32 = vcombine.low %v12198_v60, %v12197_v39  ;;  %v12207_v39 = vld [vmem:[#allocation204_spill] sm:$0xff]  ;;  %v2109_v60 = vcombine.high %v9313_v22, %v9303_v47 }
 0x2b0   :  { %v2768_v27 = vcombine.low %v12208_v24, %v12207_v39  ;;  %v3040_v47 = vcombine.low %v8651_v55, %v8655_v45  ;;  %v3312_v55 = vcombine.low %v8897_v14, %v8901_v8  ;;  %v3584_v14 = vcombine.low %v9135_v53, %v9139_v23 }
 0x2b1   :  { %6004 = vrot.lane.b32.xlu0 %v2380_v44, %s7124_s11  ;;  %5942 = vrot.lane.b32.xlu1 %v12184_v30, %s7123_s10  ;;  %v2924_v4 = vcombine.low %v9368_v2, %v9358_v15  ;;  %v9394_v44 = vrot.slane %v3448_v41, %v7274_v50  ;;  %v12194_v30 = vld [vmem:[#allocation75_spill] sm:$0xff]  ;;  %v12195_v41 = vld [vmem:[#allocation68_spill] sm:$0xff]  ;;  %v3197_v23 = vcombine.high %v9387_v6, %v9377_v10 }
 0x2b2   :  { %v1952_v56 = vcombine.low %v12194_v30, %v12193_v37  ;;  %v9426_v7 = vpop.permute.xlu0 %5816  ;;  %v12203_v37 = vld [vmem:[#allocation159_spill] sm:$0xff]  ;;  %v3048_v24 = vrot.slane %v3040_v47, %v7274_v50 }
 0x2b3   :  { %12199 = vst [vmem:[#allocation39_spill] sm:$0xff] %v9426_v7 }
 0x2b5   :  { %6008 = vrot.lane.b32.xlu0 %v2652_v29, %s7124_s11  ;;  %5946 = vrot.lane.b32.xlu1 %v12185_v49, %s7123_s10  ;;  %v3468_v29 = vcombine.low %v9406_v36, %v9394_v44  ;;  %v9415_v49 = vrot.slane %v1680_v54, %v7274_v50  ;;  %v9433_v54 = vrot.slane %v1952_v56, %v7274_v50 }
 0x2b6   :  { %v9449_v56 = vrot.slane %v2224_v32, %v7274_v50 }
 0x2b7   :  { %v1700_v31 = vcombine.low %v9422_v52, %v9415_v49  ;;  %v1701_v6 = vcombine.high %v9422_v52, %v9415_v49 }
 0x2b9   :  { %6012 = vrot.lane.b32.xlu0 %v2924_v4, %s7124_s11  ;;  %5950 = vrot.lane.b32.xlu1 %v12186_v34, %s7123_s10  ;;  %v12196_v4 = vld [vmem:[#allocation69_spill] sm:$0xff] }
 0x2ba   :  { %v1920_v34 = vcombine.low %v12196_v4, %v12195_v41  ;;  %v9453_v4 = vpop.permute.xlu0 %5820 }
 0x2bb   :  { %12206 = vst [vmem:[#allocation80_spill] sm:$0xff] %v9453_v4 }
 0x2bc   :  { %v9440_v63 = vrot.slane %v1920_v34, %v7274_v50 }
 0x2bd   :  { %6016 = vrot.lane.b32.xlu0 %v3196_v28, %s7124_s11  ;;  %5954 = vrot.lane.b32.xlu1 %v12192_v38, %s7123_s10  ;;  %v12200_v28 = vld [vmem:[#allocation111_spill] sm:$0xff]  ;;  %v12202_v38 = vld [vmem:[#allocation160_spill] sm:$0xff] }
 0x2be   :  { %v2192_v48 = vcombine.low %v12201_v16, %v12200_v28  ;;  %v2496_v61 = vcombine.low %v12203_v37, %v12202_v38  ;;  %v1972_v30 = vcombine.low %v9440_v63, %v9433_v54  ;;  %v12210_v28 = vld [vmem:[#allocation197_spill] sm:$0xff]  ;;  %v9471_v38 = vpop.permute.xlu1 %5802  ;;  %v9478_v22 = vpop.permute.xlu0 %5824  ;;  %v2381_v37 = vcombine.high %v9332_v35, %v9322_v25 }
 0x2bf   :  { %12211 = vst [vmem:[#allocation81_spill] sm:$0xff] %v9471_v38  ;;  %12212 = vst [vmem:[#allocation122_spill] sm:$0xff] %v9478_v22  ;;  %v2653_v25 = vcombine.high %v9351_v18, %v9339_v9  ;;  %v2925_v9 = vcombine.high %v9368_v2, %v9358_v15  ;;  %v3592_v2 = vrot.slane %v3584_v14, %v7274_v50  ;;  %v12230_v14 = vld [vmem:[#allocation102_spill] sm:$0xff] }
 0x2c0   :  { %v9458_v34 = vrot.slane %v2192_v48, %v7274_v50 }
 0x2c1   :  { %6020 = vrot.lane.b32.xlu0 %v3468_v29, %s7124_s11  ;;  %5958 = vrot.lane.b32.xlu1 %v3603_v62, %s7123_s10  ;;  %v12204_v29 = vld [vmem:[#allocation154_spill] sm:$0xff]  ;;  %v12205_v62 = vld [vmem:[#allocation153_spill] sm:$0xff] }
 0x2c2   :  { %v2464_v41 = vcombine.low %v12205_v62, %v12204_v29  ;;  %v2244_v32 = vcombine.low %v9458_v34, %v9449_v56  ;;  %v12214_v29 = vld [vmem:[#allocation239_spill] sm:$0xff]  ;;  %v9491_v45 = vpop.permute.xlu1 %5806 }
 0x2c3   :  { %12215 = vst [vmem:[#allocation123_spill] sm:$0xff] %v9491_v45 }
 0x2c4   :  { %v2472_v48 = vrot.slane %v2464_v41, %v7274_v50 }
 0x2c5   :  { %6056 = vrot.lane.b32.xlu0 %v1565_v20, %s7125_s12  ;;  %5994 = vrot.lane.b32.xlu1 %v1700_v31, %s7124_s11  ;;  %v9467_v20 = vrot.slane %v2496_v61, %v7274_v50  ;;  %v12209_v31 = vld [vmem:[#allocation198_spill] sm:$0xff] }
 0x2c6   :  { %v2736_v16 = vcombine.low %v12210_v28, %v12209_v31 }
 0x2c7   :  { %v2516_v61 = vcombine.low %v2472_v48, %v9467_v20 }
 0x2c8   :  { %v2744_v41 = vrot.slane %v2736_v16, %v7274_v50  ;;  %v3469_v16 = vcombine.high %v9406_v36, %v9394_v44  ;;  %v1973_v36 = vcombine.high %v9440_v63, %v9433_v54 }
 0x2c9   :  { %6060 = vrot.lane.b32.xlu0 %v1837_v26, %s7125_s12  ;;  %5998 = vrot.lane.b32.xlu1 %v1972_v30, %s7124_s11  ;;  %v2776_v26 = vrot.slane %v2768_v27, %v7274_v50  ;;  %v12213_v30 = vld [vmem:[#allocation240_spill] sm:$0xff]  ;;  %v3280_v27 = vcombine.low %v8871_v13, %v8875_v0  ;;  %v3552_v13 = vcombine.low %v9082_v58, %v9085_v1  ;;  %v9512_v0 = vpop.permute.xlu1 %5810 }
 0x2ca   :  { %v3008_v62 = vcombine.low %v12214_v29, %v12213_v30  ;;  %12216 = vst [vmem:[#allocation165_spill] sm:$0xff] %v9512_v0  ;;  %v12221_v30 = vld [vmem:[#allocation18_spill] sm:$0xff] }
 0x2cb   :  { %v2788_v35 = vcombine.low %v2744_v41, %v2776_v26  ;;  %v3288_v31 = vrot.slane %v3280_v27, %v7274_v50  ;;  %v3560_v58 = vrot.slane %v3552_v13, %v7274_v50  ;;  %v12229_v27 = vld [vmem:[#allocation103_spill] sm:$0xff]  ;;  %v12234_v13 = vld [vmem:[#allocation146_spill] sm:$0xff] }
 0x2cd   :  { %6064 = vrot.lane.b32.xlu0 %v2109_v60, %s7125_s12  ;;  %6002 = vrot.lane.b32.xlu1 %v2244_v32, %s7124_s11  ;;  %v3016_v60 = vrot.slane %v3008_v62, %v7274_v50  ;;  %v3320_v32 = vrot.slane %v3312_v55, %v7274_v50  ;;  %v9525_v1 = vpop.permute.xlu1 %5814  ;;  %v3604_v47 = vcombine.low %v3560_v58, %v3592_v2  ;;  %v12224_v62 = vld [vmem:[#allocation61_spill] sm:$0xff]  ;;  %v12225_v55 = vld [vmem:[#allocation60_spill] sm:$0xff] }
 0x2ce   :  { %12217 = vst [vmem:[#allocation166_spill] sm:$0xff] %v9525_v1 }
 0x2cf   :  { %v3060_v18 = vcombine.low %v3016_v60, %v3048_v24  ;;  %v3332_v15 = vcombine.low %v3288_v31, %v3320_v32 }
 0x2d1   :  { %6068 = vrot.lane.b32.xlu0 %v2381_v37, %s7125_s12  ;;  %6006 = vrot.lane.b32.xlu1 %v2516_v61, %s7124_s11  ;;  %v9537_v37 = vpop.permute.xlu1 %5818  ;;  %v12220_v61 = vld [vmem:[#allocation19_spill] sm:$0xff] }
 0x2d2   :  { %12219 = vst [vmem:[#allocation211_spill] sm:$0xff] %v9537_v37  ;;  %v12222_v29 = vcombine.low %v12220_v61, %v12221_v30 }
 0x2d3   :  { %v9493_v39 = vpop.permute.xlu0 %5828 }
 0x2d5   :  { %6072 = vrot.lane.b32.xlu0 %v2653_v25, %s7125_s12  ;;  %6010 = vrot.lane.b32.xlu1 %v2788_v35, %s7124_s11  ;;  %v12226_v25 = vcombine.low %v12224_v62, %v12225_v55  ;;  %v9553_v49 = vpop.permute.xlu1 %5822  ;;  %v2245_v35 = vcombine.high %v9458_v34, %v9449_v56 }
 0x2d6   :  { %12227 = vst [vmem:[#allocation13_spill] sm:$0xff] %v9553_v49  ;;  %v12260_v49 = vld [vmem:[#allocation82_spill] sm:$0xff] }
 0x2d7   :  { %v9505_v8 = vpop.permute.xlu0 %5864 }
 0x2d9   :  { %6076 = vrot.lane.b32.xlu0 %v2925_v9, %s7125_s12  ;;  %6014 = vrot.lane.b32.xlu1 %v3060_v18, %s7124_s11  ;;  %v12231_v9 = vcombine.low %v12229_v27, %v12230_v14  ;;  %v9564_v54 = vpop.permute.xlu1 %5826  ;;  %v2517_v18 = vcombine.high %v2472_v48, %v9467_v20 }
 0x2da   :  { %12232 = vst [vmem:[#allocation7_spill] sm:$0xff] %v9564_v54  ;;  %v12254_v54 = vld [vmem:[#allocation40_spill] sm:$0xff] }
 0x2db   :  { %v9517_v53 = vpop.permute.xlu0 %5868 }
 0x2dd   :  { %6080 = vrot.lane.b32.xlu0 %v3197_v23, %s7125_s12  ;;  %6018 = vrot.lane.b32.xlu1 %v3332_v15, %s7124_s11  ;;  %v12235_v23 = vld [vmem:[#allocation145_spill] sm:$0xff] }
 0x2de   :  { %v12236_v15 = vcombine.low %v12234_v13, %v12235_v23 }
 0x2df   :  { %v9527_v28 = vpop.permute.xlu0 %5872 }
 0x2e1   :  { %6084 = vrot.lane.b32.xlu0 %v3469_v16, %s7125_s12  ;;  %6022 = vrot.lane.b32.xlu1 %v3604_v47, %s7124_s11  ;;  %v2789_v16 = vcombine.high %v2744_v41, %v2776_v26  ;;  %v12238_v47 = vld [vmem:[#allocation192_spill] sm:$0xff] }
 0x2e3   :  { %v9533_v10 = vpop.permute.xlu0 %5876 }
 0x2e4   :  { %12218 = vst [vmem:[#allocation207_spill] sm:$0xff] %v9533_v10 }
 0x2e5   :  { %6120 = vrot.lane.b32.xlu0 %v12222_v29, %s7126_s13  ;;  %6058 = vrot.lane.b32.xlu1 %v1701_v6, %s7125_s12  ;;  %v12239_v6 = vld [vmem:[#allocation190_spill] sm:$0xff] }
 0x2e6   :  { %v12240_v29 = vcombine.low %v12238_v47, %v12239_v6 }
 0x2e7   :  { %v9544_v44 = vpop.permute.xlu0 %5880 }
 0x2e8   :  { %12223 = vst [vmem:[#allocation12_spill] sm:$0xff] %v9544_v44 }
 0x2e9   :  { %6124 = vrot.lane.b32.xlu0 %v12226_v25, %s7126_s13  ;;  %6062 = vrot.lane.b32.xlu1 %v1973_v36, %s7125_s12  ;;  %v3061_v36 = vcombine.high %v3016_v60, %v3048_v24  ;;  %v12242_v25 = vld [vmem:[#allocation234_spill] sm:$0xff] }
 0x2eb   :  { %v9555_v52 = vpop.permute.xlu0 %5884 }
 0x2ec   :  { %12228 = vst [vmem:[#allocation6_spill] sm:$0xff] %v9555_v52 }
 0x2ed   :  { %6128 = vrot.lane.b32.xlu0 %v12231_v9, %s7126_s13  ;;  %6066 = vrot.lane.b32.xlu1 %v2245_v35, %s7125_s12  ;;  %v12243_v35 = vld [vmem:[#allocation232_spill] sm:$0xff] }
 0x2ee   :  { %v12244_v9 = vcombine.low %v12242_v25, %v12243_v35  ;;  %v12284_v45 = vcombine.high %v12242_v25, %v12243_v35  ;;  %v12293_v25 = vcombine.high %v8834_v43, %v8828_v33  ;;  %v12295_v35 = vld [vmem:[#allocation44_spill] sm:$0xff] }
 0x2ef   :  { %v9566_v63 = vpop.permute.xlu0 %5888 }
 0x2f0   :  { %12233 = vst [vmem:[#allocation54_spill] sm:$0xff] %v9566_v63 }
 0x2f1   :  { %6132 = vrot.lane.b32.xlu0 %v12236_v15, %s7126_s13  ;;  %6070 = vrot.lane.b32.xlu1 %v2517_v18, %s7125_s12  ;;  %v3333_v18 = vcombine.high %v3288_v31, %v3320_v32  ;;  %v12246_v15 = vcombine.low %v8834_v43, %v8828_v33 }
 0x2f3   :  { %v9574_v56 = vpop.permute.xlu1 %5830  ;;  %v9576_v34 = vpop.permute.xlu0 %5892 }
 0x2f4   :  { %12237 = vst [vmem:[#allocation55_spill] sm:$0xff] %v9574_v56  ;;  %v12292_v56 = vcombine.low %v12290_v21, %v12291_v17 }
 0x2f5   :  { %6136 = vrot.lane.b32.xlu0 %v12240_v29, %s7126_s13  ;;  %6074 = vrot.lane.b32.xlu1 %v2789_v16, %s7125_s12  ;;  %v3605_v16 = vcombine.high %v3560_v58, %v3592_v2  ;;  %v12248_v29 = vld [vmem:[#allocation298_spill] sm:$0xff]  ;;  %v12256_v2 = vcombine.high %v12220_v61, %v12221_v30  ;;  %v12265_v61 = vld [vmem:[#allocation125_spill] sm:$0xff]  ;;  %v12266_v30 = vld [vmem:[#allocation124_spill] sm:$0xff] }
 0x2f7   :  { %v9583_v20 = vpop.permute.xlu1 %5866  ;;  %v9585_v48 = vpop.permute.xlu0 %5928 }
 0x2f8   :  { %12241 = vst [vmem:[#allocation48_spill] sm:$0xff] %v9583_v20  ;;  %v12286_v20 = vld [vmem:[#allocation8_spill] sm:$0xff] }
 0x2f9   :  { %6140 = vrot.lane.b32.xlu0 %v12244_v9, %s7126_s13  ;;  %6078 = vrot.lane.b32.xlu1 %v3061_v36, %s7125_s12  ;;  %v12249_v36 = vld [vmem:[#allocation296_spill] sm:$0xff] }
 0x2fa   :  { %v12250_v9 = vcombine.low %v12248_v29, %v12249_v36  ;;  %v12300_v33 = vcombine.high %v12248_v29, %v12249_v36 }
 0x2fb   :  { %v9592_v26 = vpop.permute.xlu1 %5870  ;;  %v9594_v41 = vpop.permute.xlu0 %5932 }
 0x2fc   :  { %12245 = vst [vmem:[#allocation49_spill] sm:$0xff] %v9592_v26 }
 0x2fd   :  { %6144 = vrot.lane.b32.xlu0 %v12246_v15, %s7126_s13  ;;  %6082 = vrot.lane.b32.xlu1 %v3333_v18, %s7125_s12  ;;  %v12253_v15 = vld [vmem:[#allocation41_spill] sm:$0xff] }
 0x2fe   :  { %v12255_v18 = vcombine.low %v12253_v15, %v12254_v54  ;;  %v12307_v36 = vcombine.high %v12253_v15, %v12254_v54 }
 0x2ff   :  { %v9601_v24 = vpop.permute.xlu1 %5874  ;;  %v9603_v60 = vpop.permute.xlu0 %5936 }
 0x300   :  { %12247 = vst [vmem:[#allocation97_spill] sm:$0xff] %v9601_v24 }
 0x301   :  { %6148 = vrot.lane.b32.xlu0 %v12250_v9, %s7126_s13  ;;  %6086 = vrot.lane.b32.xlu1 %v3605_v16, %s7125_s12  ;;  %v12259_v16 = vld [vmem:[#allocation83_spill] sm:$0xff] }
 0x302   :  { %v12261_v37 = vcombine.low %v12259_v16, %v12260_v49  ;;  %v12314_v15 = vcombine.high %v12259_v16, %v12260_v49  ;;  %v12321_v16 = vcombine.high %v12265_v61, %v12266_v30 }
 0x303   :  { %v9610_v32 = vpop.permute.xlu1 %5878  ;;  %v9612_v31 = vpop.permute.xlu0 %5940 }
 0x304   :  { %12251 = vst [vmem:[#allocation96_spill] sm:$0xff] %v9610_v32  ;;  %12252 = vst [vmem:[#allocation91_spill] sm:$0xff] %v9612_v31  ;;  %v12262_v32 = vcombine.high %v12224_v62, %v12225_v55  ;;  %v12271_v62 = vld [vmem:[#allocation168_spill] sm:$0xff]  ;;  %v12272_v55 = vld [vmem:[#allocation167_spill] sm:$0xff] }
 0x305   :  { %6122 = vrot.lane.b32.xlu1 %v12255_v18, %s7126_s13  ;;  %6184 = vrot.lane.b32.xlu0 %v12256_v2, %s7127_s14  ;;  %v12267_v2 = vcombine.low %v12265_v61, %v12266_v30  ;;  %v12328_v30 = vcombine.high %v12271_v62, %v12272_v55  ;;  %v12467_v31 = vld [vmem:[#allocation277_spill] sm:$0xff] }
 0x307   :  { %v9622_v58 = vpop.permute.xlu1 %5882  ;;  %v9624_v9 = vpop.permute.xlu0 %5944 }
 0x308   :  { %12257 = vst [vmem:[#allocation90_spill] sm:$0xff] %v9622_v58  ;;  %12258 = vst [vmem:[#allocation139_spill] sm:$0xff] %v9624_v9  ;;  %v12268_v58 = vcombine.high %v12229_v27, %v12230_v14  ;;  %v12276_v27 = vld [vmem:[#allocation214_spill] sm:$0xff]  ;;  %v12277_v14 = vld [vmem:[#allocation212_spill] sm:$0xff] }
 0x309   :  { %6126 = vrot.lane.b32.xlu1 %v12261_v37, %s7126_s13  ;;  %6188 = vrot.lane.b32.xlu0 %v12262_v32, %s7127_s14  ;;  %v12273_v32 = vcombine.low %v12271_v62, %v12272_v55  ;;  %v12334_v55 = vcombine.high %v12276_v27, %v12277_v14 }
 0x30b   :  { %v9634_v18 = vpop.permute.xlu1 %5886  ;;  %v9636_v1 = vpop.permute.xlu0 %5948 }
 0x30c   :  { %12263 = vst [vmem:[#allocation138_spill] sm:$0xff] %v9634_v18  ;;  %12264 = vst [vmem:[#allocation133_spill] sm:$0xff] %v9636_v1  ;;  %v12274_v18 = vcombine.high %v12234_v13, %v12235_v23  ;;  %v12281_v13 = vld [vmem:[#allocation250_spill] sm:$0xff]  ;;  %v12282_v23 = vld [vmem:[#allocation249_spill] sm:$0xff] }
 0x30d   :  { %6130 = vrot.lane.b32.xlu1 %v12267_v2, %s7126_s13  ;;  %6192 = vrot.lane.b32.xlu0 %v12268_v58, %s7127_s14  ;;  %v12278_v58 = vcombine.low %v12276_v27, %v12277_v14  ;;  %v12340_v14 = vcombine.high %v12281_v13, %v12282_v23 }
 0x30f   :  { %v9646_v37 = vpop.permute.xlu1 %5890  ;;  %v9648_v24 = vpop.permute.xlu0 %5952 }
 0x310   :  { %12269 = vst [vmem:[#allocation132_spill] sm:$0xff] %v9646_v37  ;;  %12270 = vst [vmem:[#allocation182_spill] sm:$0xff] %v9648_v24  ;;  %v12279_v37 = vcombine.high %v12238_v47, %v12239_v6  ;;  %v12288_v6 = vld [vmem:[#allocation4_spill] sm:$0xff] }
 0x311   :  { %6134 = vrot.lane.b32.xlu1 %v12273_v32, %s7126_s13  ;;  %6196 = vrot.lane.b32.xlu0 %v12274_v18, %s7127_s14  ;;  %v12283_v18 = vcombine.low %v12281_v13, %v12282_v23  ;;  %v12346_v23 = vcombine.high %v12290_v21, %v12291_v17  ;;  %v12353_v21 = vcombine.high %v9173_v19, %v9170_v57 }
 0x313   :  { %v9658_v2 = vpop.permute.xlu1 %5894  ;;  %v9660_v0 = vpop.permute.xlu0 %5956 }
 0x314   :  { %12275 = vst [vmem:[#allocation181_spill] sm:$0xff] %v9658_v2 }
 0x315   :  { %6138 = vrot.lane.b32.xlu1 %v12278_v58, %s7126_s13  ;;  %6200 = vrot.lane.b32.xlu0 %v12279_v37, %s7127_s14  ;;  %v12285_v58 = vld [vmem:[#allocation10_spill] sm:$0xff] }
 0x316   :  { %v3704_v38 = vcombine.low %v12286_v20, %v12285_v58  ;;  %v12289_v37 = vld [vmem:[#allocation2_spill] sm:$0xff] }
 0x317   :  { %v9670_v32 = vpop.permute.xlu1 %5930  ;;  %v9672_v26 = vpop.permute.xlu0 %5992  ;;  %v12297_v58 = vld [vmem:[#allocation50_spill] sm:$0xff] }
 0x318   :  { %12280 = vst [vmem:[#allocation176_spill] sm:$0xff] %v9670_v32  ;;  %v3672_v32 = vcombine.low %v12289_v37, %v12288_v6  ;;  %v9707_v6 = vrot.slane %v3704_v38, %v7274_v50  ;;  %v12301_v37 = vld [vmem:[#allocation88_spill] sm:$0xff] }
 0x319   :  { %6142 = vrot.lane.b32.xlu1 %v12283_v18, %s7126_s13  ;;  %6204 = vrot.lane.b32.xlu0 %v12284_v45, %s7127_s14  ;;  %v12294_v45 = vld [vmem:[#allocation46_spill] sm:$0xff]  ;;  %v12296_v18 = vld [vmem:[#allocation52_spill] sm:$0xff] }
 0x31a   :  { %v3944_v20 = vcombine.low %v12295_v35, %v12294_v45  ;;  %v9718_v43 = vrot.slane %v3672_v32, %v7274_v50  ;;  %v12303_v35 = vld [vmem:[#allocation94_spill] sm:$0xff] }
 0x31b   :  { %v9684_v2 = vpop.permute.xlu1 %5934  ;;  %v9686_v47 = vpop.permute.xlu0 %5996 }
 0x31c   :  { %12287 = vst [vmem:[#allocation175_spill] sm:$0xff] %v9684_v2  ;;  %v3976_v2 = vcombine.low %v12297_v58, %v12296_v18  ;;  %v12304_v18 = vld [vmem:[#allocation92_spill] sm:$0xff]  ;;  %v9731_v22 = vrot.slane %v3944_v20, %v7274_v50  ;;  %v3737_v44 = vcombine.high %v9718_v43, %v9707_v6 }
 0x31d   :  { %6146 = vrot.lane.b32.xlu1 %v12292_v56, %s7126_s13  ;;  %6208 = vrot.lane.b32.xlu0 %v12293_v25, %s7127_s14  ;;  %v12299_v56 = vcombine.low %v9173_v19, %v9170_v57  ;;  %v12302_v25 = vld [vmem:[#allocation86_spill] sm:$0xff]  ;;  %v4248_v38 = vcombine.low %v12304_v18, %v12303_v35  ;;  %v12309_v20 = vld [vmem:[#allocation128_spill] sm:$0xff] }
 0x31e   :  { %v4216_v45 = vcombine.low %v12302_v25, %v12301_v37  ;;  %v9734_v29 = vrot.slane %v3976_v2, %v7274_v50  ;;  %v12308_v37 = vld [vmem:[#allocation130_spill] sm:$0xff]  ;;  %v12310_v35 = vld [vmem:[#allocation136_spill] sm:$0xff] }
 0x31f   :  { %v9702_v24 = vpop.permute.xlu1 %5938  ;;  %v9704_v63 = vpop.permute.xlu0 %6000  ;;  %v4488_v25 = vcombine.low %v12309_v20, %v12308_v37  ;;  %v12311_v2 = vld [vmem:[#allocation134_spill] sm:$0xff]  ;;  %v12317_v37 = vld [vmem:[#allocation179_spill] sm:$0xff]  ;;  %v12318_v20 = vld [vmem:[#allocation177_spill] sm:$0xff] }
 0x320   :  { %12298 = vst [vmem:[#allocation226_spill] sm:$0xff] %v9702_v24  ;;  %v9742_v32 = vrot.slane %v4216_v45, %v7274_v50  ;;  %v4520_v18 = vcombine.low %v12311_v2, %v12310_v35  ;;  %v4008_v54 = vcombine.low %v9731_v22, %v9734_v29  ;;  %v4792_v35 = vcombine.low %v12318_v20, %v12317_v37  ;;  %v12325_v37 = vld [vmem:[#allocation221_spill] sm:$0xff] }
 0x321   :  { %6150 = vrot.lane.b32.xlu1 %v12299_v56, %s7126_s13  ;;  %6212 = vrot.lane.b32.xlu0 %v12300_v33, %s7127_s14  ;;  %v3736_v56 = vcombine.low %v9718_v43, %v9707_v6  ;;  %v9745_v33 = vrot.slane %v4248_v38, %v7274_v50  ;;  %v12315_v38 = vld [vmem:[#allocation173_spill] sm:$0xff]  ;;  %v9773_v52 = vrot.slane %v4488_v25, %v7274_v50 }
 0x322   :  { %v9776_v49 = vrot.slane %v4520_v18, %v7274_v50  ;;  %v9797_v61 = vrot.slane %v4792_v35, %v7274_v50  ;;  %v12362_v43 = vld [vmem:[#allocation157_spill] sm:$0xff] }
 0x323   :  { %v9724_v58 = vpop.permute.xlu1 %5942  ;;  %v9726_v24 = vpop.permute.xlu0 %6004  ;;  %v4280_v45 = vcombine.low %v9742_v32, %v9745_v33 }
 0x324   :  { %12305 = vst [vmem:[#allocation225_spill] sm:$0xff] %v9724_v58  ;;  %12306 = vst [vmem:[#allocation220_spill] sm:$0xff] %v9726_v24  ;;  %v4552_v18 = vcombine.low %v9773_v52, %v9776_v49 }
 0x325   :  { %6186 = vrot.lane.b32.xlu1 %v12307_v36, %s7127_s14  ;;  %6248 = vrot.lane.b32.xlu0 %v3736_v56, %s7128_s15  ;;  %v12316_v56 = vld [vmem:[#allocation171_spill] sm:$0xff] }
 0x326   :  { %v4760_v36 = vcombine.low %v12316_v56, %v12315_v38  ;;  %v12324_v56 = vld [vmem:[#allocation223_spill] sm:$0xff] }
 0x327   :  { %v9751_v58 = vpop.permute.xlu1 %5946  ;;  %v9753_v1 = vpop.permute.xlu0 %6008  ;;  %v5064_v20 = vcombine.low %v12325_v37, %v12324_v56  ;;  %v12331_v56 = vld [vmem:[#allocation259_spill] sm:$0xff]  ;;  %v12332_v37 = vld [vmem:[#allocation257_spill] sm:$0xff] }
 0x328   :  { %12312 = vst [vmem:[#allocation219_spill] sm:$0xff] %v9751_v58  ;;  %12313 = vst [vmem:[#allocation32_spill] sm:$0xff] %v9753_v1  ;;  %v5336_v35 = vcombine.low %v12332_v37, %v12331_v56 }
 0x329   :  { %6190 = vrot.lane.b32.xlu1 %v12314_v15, %s7127_s14  ;;  %6252 = vrot.lane.b32.xlu0 %v4008_v54, %s7128_s15  ;;  %v12322_v54 = vld [vmem:[#allocation217_spill] sm:$0xff]  ;;  %v12323_v15 = vld [vmem:[#allocation215_spill] sm:$0xff] }
 0x32a   :  { %v5032_v38 = vcombine.low %v12323_v15, %v12322_v54  ;;  %v12329_v54 = vld [vmem:[#allocation255_spill] sm:$0xff]  ;;  %v12330_v15 = vld [vmem:[#allocation253_spill] sm:$0xff]  ;;  %v9839_v27 = vrot.slane %v5336_v35, %v7274_v50 }
 0x32b   :  { %v9768_v2 = vpop.permute.xlu1 %5950  ;;  %v9770_v58 = vpop.permute.xlu0 %6012 }
 0x32c   :  { %12319 = vst [vmem:[#allocation33_spill] sm:$0xff] %v9768_v2  ;;  %12320 = vst [vmem:[#allocation26_spill] sm:$0xff] %v9770_v58  ;;  %v9794_v58 = vrot.slane %v4760_v36, %v7274_v50  ;;  %v5304_v36 = vcombine.low %v12330_v15, %v12329_v54  ;;  %v12337_v54 = vld [vmem:[#allocation289_spill] sm:$0xff]  ;;  %v12338_v15 = vld [vmem:[#allocation287_spill] sm:$0xff] }
 0x32d   :  { %6194 = vrot.lane.b32.xlu1 %v12321_v16, %s7127_s14  ;;  %6256 = vrot.lane.b32.xlu0 %v4280_v45, %s7128_s15  ;;  %v9805_v45 = vrot.slane %v5032_v38, %v7274_v50  ;;  %v9808_v16 = vrot.slane %v5064_v20, %v7274_v50  ;;  %v12335_v20 = vld [vmem:[#allocation285_spill] sm:$0xff]  ;;  %v5608_v56 = vcombine.low %v12338_v15, %v12337_v54  ;;  %v12344_v54 = vld [vmem:[#allocation28_spill] sm:$0xff] }
 0x32e   :  { %v4824_v62 = vcombine.low %v9794_v58, %v9797_v61  ;;  %v9836_v4 = vrot.slane %v5304_v36, %v7274_v50 }
 0x32f   :  { %v9787_v2 = vpop.permute.xlu1 %5954  ;;  %v9789_v25 = vpop.permute.xlu0 %6016  ;;  %v5096_v38 = vcombine.low %v9805_v45, %v9808_v16  ;;  %v9860_v13 = vrot.slane %v5608_v56, %v7274_v50 }
 0x330   :  { %12326 = vst [vmem:[#allocation27_spill] sm:$0xff] %v9787_v2  ;;  %12327 = vst [vmem:[#allocation74_spill] sm:$0xff] %v9789_v25  ;;  %v5368_v35 = vcombine.low %v9836_v4, %v9839_v27 }
 0x331   :  { %6198 = vrot.lane.b32.xlu1 %v12328_v30, %s7127_s14  ;;  %6260 = vrot.lane.b32.xlu0 %v4552_v18, %s7128_s15  ;;  %v12336_v18 = vld [vmem:[#allocation283_spill] sm:$0xff] }
 0x332   :  { %v5576_v30 = vcombine.low %v12336_v18, %v12335_v20  ;;  %v12343_v18 = vld [vmem:[#allocation30_spill] sm:$0xff] }
 0x333   :  { %v9814_v2 = vpop.permute.xlu1 %5958  ;;  %v9816_v25 = vpop.permute.xlu0 %6020  ;;  %v3840_v15 = vcombine.low %v12344_v54, %v12343_v18  ;;  %v12349_v18 = vld [vmem:[#allocation72_spill] sm:$0xff]  ;;  %v12350_v54 = vld [vmem:[#allocation70_spill] sm:$0xff] }
 0x334   :  { %12333 = vst [vmem:[#allocation75_spill] sm:$0xff] %v9814_v2  ;;  %v9857_v1 = vrot.slane %v5576_v30, %v7274_v50  ;;  %v4112_v30 = vcombine.low %v12350_v54, %v12349_v18 }
 0x335   :  { %6202 = vrot.lane.b32.xlu1 %v12334_v55, %s7127_s14  ;;  %6264 = vrot.lane.b32.xlu0 %v4824_v62, %s7128_s15  ;;  %v12341_v62 = vld [vmem:[#allocation24_spill] sm:$0xff]  ;;  %v12342_v55 = vld [vmem:[#allocation22_spill] sm:$0xff]  ;;  %v9881_v17 = vrot.slane %v3840_v15, %v7274_v50 }
 0x336   :  { %v3808_v20 = vcombine.low %v12342_v55, %v12341_v62  ;;  %v12348_v62 = vld [vmem:[#allocation64_spill] sm:$0xff]  ;;  %v5640_v9 = vcombine.low %v9857_v1, %v9860_v13  ;;  %v9904_v19 = vrot.slane %v4112_v30, %v7274_v50 }
 0x337   :  { %v9831_v37 = vpop.permute.xlu1 %5994  ;;  %v9833_v2 = vpop.permute.xlu0 %6056 }
 0x338   :  { %12339 = vst [vmem:[#allocation68_spill] sm:$0xff] %v9831_v37 }
 0x339   :  { %6206 = vrot.lane.b32.xlu1 %v12340_v14, %s7127_s14  ;;  %6268 = vrot.lane.b32.xlu0 %v5096_v38, %s7128_s15  ;;  %v9868_v38 = vrot.slane %v3808_v20, %v7274_v50  ;;  %v12347_v14 = vld [vmem:[#allocation66_spill] sm:$0xff]  ;;  %v12354_v20 = vld [vmem:[#allocation108_spill] sm:$0xff] }
 0x33a   :  { %v4080_v55 = vcombine.low %v12348_v62, %v12347_v14  ;;  %v12356_v14 = vld [vmem:[#allocation114_spill] sm:$0xff]  ;;  %v12357_v62 = vld [vmem:[#allocation112_spill] sm:$0xff] }
 0x33b   :  { %v9850_v37 = vpop.permute.xlu1 %5998  ;;  %v9852_v36 = vpop.permute.xlu0 %6060  ;;  %v4384_v18 = vcombine.low %v12357_v62, %v12356_v14  ;;  %v3872_v15 = vcombine.low %v9868_v38, %v9881_v17 }
 0x33c   :  { %12345 = vst [vmem:[#allocation69_spill] sm:$0xff] %v9850_v37  ;;  %v9901_v57 = vrot.slane %v4080_v55, %v7274_v50  ;;  %v12363_v55 = vld [vmem:[#allocation155_spill] sm:$0xff] }
 0x33d   :  { %6210 = vrot.lane.b32.xlu1 %v12346_v23, %s7127_s14  ;;  %6272 = vrot.lane.b32.xlu0 %v5368_v35, %s7128_s15  ;;  %v12355_v35 = vld [vmem:[#allocation106_spill] sm:$0xff]  ;;  %v4656_v14 = vcombine.low %v12363_v55, %v12362_v43  ;;  %v12368_v55 = vld [vmem:[#allocation201_spill] sm:$0xff] }
 0x33e   :  { %v4352_v23 = vcombine.low %v12355_v35, %v12354_v20  ;;  %v12360_v20 = vld [vmem:[#allocation151_spill] sm:$0xff]  ;;  %v12361_v35 = vld [vmem:[#allocation149_spill] sm:$0xff] }
 0x33f   :  { %v9874_v37 = vpop.permute.xlu1 %6002  ;;  %v9876_v56 = vpop.permute.xlu0 %6064  ;;  %v4624_v6 = vcombine.low %v12361_v35, %v12360_v20  ;;  %v12366_v20 = vld [vmem:[#allocation195_spill] sm:$0xff]  ;;  %v12367_v35 = vld [vmem:[#allocation193_spill] sm:$0xff] }
 0x340   :  { %12351 = vst [vmem:[#allocation117_spill] sm:$0xff] %v9874_v37  ;;  %12352 = vst [vmem:[#allocation116_spill] sm:$0xff] %v9876_v56  ;;  %v4896_v43 = vcombine.low %v12367_v35, %v12366_v20  ;;  %v12375_v20 = vld [vmem:[#allocation241_spill] sm:$0xff] }
 0x341   :  { %6214 = vrot.lane.b32.xlu1 %v12353_v21, %s7127_s14  ;;  %6276 = vrot.lane.b32.xlu0 %v5640_v9, %s7128_s15  ;;  %v9909_v9 = vrot.slane %v4352_v23, %v7274_v50  ;;  %v9912_v21 = vrot.slane %v4384_v18, %v7274_v50  ;;  %v4281_v18 = vcombine.high %v9742_v32, %v9745_v33  ;;  %v12372_v32 = vld [vmem:[#allocation237_spill] sm:$0xff]  ;;  %v12373_v33 = vld [vmem:[#allocation235_spill] sm:$0xff] }
 0x343   :  { %v9892_v54 = vpop.permute.xlu1 %6006  ;;  %v9894_v37 = vpop.permute.xlu0 %6068  ;;  %v4416_v23 = vcombine.low %v9909_v9, %v9912_v21 }
 0x344   :  { %12358 = vst [vmem:[#allocation111_spill] sm:$0xff] %v9892_v54  ;;  %12359 = vst [vmem:[#allocation110_spill] sm:$0xff] %v9894_v37 }
 0x345   :  { %6250 = vrot.lane.b32.xlu1 %v3872_v15, %s7128_s15  ;;  %6312 = vrot.lane.b32.xlu0 %v3737_v44, %s7129_s16  ;;  %v4144_v15 = vcombine.low %v9901_v57, %v9904_v19  ;;  %v4009_v44 = vcombine.high %v9731_v22, %v9734_v29  ;;  %v9941_v22 = vrot.slane %v4624_v6, %v7274_v50 }
 0x346   :  { %v9944_v29 = vrot.slane %v4656_v14, %v7274_v50  ;;  %v4553_v14 = vcombine.high %v9773_v52, %v9776_v49 }
 0x347   :  { %v9918_v62 = vpop.permute.xlu1 %6010  ;;  %v9920_v30 = vpop.permute.xlu0 %6072 }
 0x348   :  { %12364 = vst [vmem:[#allocation160_spill] sm:$0xff] %v9918_v62  ;;  %12365 = vst [vmem:[#allocation159_spill] sm:$0xff] %v9920_v30  ;;  %v12369_v62 = vld [vmem:[#allocation199_spill] sm:$0xff]  ;;  %v4688_v6 = vcombine.low %v9941_v22, %v9944_v29 }
 0x349   :  { %6254 = vrot.lane.b32.xlu1 %v4144_v15, %s7128_s15  ;;  %6316 = vrot.lane.b32.xlu0 %v4009_v44, %s7129_s16  ;;  %v4928_v54 = vcombine.low %v12369_v62, %v12368_v55  ;;  %v5168_v15 = vcombine.low %v12373_v33, %v12372_v32  ;;  %v12374_v44 = vld [vmem:[#allocation243_spill] sm:$0xff] }
 0x34a   :  { %v5200_v62 = vcombine.low %v12375_v20, %v12374_v44  ;;  %v12378_v44 = vld [vmem:[#allocation269_spill] sm:$0xff]  ;;  %v12379_v20 = vld [vmem:[#allocation267_spill] sm:$0xff] }
 0x34b   :  { %v9936_v30 = vpop.permute.xlu1 %6014  ;;  %v9938_v37 = vpop.permute.xlu0 %6076  ;;  %v9965_v32 = vrot.slane %v5168_v15, %v7274_v50 }
 0x34c   :  { %12370 = vst [vmem:[#allocation154_spill] sm:$0xff] %v9936_v30  ;;  %12371 = vst [vmem:[#allocation153_spill] sm:$0xff] %v9938_v37  ;;  %v5208_v33 = vrot.slane %v5200_v62, %v7274_v50  ;;  %v12380_v30 = vld [vmem:[#allocation273_spill] sm:$0xff]  ;;  %v5097_v62 = vcombine.high %v9805_v45, %v9808_v16 }
 0x34d   :  { %6258 = vrot.lane.b32.xlu1 %v4416_v23, %s7128_s15  ;;  %6320 = vrot.lane.b32.xlu0 %v4281_v18, %s7129_s16  ;;  %v4904_v23 = vrot.slane %v4896_v43, %v7274_v50  ;;  %v4936_v18 = vrot.slane %v4928_v54, %v7274_v50  ;;  %v4825_v43 = vcombine.high %v9794_v58, %v9797_v61 }
 0x34e   :  { %v5232_v15 = vcombine.low %v9965_v32, %v5208_v33 }
 0x34f   :  { %v9952_v35 = vpop.permute.xlu1 %6018  ;;  %v9954_v55 = vpop.permute.xlu0 %6080  ;;  %v4960_v54 = vcombine.low %v4904_v23, %v4936_v18 }
 0x350   :  { %12376 = vst [vmem:[#allocation204_spill] sm:$0xff] %v9952_v35  ;;  %12377 = vst [vmem:[#allocation203_spill] sm:$0xff] %v9954_v55  ;;  %v5440_v35 = vcombine.low %v12379_v20, %v12378_v44  ;;  %v12381_v55 = vld [vmem:[#allocation271_spill] sm:$0xff] }
 0x351   :  { %6262 = vrot.lane.b32.xlu1 %v4688_v6, %s7128_s15  ;;  %6324 = vrot.lane.b32.xlu0 %v4553_v14, %s7129_s16  ;;  %v5472_v37 = vcombine.low %v12381_v55, %v12380_v30  ;;  %v12383_v6 = vld [vmem:[#allocation301_spill] sm:$0xff]  ;;  %v12384_v14 = vld [vmem:[#allocation299_spill] sm:$0xff]  ;;  %v5744_v55 = vcombine.low %v9116_v42, %v9128_v3  ;;  %v5369_v42 = vcombine.high %v9836_v4, %v9839_v27 }
 0x352   :  { %v5712_v30 = vcombine.low %v12384_v14, %v12383_v6  ;;  %v5448_v58 = vrot.slane %v5440_v35, %v7274_v50  ;;  %v3873_v6 = vcombine.high %v9868_v38, %v9881_v17  ;;  %v12391_v14 = vld [vmem:[#allocation15_spill] sm:$0xff]  ;;  %v12397_v38 = vld [vmem:[#allocation58_spill] sm:$0xff] }
 0x353   :  { %v9972_v52 = vpop.permute.xlu1 %6022  ;;  %v9974_v49 = vpop.permute.xlu0 %6084  ;;  %v5480_v61 = vrot.slane %v5472_v37, %v7274_v50 }
 0x354   :  { %12382 = vst [vmem:[#allocation198_spill] sm:$0xff] %v9972_v52  ;;  %v5720_v3 = vrot.slane %v5712_v30, %v7274_v50  ;;  %v12392_v30 = vld [vmem:[#allocation16_spill] sm:$0xff] }
 0x355   :  { %6266 = vrot.lane.b32.xlu1 %v4960_v54, %s7128_s15  ;;  %6328 = vrot.lane.b32.xlu0 %v4825_v43, %s7129_s16  ;;  %v5504_v16 = vcombine.low %v5448_v58, %v5480_v61  ;;  %v5752_v43 = vrot.slane %v5744_v55, %v7274_v50  ;;  %v12393_v55 = vcombine.low %v12391_v14, %v12392_v30 }
 0x357   :  { %v9987_v44 = vpop.permute.xlu1 %6058  ;;  %v9989_v20 = vpop.permute.xlu0 %6120 }
 0x358   :  { %12385 = vst [vmem:[#allocation197_spill] sm:$0xff] %v9987_v44  ;;  %v12415_v44 = vld [vmem:[#allocation229_spill] sm:$0xff] }
 0x359   :  { %6270 = vrot.lane.b32.xlu1 %v5232_v15, %s7128_s15  ;;  %6332 = vrot.lane.b32.xlu0 %v5097_v62, %s7129_s16  ;;  %v5776_v15 = vcombine.low %v5720_v3, %v5752_v43  ;;  %v5641_v62 = vcombine.high %v9857_v1, %v9860_v13 }
 0x35b   :  { %v9995_v54 = vpop.permute.xlu1 %6062  ;;  %v9997_v45 = vpop.permute.xlu0 %6124 }
 0x35c   :  { %12386 = vst [vmem:[#allocation240_spill] sm:$0xff] %v9995_v54 }
 0x35d   :  { %6274 = vrot.lane.b32.xlu1 %v5504_v16, %s7128_s15  ;;  %6336 = vrot.lane.b32.xlu0 %v5369_v42, %s7129_s16  ;;  %v4145_v16 = vcombine.high %v9901_v57, %v9904_v19  ;;  %v12396_v42 = vld [vmem:[#allocation56_spill] sm:$0xff] }
 0x35e   :  { %v12398_v17 = vcombine.low %v12396_v42, %v12397_v38 }
 0x35f   :  { %v10005_v37 = vpop.permute.xlu1 %6066  ;;  %v10007_v35 = vpop.permute.xlu0 %6128 }
 0x360   :  { %12387 = vst [vmem:[#allocation239_spill] sm:$0xff] %v10005_v37  ;;  %12388 = vst [vmem:[#allocation19_spill] sm:$0xff] %v10007_v35  ;;  %v4961_v37 = vcombine.high %v4904_v23, %v4936_v18 }
 0x361   :  { %6278 = vrot.lane.b32.xlu1 %v5776_v15, %s7128_s15  ;;  %6340 = vrot.lane.b32.xlu0 %v5641_v62, %s7129_s16 }
 0x363   :  { %v10013_v4 = vpop.permute.xlu1 %6070  ;;  %v10015_v27 = vpop.permute.xlu0 %6132 }
 0x364   :  { %12389 = vst [vmem:[#allocation18_spill] sm:$0xff] %v10013_v4  ;;  %12390 = vst [vmem:[#allocation61_spill] sm:$0xff] %v10015_v27  ;;  %v12407_v4 = vld [vmem:[#allocation142_spill] sm:$0xff]  ;;  %v12461_v27 = vld [vmem:[#allocation9_spill] sm:$0xff] }
 0x365   :  { %6314 = vrot.lane.b32.xlu1 %v3873_v6, %s7129_s16  ;;  %6376 = vrot.lane.b32.xlu0 %v12393_v55, %s7130_s17  ;;  %v4417_v6 = vcombine.high %v9909_v9, %v9912_v21  ;;  %v12401_v55 = vld [vmem:[#allocation98_spill] sm:$0xff] }
 0x367   :  { %v10024_v1 = vpop.permute.xlu1 %6074  ;;  %v10026_v13 = vpop.permute.xlu0 %6136 }
 0x368   :  { %12394 = vst [vmem:[#allocation60_spill] sm:$0xff] %v10024_v1  ;;  %12395 = vst [vmem:[#allocation103_spill] sm:$0xff] %v10026_v13  ;;  %v12402_v1 = vld [vmem:[#allocation100_spill] sm:$0xff]  ;;  %v12437_v13 = vcombine.high %v12396_v42, %v12397_v38  ;;  %v12447_v42 = vld [vmem:[#allocation163_spill] sm:$0xff] }
 0x369   :  { %6318 = vrot.lane.b32.xlu1 %v4145_v16, %s7129_s16  ;;  %6380 = vrot.lane.b32.xlu0 %v12398_v17, %s7130_s17  ;;  %v12403_v57 = vcombine.low %v12401_v55, %v12402_v1  ;;  %v4689_v17 = vcombine.high %v9941_v22, %v9944_v29 }
 0x36b   :  { %v10035_v15 = vpop.permute.xlu1 %6078  ;;  %v10037_v62 = vpop.permute.xlu0 %6140 }
 0x36c   :  { %12399 = vst [vmem:[#allocation102_spill] sm:$0xff] %v10035_v15  ;;  %12400 = vst [vmem:[#allocation146_spill] sm:$0xff] %v10037_v62  ;;  %v12406_v15 = vld [vmem:[#allocation140_spill] sm:$0xff] }
 0x36d   :  { %6322 = vrot.lane.b32.xlu1 %v4417_v6, %s7129_s16  ;;  %6384 = vrot.lane.b32.xlu0 %v12403_v57, %s7130_s17  ;;  %v12408_v9 = vcombine.low %v12406_v15, %v12407_v4  ;;  %v12410_v57 = vld [vmem:[#allocation183_spill] sm:$0xff]  ;;  %v12429_v62 = vld [vmem:[#allocation36_spill] sm:$0xff] }
 0x36f   :  { %v10046_v19 = vpop.permute.xlu1 %6082  ;;  %v10048_v16 = vpop.permute.xlu0 %6144 }
 0x370   :  { %12404 = vst [vmem:[#allocation145_spill] sm:$0xff] %v10046_v19  ;;  %12405 = vst [vmem:[#allocation192_spill] sm:$0xff] %v10048_v16  ;;  %v12411_v19 = vld [vmem:[#allocation186_spill] sm:$0xff] }
 0x371   :  { %6326 = vrot.lane.b32.xlu1 %v4689_v17, %s7129_s16  ;;  %6388 = vrot.lane.b32.xlu0 %v12408_v9, %s7130_s17  ;;  %v12412_v54 = vcombine.low %v12410_v57, %v12411_v19  ;;  %v5233_v17 = vcombine.high %v9965_v32, %v5208_v33  ;;  %v12414_v9 = vld [vmem:[#allocation227_spill] sm:$0xff] }
 0x373   :  { %v10057_v21 = vpop.permute.xlu1 %6086  ;;  %v10059_v6 = vpop.permute.xlu0 %6148 }
 0x374   :  { %12409 = vst [vmem:[#allocation190_spill] sm:$0xff] %v10057_v21  ;;  %v12416_v21 = vcombine.low %v12414_v9, %v12415_v44 }
 0x375   :  { %6330 = vrot.lane.b32.xlu1 %v4961_v37, %s7129_s16  ;;  %6392 = vrot.lane.b32.xlu0 %v12412_v54, %s7130_s17  ;;  %v5505_v37 = vcombine.high %v5448_v58, %v5480_v61  ;;  %v12418_v54 = vld [vmem:[#allocation261_spill] sm:$0xff] }
 0x377   :  { %v10066_v22 = vpop.permute.xlu1 %6122  ;;  %v10068_v29 = vpop.permute.xlu0 %6184 }
 0x378   :  { %12413 = vst [vmem:[#allocation234_spill] sm:$0xff] %v10066_v22  ;;  %v12419_v22 = vld [vmem:[#allocation263_spill] sm:$0xff] }
 0x379   :  { %6334 = vrot.lane.b32.xlu1 %v5233_v17, %s7129_s16  ;;  %6396 = vrot.lane.b32.xlu0 %v12416_v21, %s7130_s17  ;;  %v12420_v52 = vcombine.low %v12418_v54, %v12419_v22  ;;  %v5777_v17 = vcombine.high %v5720_v3, %v5752_v43  ;;  %v12423_v21 = vld [vmem:[#allocation291_spill] sm:$0xff]  ;;  %v12431_v3 = vcombine.high %v12391_v14, %v12392_v30  ;;  %v12440_v14 = vld [vmem:[#allocation118_spill] sm:$0xff]  ;;  %v12441_v30 = vld [vmem:[#allocation120_spill] sm:$0xff] }
 0x37b   :  { %v10076_v23 = vpop.permute.xlu1 %6126  ;;  %v10078_v18 = vpop.permute.xlu0 %6188 }
 0x37c   :  { %12417 = vst [vmem:[#allocation232_spill] sm:$0xff] %v10076_v23  ;;  %v12424_v23 = vld [vmem:[#allocation292_spill] sm:$0xff] }
 0x37d   :  { %6338 = vrot.lane.b32.xlu1 %v5505_v37, %s7129_s16  ;;  %6400 = vrot.lane.b32.xlu0 %v12420_v52, %s7130_s17  ;;  %v12425_v16 = vcombine.low %v12423_v21, %v12424_v23  ;;  %v12428_v37 = vld [vmem:[#allocation34_spill] sm:$0xff] }
 0x37e   :  { %v12430_v52 = vcombine.low %v12428_v37, %v12429_v62 }
 0x37f   :  { %v10085_v32 = vpop.permute.xlu1 %6130  ;;  %v10087_v33 = vpop.permute.xlu0 %6192 }
 0x380   :  { %12421 = vst [vmem:[#allocation298_spill] sm:$0xff] %v10085_v32  ;;  %12422 = vst [vmem:[#allocation296_spill] sm:$0xff] %v10087_v33  ;;  %v12466_v33 = vld [vmem:[#allocation275_spill] sm:$0xff] }
 0x381   :  { %6342 = vrot.lane.b32.xlu1 %v5777_v17, %s7129_s16  ;;  %6404 = vrot.lane.b32.xlu0 %v12425_v16, %s7130_s17  ;;  %v12434_v16 = vld [vmem:[#allocation76_spill] sm:$0xff]  ;;  %v12468_v35 = vcombine.low %v12466_v33, %v12467_v31 }
 0x383   :  { %v10094_v58 = vpop.permute.xlu1 %6134  ;;  %v10096_v61 = vpop.permute.xlu0 %6196 }
 0x384   :  { %12426 = vst [vmem:[#allocation41_spill] sm:$0xff] %v10094_v58  ;;  %12427 = vst [vmem:[#allocation40_spill] sm:$0xff] %v10096_v61  ;;  %v12435_v58 = vld [vmem:[#allocation78_spill] sm:$0xff] }
 0x385   :  { %6378 = vrot.lane.b32.xlu1 %v12430_v52, %s7130_s17  ;;  %6440 = vrot.lane.b32.xlu0 %v12431_v3, %s7131_s18  ;;  %v12436_v32 = vcombine.low %v12434_v16, %v12435_v58  ;;  %v12442_v3 = vcombine.low %v12440_v14, %v12441_v30 }
 0x387   :  { %v10106_v43 = vpop.permute.xlu1 %6138  ;;  %v10108_v17 = vpop.permute.xlu0 %6200 }
 0x388   :  { %12432 = vst [vmem:[#allocation83_spill] sm:$0xff] %v10106_v43  ;;  %12433 = vst [vmem:[#allocation82_spill] sm:$0xff] %v10108_v17  ;;  %v12443_v43 = vcombine.high %v12401_v55, %v12402_v1  ;;  %v12451_v1 = vld [vmem:[#allocation205_spill] sm:$0xff]  ;;  %v12452_v55 = vld [vmem:[#allocation208_spill] sm:$0xff] }
 0x389   :  { %6382 = vrot.lane.b32.xlu1 %v12436_v32, %s7130_s17  ;;  %6444 = vrot.lane.b32.xlu0 %v12437_v13, %s7131_s18  ;;  %v12446_v13 = vld [vmem:[#allocation161_spill] sm:$0xff] }
 0x38a   :  { %v12448_v38 = vcombine.low %v12446_v13, %v12447_v42 }
 0x38b   :  { %v10118_v52 = vpop.permute.xlu1 %6142  ;;  %v10120_v61 = vpop.permute.xlu0 %6204 }
 0x38c   :  { %12438 = vst [vmem:[#allocation125_spill] sm:$0xff] %v10118_v52  ;;  %12439 = vst [vmem:[#allocation124_spill] sm:$0xff] %v10120_v61  ;;  %v12449_v52 = vcombine.high %v12406_v15, %v12407_v4  ;;  %v12456_v4 = vld [vmem:[#allocation245_spill] sm:$0xff]  ;;  %v12457_v15 = vld [vmem:[#allocation247_spill] sm:$0xff] }
 0x38d   :  { %6386 = vrot.lane.b32.xlu1 %v12442_v3, %s7130_s17  ;;  %6448 = vrot.lane.b32.xlu0 %v12443_v43, %s7131_s18  ;;  %v12453_v43 = vcombine.low %v12451_v1, %v12452_v55 }
 0x38f   :  { %v10130_v32 = vpop.permute.xlu1 %6146  ;;  %v10132_v17 = vpop.permute.xlu0 %6208 }
 0x390   :  { %12444 = vst [vmem:[#allocation168_spill] sm:$0xff] %v10130_v32  ;;  %12445 = vst [vmem:[#allocation167_spill] sm:$0xff] %v10132_v17  ;;  %v12454_v32 = vcombine.high %v12410_v57, %v12411_v19  ;;  %v12464_v57 = vld [vmem:[#allocation5_spill] sm:$0xff] }
 0x391   :  { %6390 = vrot.lane.b32.xlu1 %v12448_v38, %s7130_s17  ;;  %6452 = vrot.lane.b32.xlu0 %v12449_v52, %s7131_s18  ;;  %v12458_v52 = vcombine.low %v12456_v4, %v12457_v15 }
 0x393   :  { %v10142_v3 = vpop.permute.xlu1 %6150  ;;  %v10144_v61 = vpop.permute.xlu0 %6212 }
 0x394   :  { %12450 = vst [vmem:[#allocation214_spill] sm:$0xff] %v10142_v3  ;;  %v12459_v3 = vcombine.high %v12414_v9, %v12415_v44  ;;  %v12469_v44 = vcombine.high %v12418_v54, %v12419_v22  ;;  %v12470_v9 = vld [vmem:[#allocation47_spill] sm:$0xff]  ;;  %v12477_v22 = vcombine.high %v12423_v21, %v12424_v23  ;;  %v12484_v21 = vcombine.high %v12428_v37, %v12429_v62 }
 0x395   :  { %6394 = vrot.lane.b32.xlu1 %v12453_v43, %s7130_s17  ;;  %6456 = vrot.lane.b32.xlu0 %v12454_v32, %s7131_s18  ;;  %v12460_v43 = vld [vmem:[#allocation11_spill] sm:$0xff]  ;;  %v12491_v37 = vcombine.high %v12434_v16, %v12435_v58  ;;  %v12498_v16 = vcombine.high %v12440_v14, %v12441_v30  ;;  %v12505_v30 = vcombine.high %v12446_v13, %v12447_v42 }
 0x396   :  { %v3720_v7 = vcombine.low %v12461_v27, %v12460_v43  ;;  %v12465_v32 = vld [vmem:[#allocation3_spill] sm:$0xff]  ;;  %v12511_v42 = vcombine.high %v12451_v1, %v12452_v55  ;;  %v12517_v55 = vcombine.high %v12456_v4, %v12457_v15  ;;  %v12524_v15 = vcombine.high %v12466_v33, %v12467_v31 }
 0x397   :  { %v10154_v38 = vpop.permute.xlu1 %6186  ;;  %v10156_v17 = vpop.permute.xlu0 %6248  ;;  %v12473_v43 = vld [vmem:[#allocation51_spill] sm:$0xff]  ;;  %v12531_v33 = vcombine.high %v9150_v12, %v9156_v59 }
 0x398   :  { %12455 = vst [vmem:[#allocation212_spill] sm:$0xff] %v10154_v38  ;;  %v3688_v38 = vcombine.low %v12465_v32, %v12464_v57  ;;  %v10191_v57 = vrot.slane %v3720_v7, %v7274_v50  ;;  %v12478_v32 = vld [vmem:[#allocation89_spill] sm:$0xff] }
 0x399   :  { %6398 = vrot.lane.b32.xlu1 %v12458_v52, %s7130_s17  ;;  %6460 = vrot.lane.b32.xlu0 %v12459_v3, %s7131_s18  ;;  %v12471_v3 = vld [vmem:[#allocation45_spill] sm:$0xff] }
 0x39a   :  { %v3960_v27 = vcombine.low %v12471_v3, %v12470_v9  ;;  %v12472_v52 = vld [vmem:[#allocation53_spill] sm:$0xff]  ;;  %v10202_v54 = vrot.slane %v3688_v38, %v7274_v50  ;;  %v12480_v3 = vld [vmem:[#allocation95_spill] sm:$0xff] }
 0x39b   :  { %v10168_v24 = vpop.permute.xlu1 %6190  ;;  %v10170_v19 = vpop.permute.xlu0 %6252 }
 0x39c   :  { %12462 = vst [vmem:[#allocation250_spill] sm:$0xff] %v10168_v24  ;;  %12463 = vst [vmem:[#allocation249_spill] sm:$0xff] %v10170_v19  ;;  %v3992_v24 = vcombine.low %v12473_v43, %v12472_v52  ;;  %v12481_v52 = vld [vmem:[#allocation93_spill] sm:$0xff] }
 0x39d   :  { %6402 = vrot.lane.b32.xlu1 %v12468_v35, %s7130_s17  ;;  %6464 = vrot.lane.b32.xlu0 %v12469_v44, %s7131_s18  ;;  %v12476_v35 = vcombine.low %v9150_v12, %v9156_v59  ;;  %v12479_v44 = vld [vmem:[#allocation87_spill] sm:$0xff]  ;;  %v4264_v7 = vcombine.low %v12481_v52, %v12480_v3  ;;  %v12487_v3 = vld [vmem:[#allocation137_spill] sm:$0xff] }
 0x39e   :  { %v4232_v9 = vcombine.low %v12479_v44, %v12478_v32  ;;  %v10218_v23 = vrot.slane %v3992_v24, %v7274_v50  ;;  %v12485_v32 = vld [vmem:[#allocation131_spill] sm:$0xff] }
 0x39f   :  { %v10186_v10 = vpop.permute.xlu1 %6194  ;;  %v10188_v56 = vpop.permute.xlu0 %6256  ;;  %v12488_v24 = vld [vmem:[#allocation135_spill] sm:$0xff] }
 0x3a0   :  { %12474 = vst [vmem:[#allocation10_spill] sm:$0xff] %v10186_v10  ;;  %12475 = vst [vmem:[#allocation8_spill] sm:$0xff] %v10188_v56  ;;  %v10215_v56 = vrot.slane %v3960_v27, %v7274_v50  ;;  %v10226_v38 = vrot.slane %v4232_v9, %v7274_v50  ;;  %v12486_v27 = vld [vmem:[#allocation129_spill] sm:$0xff]  ;;  %v4536_v52 = vcombine.low %v12488_v24, %v12487_v3 }
 0x3a1   :  { %6406 = vrot.lane.b32.xlu1 %v12476_v35, %s7130_s17  ;;  %6468 = vrot.lane.b32.xlu0 %v12477_v22, %s7131_s18  ;;  %v3740_v35 = vcombine.low %v10202_v54, %v10191_v57  ;;  %v10229_v22 = vrot.slane %v4264_v7, %v7274_v50  ;;  %v4504_v44 = vcombine.low %v12486_v27, %v12485_v32  ;;  %v12492_v7 = vld [vmem:[#allocation174_spill] sm:$0xff]  ;;  %v12494_v32 = vld [vmem:[#allocation180_spill] sm:$0xff] }
 0x3a2   :  { %v4012_v62 = vcombine.low %v10215_v56, %v10218_v23  ;;  %v12495_v27 = vld [vmem:[#allocation178_spill] sm:$0xff]  ;;  %v10260_v58 = vrot.slane %v4536_v52, %v7274_v50 }
 0x3a3   :  { %v10208_v43 = vpop.permute.xlu1 %6198  ;;  %v10210_v10 = vpop.permute.xlu0 %6260  ;;  %v4284_v9 = vcombine.low %v10226_v38, %v10229_v22  ;;  %v4808_v3 = vcombine.low %v12495_v27, %v12494_v32  ;;  %v12502_v32 = vld [vmem:[#allocation222_spill] sm:$0xff] }
 0x3a4   :  { %12482 = vst [vmem:[#allocation4_spill] sm:$0xff] %v10208_v43  ;;  %12483 = vst [vmem:[#allocation2_spill] sm:$0xff] %v10210_v10 }
 0x3a5   :  { %6442 = vrot.lane.b32.xlu1 %v12484_v21, %s7131_s18  ;;  %6504 = vrot.lane.b32.xlu0 %v3740_v35, %s7132_s19  ;;  %v12493_v35 = vld [vmem:[#allocation172_spill] sm:$0xff]  ;;  %v10281_v14 = vrot.slane %v4808_v3, %v7274_v50 }
 0x3a6   :  { %v4776_v21 = vcombine.low %v12493_v35, %v12492_v7  ;;  %v12501_v35 = vld [vmem:[#allocation224_spill] sm:$0xff] }
 0x3a7   :  { %v10235_v43 = vpop.permute.xlu1 %6202  ;;  %v10237_v10 = vpop.permute.xlu0 %6264  ;;  %v5080_v27 = vcombine.low %v12502_v32, %v12501_v35  ;;  %v12508_v35 = vld [vmem:[#allocation260_spill] sm:$0xff]  ;;  %v12509_v32 = vld [vmem:[#allocation258_spill] sm:$0xff] }
 0x3a8   :  { %12489 = vst [vmem:[#allocation282_spill] sm:$0xff] %v10235_v43  ;;  %12490 = vst [vmem:[#allocation280_spill] sm:$0xff] %v10237_v10  ;;  %v10257_v10 = vrot.slane %v4504_v44, %v7274_v50  ;;  %v5352_v3 = vcombine.low %v12509_v32, %v12508_v35 }
 0x3a9   :  { %6446 = vrot.lane.b32.xlu1 %v12491_v37, %s7131_s18  ;;  %6508 = vrot.lane.b32.xlu0 %v4012_v62, %s7132_s19  ;;  %v12499_v62 = vld [vmem:[#allocation218_spill] sm:$0xff]  ;;  %v12500_v37 = vld [vmem:[#allocation216_spill] sm:$0xff] }
 0x3aa   :  { %v5048_v7 = vcombine.low %v12500_v37, %v12499_v62  ;;  %v4556_v52 = vcombine.low %v10257_v10, %v10260_v58  ;;  %v12506_v62 = vld [vmem:[#allocation256_spill] sm:$0xff]  ;;  %v12507_v37 = vld [vmem:[#allocation254_spill] sm:$0xff]  ;;  %v10323_v1 = vrot.slane %v5352_v3, %v7274_v50 }
 0x3ab   :  { %v10252_v24 = vpop.permute.xlu1 %6206  ;;  %v10254_v43 = vpop.permute.xlu0 %6268 }
 0x3ac   :  { %12496 = vst [vmem:[#allocation46_spill] sm:$0xff] %v10252_v24  ;;  %12497 = vst [vmem:[#allocation44_spill] sm:$0xff] %v10254_v43  ;;  %v10278_v43 = vrot.slane %v4776_v21, %v7274_v50  ;;  %v5320_v21 = vcombine.low %v12507_v37, %v12506_v62  ;;  %v12514_v62 = vld [vmem:[#allocation290_spill] sm:$0xff]  ;;  %v12515_v37 = vld [vmem:[#allocation288_spill] sm:$0xff] }
 0x3ad   :  { %6450 = vrot.lane.b32.xlu1 %v12498_v16, %s7131_s18  ;;  %6512 = vrot.lane.b32.xlu0 %v4284_v9, %s7132_s19  ;;  %v10289_v9 = vrot.slane %v5048_v7, %v7274_v50  ;;  %v10292_v16 = vrot.slane %v5080_v27, %v7274_v50  ;;  %v12512_v27 = vld [vmem:[#allocation286_spill] sm:$0xff]  ;;  %v5624_v35 = vcombine.low %v12515_v37, %v12514_v62  ;;  %v12521_v62 = vld [vmem:[#allocation29_spill] sm:$0xff] }
 0x3ae   :  { %v4828_v13 = vcombine.low %v10278_v43, %v10281_v14  ;;  %v10320_v51 = vrot.slane %v5320_v21, %v7274_v50 }
 0x3af   :  { %v10271_v24 = vpop.permute.xlu1 %6210  ;;  %v10273_v44 = vpop.permute.xlu0 %6272  ;;  %v5100_v7 = vcombine.low %v10289_v9, %v10292_v16  ;;  %v10344_v4 = vrot.slane %v5624_v35, %v7274_v50 }
 0x3b0   :  { %12503 = vst [vmem:[#allocation52_spill] sm:$0xff] %v10271_v24  ;;  %12504 = vst [vmem:[#allocation50_spill] sm:$0xff] %v10273_v44  ;;  %v5372_v3 = vcombine.low %v10320_v51, %v10323_v1 }
 0x3b1   :  { %6454 = vrot.lane.b32.xlu1 %v12505_v30, %s7131_s18  ;;  %6516 = vrot.lane.b32.xlu0 %v4556_v52, %s7132_s19  ;;  %v12513_v52 = vld [vmem:[#allocation284_spill] sm:$0xff] }
 0x3b2   :  { %v5592_v30 = vcombine.low %v12513_v52, %v12512_v27  ;;  %v12520_v52 = vld [vmem:[#allocation31_spill] sm:$0xff] }
 0x3b3   :  { %v10298_v24 = vpop.permute.xlu1 %6214  ;;  %v10300_v44 = vpop.permute.xlu0 %6276  ;;  %v3856_v37 = vcombine.low %v12521_v62, %v12520_v52  ;;  %v12527_v52 = vld [vmem:[#allocation73_spill] sm:$0xff]  ;;  %v12528_v62 = vld [vmem:[#allocation71_spill] sm:$0xff] }
 0x3b4   :  { %12510 = vst [vmem:[#allocation88_spill] sm:$0xff] %v10298_v24  ;;  %v10341_v19 = vrot.slane %v5592_v30, %v7274_v50  ;;  %v4128_v30 = vcombine.low %v12528_v62, %v12527_v52 }
 0x3b5   :  { %6458 = vrot.lane.b32.xlu1 %v12511_v42, %s7131_s18  ;;  %6520 = vrot.lane.b32.xlu0 %v4828_v13, %s7132_s19  ;;  %v12518_v13 = vld [vmem:[#allocation25_spill] sm:$0xff]  ;;  %v12519_v42 = vld [vmem:[#allocation23_spill] sm:$0xff]  ;;  %v10365_v31 = vrot.slane %v3856_v37, %v7274_v50 }
 0x3b6   :  { %v3824_v27 = vcombine.low %v12519_v42, %v12518_v13  ;;  %v12526_v13 = vld [vmem:[#allocation65_spill] sm:$0xff]  ;;  %v10388_v59 = vrot.slane %v4128_v30, %v7274_v50 }
 0x3b7   :  { %v10315_v32 = vpop.permute.xlu1 %6250  ;;  %v10317_v24 = vpop.permute.xlu0 %6312 }
 0x3b8   :  { %12516 = vst [vmem:[#allocation86_spill] sm:$0xff] %v10315_v32 }
 0x3b9   :  { %6462 = vrot.lane.b32.xlu1 %v12517_v55, %s7131_s18  ;;  %6524 = vrot.lane.b32.xlu0 %v5100_v7, %s7132_s19  ;;  %v10352_v7 = vrot.slane %v3824_v27, %v7274_v50  ;;  %v12525_v55 = vld [vmem:[#allocation67_spill] sm:$0xff]  ;;  %v12532_v27 = vld [vmem:[#allocation109_spill] sm:$0xff] }
 0x3ba   :  { %v4096_v42 = vcombine.low %v12526_v13, %v12525_v55  ;;  %v12534_v55 = vld [vmem:[#allocation115_spill] sm:$0xff]  ;;  %v12535_v13 = vld [vmem:[#allocation113_spill] sm:$0xff] }
 0x3bb   :  { %v10334_v32 = vpop.permute.xlu1 %6254  ;;  %v10336_v21 = vpop.permute.xlu0 %6316  ;;  %v4400_v52 = vcombine.low %v12535_v13, %v12534_v55  ;;  %v3876_v37 = vcombine.low %v10352_v7, %v10365_v31 }
 0x3bc   :  { %12522 = vst [vmem:[#allocation94_spill] sm:$0xff] %v10334_v32  ;;  %12523 = vst [vmem:[#allocation92_spill] sm:$0xff] %v10336_v21  ;;  %v5644_v21 = vcombine.low %v10341_v19, %v10344_v4  ;;  %v10385_v12 = vrot.slane %v4096_v42, %v7274_v50  ;;  %v12541_v42 = vld [vmem:[#allocation156_spill] sm:$0xff] }
 0x3bd   :  { %6466 = vrot.lane.b32.xlu1 %v12524_v15, %s7131_s18  ;;  %6528 = vrot.lane.b32.xlu0 %v5372_v3, %s7132_s19  ;;  %v12533_v3 = vld [vmem:[#allocation107_spill] sm:$0xff] }
 0x3be   :  { %v4368_v15 = vcombine.low %v12533_v3, %v12532_v27  ;;  %v12538_v27 = vld [vmem:[#allocation152_spill] sm:$0xff]  ;;  %v12539_v3 = vld [vmem:[#allocation150_spill] sm:$0xff] }
 0x3bf   :  { %v10358_v32 = vpop.permute.xlu1 %6258  ;;  %v10360_v35 = vpop.permute.xlu0 %6320 }
 0x3c0   :  { %12529 = vst [vmem:[#allocation130_spill] sm:$0xff] %v10358_v32  ;;  %12530 = vst [vmem:[#allocation128_spill] sm:$0xff] %v10360_v35  ;;  %v3741_v35 = vcombine.high %v10202_v54, %v10191_v57  ;;  %v4640_v57 = vcombine.low %v12539_v3, %v12538_v27  ;;  %v12540_v54 = vld [vmem:[#allocation158_spill] sm:$0xff]  ;;  %v12544_v27 = vld [vmem:[#allocation196_spill] sm:$0xff] }
 0x3c1   :  { %6470 = vrot.lane.b32.xlu1 %v12531_v33, %s7131_s18  ;;  %6532 = vrot.lane.b32.xlu0 %v5644_v21, %s7132_s19  ;;  %v10393_v21 = vrot.slane %v4368_v15, %v7274_v50  ;;  %v10396_v33 = vrot.slane %v4400_v52, %v7274_v50  ;;  %v4672_v55 = vcombine.low %v12541_v42, %v12540_v54  ;;  %v12545_v3 = vld [vmem:[#allocation194_spill] sm:$0xff] }
 0x3c2   :  { %v4285_v52 = vcombine.high %v10226_v38, %v10229_v22  ;;  %v4912_v54 = vcombine.low %v12545_v3, %v12544_v27  ;;  %v12546_v42 = vld [vmem:[#allocation202_spill] sm:$0xff]  ;;  %v12551_v22 = vld [vmem:[#allocation236_spill] sm:$0xff] }
 0x3c3   :  { %v10376_v62 = vpop.permute.xlu1 %6262  ;;  %v10378_v32 = vpop.permute.xlu0 %6324  ;;  %v4420_v15 = vcombine.low %v10393_v21, %v10396_v33  ;;  %v12550_v38 = vld [vmem:[#allocation238_spill] sm:$0xff] }
 0x3c4   :  { %12536 = vst [vmem:[#allocation136_spill] sm:$0xff] %v10376_v62  ;;  %12537 = vst [vmem:[#allocation134_spill] sm:$0xff] %v10378_v32  ;;  %v12553_v27 = vld [vmem:[#allocation242_spill] sm:$0xff] }
 0x3c5   :  { %6506 = vrot.lane.b32.xlu1 %v3876_v37, %s7132_s19  ;;  %6568 = vrot.lane.b32.xlu0 %v3741_v35, %s7133_s20  ;;  %v4148_v37 = vcombine.low %v10385_v12, %v10388_v59  ;;  %v4013_v35 = vcombine.high %v10215_v56, %v10218_v23  ;;  %v10425_v56 = vrot.slane %v4640_v57, %v7274_v50 }
 0x3c6   :  { %v10428_v23 = vrot.slane %v4672_v55, %v7274_v50  ;;  %v4557_v55 = vcombine.high %v10257_v10, %v10260_v58  ;;  %v12558_v10 = vld [vmem:[#allocation274_spill] sm:$0xff]  ;;  %v12559_v58 = vld [vmem:[#allocation272_spill] sm:$0xff] }
 0x3c7   :  { %v10402_v13 = vpop.permute.xlu1 %6266  ;;  %v10404_v30 = vpop.permute.xlu0 %6328 }
 0x3c8   :  { %12542 = vst [vmem:[#allocation173_spill] sm:$0xff] %v10402_v13  ;;  %12543 = vst [vmem:[#allocation171_spill] sm:$0xff] %v10404_v30  ;;  %v12547_v13 = vld [vmem:[#allocation200_spill] sm:$0xff]  ;;  %v4692_v57 = vcombine.low %v10425_v56, %v10428_v23 }
 0x3c9   :  { %6510 = vrot.lane.b32.xlu1 %v4148_v37, %s7132_s19  ;;  %6572 = vrot.lane.b32.xlu0 %v4013_v35, %s7133_s20  ;;  %v4944_v62 = vcombine.low %v12547_v13, %v12546_v42  ;;  %v5184_v37 = vcombine.low %v12551_v22, %v12550_v38  ;;  %v12552_v35 = vld [vmem:[#allocation244_spill] sm:$0xff] }
 0x3ca   :  { %v5216_v13 = vcombine.low %v12553_v27, %v12552_v35  ;;  %v12556_v35 = vld [vmem:[#allocation270_spill] sm:$0xff]  ;;  %v12557_v27 = vld [vmem:[#allocation268_spill] sm:$0xff] }
 0x3cb   :  { %v10420_v30 = vpop.permute.xlu1 %6270  ;;  %v10422_v32 = vpop.permute.xlu0 %6332  ;;  %v10453_v38 = vrot.slane %v5184_v37, %v7274_v50  ;;  %v4829_v37 = vcombine.high %v10278_v43, %v10281_v14 }
 0x3cc   :  { %12548 = vst [vmem:[#allocation179_spill] sm:$0xff] %v10420_v30  ;;  %12549 = vst [vmem:[#allocation177_spill] sm:$0xff] %v10422_v32  ;;  %v10456_v22 = vrot.slane %v5216_v13, %v7274_v50 }
 0x3cd   :  { %6514 = vrot.lane.b32.xlu1 %v4420_v15, %s7132_s19  ;;  %6576 = vrot.lane.b32.xlu0 %v4285_v52, %s7133_s20  ;;  %v10445_v15 = vrot.slane %v4912_v54, %v7274_v50  ;;  %v10448_v52 = vrot.slane %v4944_v62, %v7274_v50  ;;  %v5488_v54 = vcombine.low %v12559_v58, %v12558_v10  ;;  %v12563_v58 = vld [vmem:[#allocation144_spill] sm:$0xff] }
 0x3ce   :  { %v5236_v13 = vcombine.low %v10453_v38, %v10456_v22 }
 0x3cf   :  { %v10436_v3 = vpop.permute.xlu1 %6274  ;;  %v10438_v42 = vpop.permute.xlu0 %6336  ;;  %v10488_v14 = vrot.slane %v5488_v54, %v7274_v50 }
 0x3d0   :  { %12554 = vst [vmem:[#allocation217_spill] sm:$0xff] %v10436_v3  ;;  %12555 = vst [vmem:[#allocation215_spill] sm:$0xff] %v10438_v42  ;;  %v5456_v3 = vcombine.low %v12557_v27, %v12556_v35  ;;  %v12561_v35 = vld [vmem:[#allocation302_spill] sm:$0xff]  ;;  %v12562_v27 = vld [vmem:[#allocation300_spill] sm:$0xff] }
 0x3d1   :  { %6518 = vrot.lane.b32.xlu1 %v4692_v57, %s7132_s19  ;;  %6580 = vrot.lane.b32.xlu0 %v4557_v55, %s7133_s20  ;;  %v4964_v57 = vcombine.low %v10445_v15, %v10448_v52  ;;  %v5101_v55 = vcombine.high %v10289_v9, %v10292_v16  ;;  %v5728_v10 = vcombine.low %v12562_v27, %v12561_v35  ;;  %v12564_v35 = vld [vmem:[#allocation20_spill] sm:$0xff]  ;;  %v12565_v27 = vld [vmem:[#allocation21_spill] sm:$0xff] }
 0x3d2   :  { %v10485_v43 = vrot.slane %v5456_v3, %v7274_v50 }
 0x3d3   :  { %v10462_v30 = vpop.permute.xlu1 %6278  ;;  %v10464_v62 = vpop.permute.xlu0 %6340  ;;  %v10501_v3 = vrot.slane %v5728_v10, %v7274_v50  ;;  %v12566_v10 = vcombine.low %v12564_v35, %v12565_v27 }
 0x3d4   :  { %12560 = vst [vmem:[#allocation223_spill] sm:$0xff] %v10462_v30  ;;  %v5760_v30 = vcombine.low %v12563_v58, %v9131_v40  ;;  %v5508_v40 = vcombine.low %v10485_v43, %v10488_v14  ;;  %v4149_v58 = vcombine.high %v10385_v12, %v10388_v59  ;;  %v4421_v12 = vcombine.high %v10393_v21, %v10396_v33 }
 0x3d5   :  { %6522 = vrot.lane.b32.xlu1 %v4964_v57, %s7132_s19  ;;  %6584 = vrot.lane.b32.xlu0 %v4829_v37, %s7133_s20  ;;  %v5373_v57 = vcombine.high %v10320_v51, %v10323_v1  ;;  %v5645_v51 = vcombine.high %v10341_v19, %v10344_v4 }
 0x3d6   :  { %v10504_v54 = vrot.slane %v5760_v30, %v7274_v50  ;;  %v3877_v30 = vcombine.high %v10352_v7, %v10365_v31  ;;  %v12569_v7 = vld [vmem:[#allocation63_spill] sm:$0xff] }
 0x3d7   :  { %v10480_v42 = vpop.permute.xlu1 %6314  ;;  %v10482_v32 = vpop.permute.xlu0 %6376 }
 0x3d9   :  { %6526 = vrot.lane.b32.xlu1 %v5236_v13, %s7132_s19  ;;  %6588 = vrot.lane.b32.xlu0 %v5101_v55, %s7133_s20  ;;  %v5780_v55 = vcombine.low %v10501_v3, %v10504_v54 }
 0x3db   :  { %v10492_v9 = vpop.permute.xlu1 %6318  ;;  %v10494_v16 = vpop.permute.xlu0 %6380 }
 0x3dd   :  { %6530 = vrot.lane.b32.xlu1 %v5508_v40, %s7132_s19  ;;  %6592 = vrot.lane.b32.xlu0 %v5373_v57, %s7133_s20  ;;  %v12568_v40 = vld [vmem:[#allocation62_spill] sm:$0xff] }
 0x3de   :  { %v12570_v31 = vcombine.low %v12568_v40, %v12569_v7  ;;  %v12571_v57 = vld [vmem:[#allocation294_spill] sm:$0xff] }
 0x3df   :  { %v10508_v37 = vpop.permute.xlu1 %6322  ;;  %v10510_v13 = vpop.permute.xlu0 %6384 }
 0x3e1   :  { %6534 = vrot.lane.b32.xlu1 %v5780_v55, %s7132_s19  ;;  %6596 = vrot.lane.b32.xlu0 %v5645_v51, %s7133_s20  ;;  %v12572_v55 = vld [vmem:[#allocation295_spill] sm:$0xff] }
 0x3e2   :  { %v12573_v51 = vcombine.low %v12571_v57, %v12572_v55  ;;  %v12578_v55 = vld [vmem:[#allocation14_spill] sm:$0xff] }
 0x3e3   :  { %v10518_v50 = vpop.permute.xlu1 %6326  ;;  %v10520_v1 = vpop.permute.xlu0 %6388 }
 0x3e5   :  { %6570 = vrot.lane.b32.xlu1 %v3877_v30, %s7133_s20  ;;  %6632 = vrot.lane.b32.xlu0 %v12566_v10, %s7134_s21  ;;  %v6759_v30 = vsel %vm6744_vm0, %v12573_v51, %v9493_v39  ;;  %v12575_v39 = vld [vmem:[#allocation104_spill] sm:$0xff]  ;;  %v12579_v51 = vld [vmem:[#allocation17_spill] sm:$0xff] }
 0x3e6   :  { %v6776_v59 = vsel %vm6761_vm1, %v6759_v30, %v9576_v34 }
 0x3e7   :  { %v10529_v19 = vpop.permute.xlu1 %6330  ;;  %v10531_v4 = vpop.permute.xlu0 %6392 }
 0x3e8   :  { %12567 = vst [vmem:[#allocation221_spill] sm:$0xff] %v10529_v19 }
 0x3e9   :  { %6574 = vrot.lane.b32.xlu1 %v4149_v58, %s7133_s20  ;;  %6636 = vrot.lane.b32.xlu0 %v12570_v31, %s7134_s21  ;;  %v6793_v58 = vsel %vm6778_vm2, %v6776_v59, %v9660_v0  ;;  %v12576_v31 = vld [vmem:[#allocation105_spill] sm:$0xff]  ;;  %v4693_v59 = vcombine.high %v10425_v56, %v10428_v23  ;;  %v12585_v23 = vld [vmem:[#allocation59_spill] sm:$0xff] }
 0x3ea   :  { %v12577_v57 = vcombine.low %v12575_v39, %v12576_v31  ;;  %v6810_v34 = vsel %vm6795_vm3, %v6793_v58, %v9816_v25  ;;  %v12582_v58 = vld [vmem:[#allocation148_spill] sm:$0xff] }
 0x3eb   :  { %v10545_v10 = vpop.permute.xlu1 %6334  ;;  %v10547_v19 = vpop.permute.xlu0 %6396  ;;  %v6827_v33 = vsel %vm6812_vm4, %v6810_v34, %v9974_v49 }
 0x3ec   :  { %12574 = vst [vmem:[#allocation255_spill] sm:$0xff] %v10545_v10  ;;  %v12580_v10 = vcombine.low %v12578_v55, %v12579_v51  ;;  %v6844_v25 = vsel %vm6829_vm5, %v6827_v33, %v10059_v6  ;;  %v12584_v6 = vld [vmem:[#allocation57_spill] sm:$0xff] }
 0x3ed   :  { %6578 = vrot.lane.b32.xlu1 %v4421_v12, %s7133_s20  ;;  %6640 = vrot.lane.b32.xlu0 %v12577_v57, %s7134_s21  ;;  %v6861_v49 = vsel %vm6846_vm6, %v6844_v25, %v10144_v61  ;;  %v12586_v57 = vcombine.low %v12584_v6, %v12585_v23  ;;  %v12593_v6 = vld [vmem:[#allocation249_spill] sm:$0xff]  ;;  %v12594_v23 = vld [vmem:[#allocation230_spill] sm:$0xff] }
 0x3ee   :  { %v6745_v21 = vsel %vm6744_vm0, %v12580_v10, %v9317_v46  ;;  %v12581_v10 = vld [vmem:[#allocation147_spill] sm:$0xff]  ;;  %v6878_v55 = vsel %vm6863_vm7, %v6861_v49, %v10300_v44 }
 0x3ef   :  { %v6762_v0 = vsel %vm6761_vm1, %v6745_v21, %v9505_v8  ;;  %v10571_v30 = vpop.permute.xlu1 %6338  ;;  %v10573_v12 = vpop.permute.xlu0 %6400  ;;  %v12583_v56 = vcombine.low %v12581_v10, %v12582_v58 }
 0x3f0   :  { %v6779_v46 = vsel %vm6778_vm2, %v6762_v0, %v9585_v48  ;;  %v4965_v48 = vcombine.high %v10445_v15, %v10448_v52  ;;  %v6895_v15 = vsel %vm6880_vm8, %v6878_v55, %v10464_v62  ;;  %v12587_v62 = vld [vmem:[#allocation187_spill] sm:$0xff]  ;;  %v12601_v55 = vld [vmem:[#allocation116_spill] sm:$0xff] }
 0x3f1   :  { %v6796_v8 = vsel %vm6795_vm3, %v6779_v46, %v9672_v26  ;;  %6582 = vrot.lane.b32.xlu1 %v4693_v59, %s7133_s20  ;;  %6644 = vrot.lane.b32.xlu0 %v12583_v56, %s7134_s21  ;;  %v6747_v26 = vsel %vm6744_vm0, %v12586_v57, %v9343_v11  ;;  %v12588_v0 = vld [vmem:[#allocation191_spill] sm:$0xff]  ;;  %v12598_v57 = vld [vmem:[#allocation141_spill] sm:$0xff] }
 0x3f2   :  { %v6813_v61 = vsel %vm6812_vm4, %v6796_v8, %v9833_v2  ;;  %v6764_v51 = vsel %vm6761_vm1, %v6747_v26, %v9517_v53  ;;  %v12589_v33 = vcombine.low %v12587_v62, %v12588_v0  ;;  %v12599_v26 = vld [vmem:[#allocation143_spill] sm:$0xff] }
 0x3f3   :  { %v6830_v21 = vsel %vm6829_vm5, %v6813_v61, %v9989_v20  ;;  %v10607_v52 = vpop.permute.xlu1 %6342  ;;  %v6405_v11 = vpop.permute.xlu0 %6404  ;;  %v6781_v2 = vsel %vm6778_vm2, %v6764_v51, %v9594_v41  ;;  %v12590_v41 = vld [vmem:[#allocation99_spill] sm:$0xff] }
 0x3f4   :  { %v6847_v44 = vsel %vm6846_vm6, %v6830_v21, %v10068_v29  ;;  %v10614_v34 = vsel %vm6897_vm9, %v6895_v15, %v6405_v11  ;;  %v6798_v53 = vsel %vm6795_vm3, %v6781_v2, %v9686_v47  ;;  %v12591_v29 = vld [vmem:[#allocation101_spill] sm:$0xff]  ;;  %v12603_v15 = vld [vmem:[#allocation207_spill] sm:$0xff] }
 0x3f5   :  { %v6864_v20 = vsel %vm6863_vm7, %v6847_v44, %v10156_v17  ;;  %6586 = vrot.lane.b32.xlu1 %v4965_v48, %s7133_s20  ;;  %6648 = vrot.lane.b32.xlu0 %v12589_v33, %s7134_s21  ;;  %v12592_v59 = vcombine.low %v12590_v41, %v12591_v29  ;;  %v6815_v47 = vsel %vm6812_vm4, %v6798_v53, %v9852_v36  ;;  %v12604_v2 = vld [vmem:[#allocation19_spill] sm:$0xff] }
 0x3f6   :  { %v6881_v17 = vsel %vm6880_vm8, %v6864_v20, %v10317_v24  ;;  %v6832_v8 = vsel %vm6829_vm5, %v6815_v47, %v9997_v45  ;;  %v5509_v41 = vcombine.high %v10485_v43, %v10488_v14  ;;  %v12605_v29 = vld [vmem:[#allocation91_spill] sm:$0xff]  ;;  %v12610_v43 = vld [vmem:[#allocation266_spill] sm:$0xff] }
 0x3f7   :  { %v6749_v46 = vsel %vm6744_vm0, %v12592_v59, %v9372_v5  ;;  %v6898_v49 = vsel %vm6897_vm9, %v6881_v17, %v10482_v32  ;;  %v10640_v56 = vpop.permute.xlu1 %6378  ;;  %v6441_v48 = vpop.permute.xlu0 %6440  ;;  %v5237_v5 = vcombine.high %v10453_v38, %v10456_v22  ;;  %v6849_v24 = vsel %vm6846_vm6, %v6832_v8, %v10078_v18  ;;  %v12595_v38 = vld [vmem:[#allocation233_spill] sm:$0xff] }
 0x3f8   :  { %v6766_v25 = vsel %vm6761_vm1, %v6749_v46, %v9527_v28  ;;  %v10649_v28 = vsel %vm6914_vm10, %v6898_v49, %v6441_v48  ;;  %v6866_v32 = vsel %vm6863_vm7, %v6849_v24, %v12593_v6  ;;  %v12596_v22 = vcombine.low %v12594_v23, %v12595_v38  ;;  %v12606_v46 = vld [vmem:[#allocation296_spill] sm:$0xff] }
 0x3f9   :  { %v6783_v36 = vsel %vm6778_vm2, %v6766_v25, %v9603_v60  ;;  %6590 = vrot.lane.b32.xlu1 %v5237_v5, %s7133_s20  ;;  %v12597_v60 = vld [vmem:[#allocation38_spill] sm:$0xff]  ;;  %v12600_v18 = vcombine.low %v12598_v57, %v12599_v26  ;;  %v12607_v25 = vld [vmem:[#allocation220_spill] sm:$0xff]  ;;  %v12612_v5 = vld [vmem:[#allocation39_spill] sm:$0xff] }
 0x3fa   :  { %v6800_v45 = vsel %vm6795_vm3, %v6783_v36, %v9704_v63  ;;  %6652 = vrot.lane.b32.xlu0 %v12596_v22, %s7134_s21  ;;  %v12602_v63 = vld [vmem:[#allocation92_spill] sm:$0xff] }
 0x3fb   :  { %v6751_v61 = vsel %vm6744_vm0, %v12600_v18, %v12597_v60  ;;  %v6817_v51 = vsel %vm6812_vm4, %v6800_v45, %v12601_v55  ;;  %v6883_v21 = vsel %vm6880_vm8, %v6866_v32, %v12602_v63  ;;  %v10675_v20 = vpop.permute.xlu1 %6382  ;;  %v6445_v33 = vpop.permute.xlu0 %6444  ;;  %v12608_v49 = vld [vmem:[#allocation8_spill] sm:$0xff]  ;;  %v12616_v32 = vld [vmem:[#allocation110_spill] sm:$0xff] }
 0x3fc   :  { %v6768_v11 = vsel %vm6761_vm1, %v6751_v61, %v12603_v15  ;;  %v6834_v44 = vsel %vm6829_vm5, %v6817_v51, %v12604_v2  ;;  %v6900_v53 = vsel %vm6897_vm9, %v6883_v21, %v10494_v16  ;;  %v12609_v48 = vld [vmem:[#allocation264_spill] sm:$0xff]  ;;  %v12619_v61 = vld [vmem:[#allocation61_spill] sm:$0xff]  ;;  %v5781_v15 = vcombine.high %v10501_v3, %v10504_v54 }
 0x3fd   :  { %v6785_v59 = vsel %vm6778_vm2, %v6768_v11, %v12605_v29  ;;  %v6851_v47 = vsel %vm6846_vm6, %v6834_v44, %v12606_v46  ;;  %v10684_v17 = vsel %vm6914_vm10, %v6900_v53, %v6445_v33  ;;  %6594 = vrot.lane.b32.xlu1 %v5509_v41, %s7133_s20  ;;  %v12611_v14 = vcombine.low %v12609_v48, %v12610_v43  ;;  %v12613_v36 = vld [vmem:[#allocation184_spill] sm:$0xff]  ;;  %v12620_v11 = vld [vmem:[#allocation139_spill] sm:$0xff]  ;;  %v12624_v46 = vld [vmem:[#allocation293_spill] sm:$0xff] }
 0x3fe   :  { %v6802_v8 = vsel %vm6795_vm3, %v6785_v59, %v12607_v25  ;;  %v6868_v16 = vsel %vm6863_vm7, %v6851_v47, %v12608_v49  ;;  %v12614_v24 = vld [vmem:[#allocation188_spill] sm:$0xff]  ;;  %v12623_v59 = vld [vmem:[#allocation2_spill] sm:$0xff]  ;;  %v12625_v3 = vld [vmem:[#allocation297_spill] sm:$0xff] }
 0x3ff   :  { %6656 = vrot.lane.b32.xlu0 %v12611_v14, %s7134_s21  ;;  %v12615_v45 = vcombine.low %v12613_v36, %v12614_v24  ;;  %v6819_v22 = vsel %vm6812_vm4, %v6802_v8, %v12616_v32  ;;  %v12617_v60 = vld [vmem:[#allocation128_spill] sm:$0xff]  ;;  %v10710_v63 = vpop.permute.xlu1 %6386  ;;  %v6449_v21 = vpop.permute.xlu0 %6448  ;;  %v12626_v54 = vcombine.low %v12624_v46, %v12625_v3  ;;  %v12629_v8 = vld [vmem:[#allocation231_spill] sm:$0xff]  ;;  %v12632_v36 = vld [vmem:[#allocation134_spill] sm:$0xff] }
 0x400   :  { %v6885_v57 = vsel %vm6880_vm8, %v6868_v16, %v12617_v60  ;;  %v12618_v26 = vld [vmem:[#allocation12_spill] sm:$0xff]  ;;  %v6836_v55 = vsel %vm6829_vm5, %v6819_v22, %v12619_v61  ;;  %v12631_v14 = vld [vmem:[#allocation159_spill] sm:$0xff] }
 0x401   :  { %v6753_v6 = vsel %vm6744_vm0, %v12615_v45, %v12612_v5  ;;  %v6902_v51 = vsel %vm6897_vm9, %v6885_v57, %v10510_v13  ;;  %v12621_v44 = vld [vmem:[#allocation40_spill] sm:$0xff]  ;;  %6598 = vrot.lane.b32.xlu1 %v5781_v15, %s7133_s20  ;;  %v12633_v45 = vld [vmem:[#allocation6_spill] sm:$0xff]  ;;  %v12634_v32 = vld [vmem:[#allocation103_spill] sm:$0xff] }
 0x402   :  { %v6770_v18 = vsel %vm6761_vm1, %v6753_v6, %v12618_v26  ;;  %v6853_v53 = vsel %vm6846_vm6, %v6836_v55, %v12621_v44  ;;  %v10719_v33 = vsel %vm6914_vm10, %v6902_v51, %v6449_v21  ;;  %v12622_v41 = vld [vmem:[#allocation32_spill] sm:$0xff]  ;;  %v12636_v55 = vld [vmem:[#allocation82_spill] sm:$0xff] }
 0x403   :  { %v6787_v2 = vsel %vm6778_vm2, %v6770_v18, %v12620_v11  ;;  %v6870_v13 = vsel %vm6863_vm7, %v6853_v53, %v12623_v59  ;;  %6660 = vrot.lane.b32.xlu0 %v12626_v54, %s7134_s21  ;;  %v12627_v47 = vld [vmem:[#allocation80_spill] sm:$0xff]  ;;  %v10745_v57 = vpop.permute.xlu1 %6390  ;;  %v6453_v26 = vpop.permute.xlu0 %6452  ;;  %v12635_v18 = vld [vmem:[#allocation133_spill] sm:$0xff]  ;;  %v12637_v15 = vld [vmem:[#allocation26_spill] sm:$0xff] }
 0x404   :  { %v6804_v29 = vsel %vm6795_vm3, %v6787_v2, %v12622_v41  ;;  %v12628_v25 = vld [vmem:[#allocation228_spill] sm:$0xff]  ;;  %v6887_v24 = vsel %vm6880_vm8, %v6870_v13, %v12632_v36  ;;  %v12640_v53 = vld [vmem:[#allocation43_spill] sm:$0xff]  ;;  %v12643_v59 = vld [vmem:[#allocation122_spill] sm:$0xff] }
 0x405   :  { %v12630_v49 = vcombine.low %v12628_v25, %v12629_v8  ;;  %v6821_v5 = vsel %vm6812_vm4, %v6804_v29, %v12631_v14  ;;  %v6904_v60 = vsel %vm6897_vm9, %v6887_v24, %v10520_v1  ;;  %v12638_v2 = vld [vmem:[#allocation280_spill] sm:$0xff]  ;;  %v12639_v1 = vld [vmem:[#allocation42_spill] sm:$0xff]  ;;  %v12642_v29 = vcombine.high %v12564_v35, %v12565_v27  ;;  %v12645_v54 = vld [vmem:[#allocation265_spill] sm:$0xff] }
 0x406   :  { %v6838_v22 = vsel %vm6829_vm5, %v6821_v5, %v12634_v32  ;;  %v10752_v21 = vsel %vm6914_vm10, %v6904_v60, %v6453_v26  ;;  %v12641_v41 = vcombine.low %v12639_v1, %v12640_v53  ;;  %v12644_v13 = vld [vmem:[#allocation262_spill] sm:$0xff]  ;;  %v12647_v8 = vld [vmem:[#allocation153_spill] sm:$0xff]  ;;  %v12652_v60 = vld [vmem:[#allocation124_spill] sm:$0xff] }
 0x407   :  { %v6755_v16 = vsel %vm6744_vm0, %v12630_v49, %v12627_v47  ;;  %v6855_v51 = vsel %vm6846_vm6, %v6838_v22, %v12636_v55  ;;  %6696 = vrot.lane.b32.xlu0 %v12642_v29, %s7135_s22  ;;  %v12646_v47 = vcombine.low %v12644_v13, %v12645_v54  ;;  %v12649_v5 = vld [vmem:[#allocation54_spill] sm:$0xff]  ;;  %v10781_v27 = vpop.permute.xlu1 %6394  ;;  %v12661_v54 = vld [vmem:[#allocation55_spill] sm:$0xff] }
 0x408   :  { %v6772_v6 = vsel %vm6761_vm1, %v6755_v16, %v12633_v45  ;;  %v6872_v44 = vsel %vm6863_vm7, %v6855_v51, %v12638_v2  ;;  %6634 = vrot.lane.b32.xlu1 %v12641_v41, %s7134_s21  ;;  %v12648_v16 = vld [vmem:[#allocation171_spill] sm:$0xff]  ;;  %v12650_v24 = vld [vmem:[#allocation146_spill] sm:$0xff]  ;;  %v12654_v51 = vld [vmem:[#allocation44_spill] sm:$0xff] }
 0x409   :  { %v6789_v61 = vsel %vm6778_vm2, %v6772_v6, %v12635_v18  ;;  %v6757_v25 = vsel %vm6744_vm0, %v12646_v47, %v12643_v59  ;;  %v6889_v14 = vsel %vm6880_vm8, %v6872_v44, %v12648_v16  ;;  %v6457_v6 = vpop.permute.xlu0 %6456  ;;  %v12651_v32 = vld [vmem:[#allocation182_spill] sm:$0xff]  ;;  %v12658_v44 = vcombine.high %v12568_v40, %v12569_v7  ;;  %v12659_v41 = vld [vmem:[#allocation203_spill] sm:$0xff]  ;;  %v12660_v59 = vld [vmem:[#allocation177_spill] sm:$0xff] }
 0x40a   :  { %v6806_v11 = vsel %vm6795_vm3, %v6789_v61, %v12637_v15  ;;  %v6774_v36 = vsel %vm6761_vm1, %v6757_v25, %v12649_v5  ;;  %v6906_v35 = vsel %vm6897_vm9, %v6889_v14, %v10531_v4  ;;  %v12653_v61 = vld [vmem:[#allocation74_spill] sm:$0xff]  ;;  %v12655_v4 = vld [vmem:[#allocation84_spill] sm:$0xff]  ;;  %v12662_v47 = vld [vmem:[#allocation185_spill] sm:$0xff] }
 0x40b   :  { %v6823_v49 = vsel %vm6812_vm4, %v6806_v11, %v12647_v8  ;;  %v6791_v22 = vsel %vm6778_vm2, %v6774_v36, %v12651_v32  ;;  %v10788_v18 = vsel %vm6914_vm10, %v6906_v35, %v6457_v6  ;;  %v12656_v11 = vld [vmem:[#allocation85_spill] sm:$0xff]  ;;  %6700 = vrot.lane.b32.xlu0 %v12658_v44, %s7135_s22  ;;  %v12665_v16 = vld [vmem:[#allocation192_spill] sm:$0xff]  ;;  %v10815_v40 = vpop.permute.xlu1 %6398  ;;  %v12668_v32 = vld [vmem:[#allocation75_spill] sm:$0xff] }
 0x40c   :  { %v6840_v45 = vsel %vm6829_vm5, %v6823_v49, %v12650_v24  ;;  %v6808_v55 = vsel %vm6795_vm3, %v6791_v22, %v12653_v61  ;;  %v12657_v2 = vcombine.low %v12655_v4, %v12656_v11  ;;  %v12663_v25 = vld [vmem:[#allocation189_spill] sm:$0xff]  ;;  %v12671_v61 = vld [vmem:[#allocation127_spill] sm:$0xff] }
 0x40d   :  { %v6857_v26 = vsel %vm6846_vm6, %v6840_v45, %v12652_v60  ;;  %v6825_v29 = vsel %vm6812_vm4, %v6808_v55, %v12659_v41  ;;  %v12664_v8 = vcombine.low %v12662_v47, %v12663_v25  ;;  %v6461_v7 = vpop.permute.xlu0 %6460  ;;  %v12666_v36 = vld [vmem:[#allocation181_spill] sm:$0xff]  ;;  %v12667_v45 = vld [vmem:[#allocation167_spill] sm:$0xff]  ;;  %v12669_v60 = vld [vmem:[#allocation50_spill] sm:$0xff] }
 0x40e   :  { %v6874_v15 = vsel %vm6863_vm7, %v6857_v26, %v12654_v51  ;;  %6638 = vrot.lane.b32.xlu1 %v12657_v2, %s7134_s21  ;;  %v6842_v14 = vsel %vm6829_vm5, %v6825_v29, %v12665_v16  ;;  %v12673_v51 = vcombine.high %v12575_v39, %v12576_v31  ;;  %v12675_v2 = vld [vmem:[#allocation35_spill] sm:$0xff]  ;;  %v12676_v44 = vld [vmem:[#allocation37_spill] sm:$0xff]  ;;  %v12680_v25 = vld [vmem:[#allocation48_spill] sm:$0xff] }
 0x40f   :  { %v6891_v13 = vsel %vm6880_vm8, %v6874_v15, %v12660_v59  ;;  %v6760_v49 = vsel %vm6744_vm0, %v12664_v8, %v12661_v54  ;;  %v6859_v35 = vsel %vm6846_vm6, %v6842_v14, %v12667_v45  ;;  %v12674_v15 = vld [vmem:[#allocation81_spill] sm:$0xff]  ;;  %v12677_v41 = vcombine.low %v12675_v2, %v12676_v44  ;;  %v12678_v59 = vld [vmem:[#allocation198_spill] sm:$0xff]  ;;  %v12679_v54 = vld [vmem:[#allocation215_spill] sm:$0xff]  ;;  %v10851_v31 = vpop.permute.xlu1 %6402 }
 0x410   :  { %v6908_v5 = vsel %vm6897_vm9, %v6891_v13, %v10547_v19  ;;  %v6777_v24 = vsel %vm6761_vm1, %v6760_v49, %v12666_v36  ;;  %v6876_v26 = vsel %vm6863_vm7, %v6859_v35, %v12669_v60  ;;  %v12670_v19 = vld [vmem:[#allocation126_spill] sm:$0xff]  ;;  %6704 = vrot.lane.b32.xlu0 %v12673_v51, %s7135_s22  ;;  %v12684_v35 = vld [vmem:[#allocation68_spill] sm:$0xff]  ;;  %v12689_v51 = vcombine.high %v12581_v10, %v12582_v58  ;;  %v12691_v2 = vld [vmem:[#allocation77_spill] sm:$0xff] }
 0x411   :  { %v10822_v6 = vsel %vm6914_vm10, %v6908_v5, %v6461_v7  ;;  %v6794_v22 = vsel %vm6778_vm2, %v6777_v24, %v12668_v32  ;;  %v12672_v55 = vcombine.low %v12670_v19, %v12671_v61  ;;  %v6746_v29 = vsel %vm6744_vm0, %v12677_v41, %v12674_v15  ;;  %v12681_v49 = vld [vmem:[#allocation190_spill] sm:$0xff]  ;;  %v6465_v14 = vpop.permute.xlu0 %6464  ;;  %v12682_v5 = vld [vmem:[#allocation176_spill] sm:$0xff]  ;;  %v12690_v15 = vld [vmem:[#allocation123_spill] sm:$0xff] }
 0x412   :  { %v6811_v13 = vsel %vm6795_vm3, %v6794_v22, %v12678_v59  ;;  %v6893_v47 = vsel %vm6880_vm8, %v6876_v26, %v12679_v54  ;;  %v6763_v8 = vsel %vm6761_vm1, %v6746_v29, %v12680_v25  ;;  %v12683_v36 = vld [vmem:[#allocation214_spill] sm:$0xff]  ;;  %v12685_v22 = vld [vmem:[#allocation88_spill] sm:$0xff]  ;;  %v12692_v44 = vld [vmem:[#allocation79_spill] sm:$0xff] }
 0x413   :  { %6642 = vrot.lane.b32.xlu1 %v12672_v55, %s7134_s21  ;;  %v6828_v16 = vsel %vm6812_vm4, %v6811_v13, %v12681_v49  ;;  %v6910_v39 = vsel %vm6897_vm9, %v6893_v47, %v10573_v12  ;;  %v6780_v7 = vsel %vm6778_vm2, %v6763_v8, %v12682_v5  ;;  %v12686_v12 = vld [vmem:[#allocation169_spill] sm:$0xff]  ;;  %v12687_v26 = vld [vmem:[#allocation170_spill] sm:$0xff]  ;;  %v12693_v41 = vcombine.low %v12691_v2, %v12692_v44  ;;  %v12695_v54 = vld [vmem:[#allocation223_spill] sm:$0xff]  ;;  %v6407_v58 = vpop.permute.xlu1 %6406 }
 0x414   :  { %v6845_v24 = vsel %vm6829_vm5, %v6828_v16, %v12683_v36  ;;  %v10858_v45 = vsel %vm6914_vm10, %v6910_v39, %v6465_v14  ;;  %v6797_v32 = vsel %vm6795_vm3, %v6780_v7, %v12684_v35  ;;  %v12688_v55 = vcombine.low %v12686_v12, %v12687_v26  ;;  %6708 = vrot.lane.b32.xlu0 %v12689_v51, %s7135_s22  ;;  %v12694_v59 = vld [vmem:[#allocation197_spill] sm:$0xff]  ;;  %v12697_v49 = vld [vmem:[#allocation234_spill] sm:$0xff]  ;;  %v12698_v14 = vld [vmem:[#allocation175_spill] sm:$0xff] }
 0x415   :  { %v6862_v60 = vsel %vm6846_vm6, %v6845_v24, %v12685_v22  ;;  %v6748_v29 = vsel %vm6744_vm0, %v12693_v41, %v12690_v15  ;;  %v6814_v13 = vsel %vm6812_vm4, %v6797_v32, %v12694_v59  ;;  %v12696_v25 = vld [vmem:[#allocation49_spill] sm:$0xff]  ;;  %v6469_v39 = vpop.permute.xlu0 %6468  ;;  %v12699_v7 = vld [vmem:[#allocation212_spill] sm:$0xff]  ;;  %v12705_v2 = vcombine.high %v12587_v62, %v12588_v0 }
 0x416   :  { %v6879_v47 = vsel %vm6863_vm7, %v6862_v60, %v12695_v54  ;;  %v6765_v8 = vsel %vm6761_vm1, %v6748_v29, %v12696_v25  ;;  %v6831_v16 = vsel %vm6829_vm5, %v6814_v13, %v12697_v49  ;;  %v10896_v35 = vsel %vm6914_vm10, %v10614_v34, %v6469_v39  ;;  %v12700_v32 = vld [vmem:[#allocation69_spill] sm:$0xff]  ;;  %v12701_v60 = vld [vmem:[#allocation86_spill] sm:$0xff]  ;;  %v12707_v34 = vld [vmem:[#allocation119_spill] sm:$0xff] }
 0x417   :  { %6646 = vrot.lane.b32.xlu1 %v12688_v55, %s7134_s21  ;;  %v6896_v10 = vsel %vm6880_vm8, %v6879_v47, %v10607_v52  ;;  %v6782_v5 = vsel %vm6778_vm2, %v6765_v8, %v12698_v14  ;;  %v6848_v36 = vsel %vm6846_vm6, %v6831_v16, %v12699_v7  ;;  %v12702_v55 = vld [vmem:[#allocation209_spill] sm:$0xff]  ;;  %v12710_v13 = vld [vmem:[#allocation240_spill] sm:$0xff]  ;;  %v6443_v16 = vpop.permute.xlu1 %6442  ;;  %v12714_v14 = vld [vmem:[#allocation250_spill] sm:$0xff] }
 0x418   :  { %v10892_v24 = vsel %vm6897_vm9, %v6896_v10, %v6407_v58  ;;  %v6799_v22 = vsel %vm6795_vm3, %v6782_v5, %v12700_v32  ;;  %v6865_v52 = vsel %vm6863_vm7, %v6848_v36, %v12701_v60  ;;  %v12703_v51 = vld [vmem:[#allocation213_spill] sm:$0xff]  ;;  %6712 = vrot.lane.b32.xlu0 %v12705_v2, %s7135_s22  ;;  %v12712_v49 = vld [vmem:[#allocation232_spill] sm:$0xff]  ;;  %v12713_v58 = vld [vmem:[#allocation226_spill] sm:$0xff]  ;;  %v12720_v2 = vcombine.high %v12594_v23, %v12595_v38 }
 0x419   :  { %v12704_v15 = vcombine.low %v12702_v55, %v12703_v51  ;;  %v12706_v44 = vld [vmem:[#allocation165_spill] sm:$0xff]  ;;  %v6816_v54 = vsel %vm6812_vm4, %v6799_v22, %v12710_v13  ;;  %v6882_v47 = vsel %vm6880_vm8, %v6865_v52, %v10480_v42  ;;  %v6505_v10 = vpop.permute.xlu0 %6504  ;;  %v12716_v22 = vld [vmem:[#allocation94_spill] sm:$0xff]  ;;  %v12717_v60 = vld [vmem:[#allocation251_spill] sm:$0xff] }
 0x41a   :  { %v12708_v41 = vld [vmem:[#allocation121_spill] sm:$0xff]  ;;  %v6833_v62 = vsel %vm6829_vm5, %v6816_v54, %v12712_v49  ;;  %v6899_v0 = vsel %vm6897_vm9, %v6882_v47, %v10640_v56  ;;  %v10934_v42 = vsel %vm6931_vm11, %v10649_v28, %v6505_v10  ;;  %v12718_v52 = vld [vmem:[#allocation252_spill] sm:$0xff]  ;;  %v12729_v10 = vld [vmem:[#allocation10_spill] sm:$0xff] }
 0x41b   :  { %6650 = vrot.lane.b32.xlu1 %v12704_v15, %s7134_s21  ;;  %v12709_v29 = vcombine.low %v12707_v34, %v12708_v41  ;;  %v12711_v25 = vld [vmem:[#allocation97_spill] sm:$0xff]  ;;  %v6850_v5 = vsel %vm6846_vm6, %v6833_v62, %v12714_v14  ;;  %v10930_v7 = vsel %vm6914_vm10, %v6899_v0, %v6443_v16  ;;  %v12719_v15 = vcombine.low %v12717_v60, %v12718_v52  ;;  %v12722_v34 = vld [vmem:[#allocation162_spill] sm:$0xff]  ;;  %v12723_v28 = vld [vmem:[#allocation164_spill] sm:$0xff]  ;;  %v6447_v38 = vpop.permute.xlu1 %6446 }
 0x41c   :  { %v12715_v36 = vld [vmem:[#allocation117_spill] sm:$0xff]  ;;  %v6867_v56 = vsel %vm6863_vm7, %v6850_v5, %v12716_v22  ;;  %6716 = vrot.lane.b32.xlu0 %v12720_v2, %s7135_s22  ;;  %v12724_v41 = vcombine.low %v12722_v34, %v12723_v28  ;;  %v12726_v47 = vld [vmem:[#allocation96_spill] sm:$0xff]  ;;  %v12730_v14 = vld [vmem:[#allocation111_spill] sm:$0xff] }
 0x41d   :  { %v6750_v59 = vsel %vm6744_vm0, %v12709_v29, %v12706_v44  ;;  %v12721_v44 = vld [vmem:[#allocation166_spill] sm:$0xff]  ;;  %v6884_v54 = vsel %vm6880_vm8, %v6867_v56, %v10492_v9  ;;  %v6509_v62 = vpop.permute.xlu0 %6508  ;;  %v12728_v0 = vld [vmem:[#allocation225_spill] sm:$0xff]  ;;  %v12736_v2 = vld [vmem:[#allocation211_spill] sm:$0xff] }
 0x41e   :  { %v6767_v8 = vsel %vm6761_vm1, %v6750_v59, %v12711_v25  ;;  %v6752_v29 = vsel %vm6744_vm0, %v12724_v41, %v12721_v44  ;;  %v12725_v59 = vld [vmem:[#allocation239_spill] sm:$0xff]  ;;  %v6901_v23 = vsel %vm6897_vm9, %v6884_v54, %v10675_v20  ;;  %v10972_v9 = vsel %vm6931_vm11, %v10684_v17, %v6509_v62  ;;  %v12733_v22 = vld [vmem:[#allocation281_spill] sm:$0xff]  ;;  %v12737_v44 = vld [vmem:[#allocation206_spill] sm:$0xff] }
 0x41f   :  { %v6784_v39 = vsel %vm6778_vm2, %v6767_v8, %v12713_v58  ;;  %6654 = vrot.lane.b32.xlu1 %v12719_v15, %s7134_s21  ;;  %v6769_v25 = vsel %vm6761_vm1, %v6752_v29, %v12726_v47  ;;  %v12727_v8 = vld [vmem:[#allocation298_spill] sm:$0xff]  ;;  %v12735_v15 = vcombine.high %v12609_v48, %v12610_v43  ;;  %v12742_v47 = vld [vmem:[#allocation41_spill] sm:$0xff]  ;;  %v6451_v43 = vpop.permute.xlu1 %6450 }
 0x420   :  { %v6801_v32 = vsel %vm6795_vm3, %v6784_v39, %v12715_v36  ;;  %v6786_v16 = vsel %vm6778_vm2, %v6769_v25, %v12728_v0  ;;  %v10968_v39 = vsel %vm6914_vm10, %v6901_v23, %v6447_v38  ;;  %v12731_v36 = vld [vmem:[#allocation130_spill] sm:$0xff]  ;;  %v12744_v38 = vld [vmem:[#allocation4_spill] sm:$0xff] }
 0x421   :  { %v6818_v13 = vsel %vm6812_vm4, %v6801_v32, %v12725_v59  ;;  %v6803_v5 = vsel %vm6795_vm3, %v6786_v16, %v12730_v14  ;;  %v12732_v32 = vld [vmem:[#allocation278_spill] sm:$0xff]  ;;  %6720 = vrot.lane.b32.xlu0 %v12735_v15, %s7135_s22  ;;  %v12745_v16 = vld [vmem:[#allocation160_spill] sm:$0xff]  ;;  %v12747_v14 = vld [vmem:[#allocation303_spill] sm:$0xff] }
 0x422   :  { %v6835_v49 = vsel %vm6829_vm5, %v6818_v13, %v12727_v8  ;;  %v12734_v56 = vcombine.low %v12732_v32, %v12733_v22  ;;  %v12738_v17 = vld [vmem:[#allocation210_spill] sm:$0xff]  ;;  %v6513_v8 = vpop.permute.xlu0 %6512 }
 0x423   :  { %v6852_v58 = vsel %vm6846_vm6, %v6835_v49, %v12729_v10  ;;  %v12739_v34 = vcombine.low %v12737_v44, %v12738_v17  ;;  %v12740_v41 = vld [vmem:[#allocation18_spill] sm:$0xff]  ;;  %v12743_v49 = vld [vmem:[#allocation219_spill] sm:$0xff]  ;;  %v12755_v17 = vld [vmem:[#allocation60_spill] sm:$0xff] }
 0x424   :  { %v6869_v20 = vsel %vm6863_vm7, %v6852_v58, %v12731_v36  ;;  %6658 = vrot.lane.b32.xlu1 %v12734_v56, %s7134_s21  ;;  %v6820_v29 = vsel %vm6812_vm4, %v6803_v5, %v12740_v41  ;;  %v12741_v13 = vld [vmem:[#allocation90_spill] sm:$0xff]  ;;  %v12746_v58 = vld [vmem:[#allocation136_spill] sm:$0xff]  ;;  %v12751_v56 = vld [vmem:[#allocation13_spill] sm:$0xff] }
 0x425   :  { %v6754_v28 = vsel %vm6744_vm0, %v12739_v34, %v12736_v2  ;;  %v6886_v59 = vsel %vm6880_vm8, %v6869_v20, %v10508_v37  ;;  %v6837_v25 = vsel %vm6829_vm5, %v6820_v29, %v12742_v47  ;;  %v11010_v37 = vsel %vm6931_vm11, %v10719_v33, %v6513_v8  ;;  %v12748_v5 = vld [vmem:[#allocation304_spill] sm:$0xff]  ;;  %v12752_v15 = vld [vmem:[#allocation246_spill] sm:$0xff]  ;;  %v12758_v47 = vld [vmem:[#allocation33_spill] sm:$0xff] }
 0x426   :  { %v6771_v54 = vsel %vm6761_vm1, %v6754_v28, %v12741_v13  ;;  %v6903_v48 = vsel %vm6897_vm9, %v6886_v59, %v10710_v63  ;;  %v6854_v62 = vsel %vm6846_vm6, %v6837_v25, %v12744_v38  ;;  %v12749_v36 = vcombine.low %v12747_v14, %v12748_v5  ;;  %v12753_v33 = vld [vmem:[#allocation248_spill] sm:$0xff]  ;;  %v12756_v41 = vld [vmem:[#allocation138_spill] sm:$0xff]  ;;  %v12757_v59 = vld [vmem:[#allocation83_spill] sm:$0xff] }
 0x427   :  { %v6788_v23 = vsel %vm6778_vm2, %v6771_v54, %v12743_v49  ;;  %v11006_v0 = vsel %vm6914_vm10, %v6903_v48, %v6451_v43  ;;  %v6871_v63 = vsel %vm6863_vm7, %v6854_v62, %v12746_v58  ;;  %v12750_v20 = vcombine.high %v12624_v46, %v12625_v3  ;;  %v6455_v3 = vpop.permute.xlu1 %6454  ;;  %v6517_v54 = vpop.permute.xlu0 %6516  ;;  %v12759_v48 = vld [vmem:[#allocation282_spill] sm:$0xff]  ;;  %v12761_v38 = vld [vmem:[#allocation173_spill] sm:$0xff]  ;;  %v12765_v58 = vld [vmem:[#allocation279_spill] sm:$0xff] }
 0x428   :  { %v6805_v10 = vsel %vm6795_vm3, %v6788_v23, %v12745_v16  ;;  %6662 = vrot.lane.b32.xlu1 %v12749_v36, %s7134_s21  ;;  %v12754_v2 = vcombine.low %v12752_v15, %v12753_v33  ;;  %v6888_v28 = vsel %vm6880_vm8, %v6871_v63, %v10518_v50  ;;  %v11046_v50 = vsel %vm6931_vm11, %v10752_v21, %v6517_v54  ;;  %v12760_v49 = vld [vmem:[#allocation154_spill] sm:$0xff]  ;;  %v12763_v16 = vld [vmem:[#allocation7_spill] sm:$0xff]  ;;  %v12769_v33 = vld [vmem:[#allocation132_spill] sm:$0xff] }
 0x429   :  { %6724 = vrot.lane.b32.xlu0 %v12750_v20, %s7135_s22  ;;  %v6822_v34 = vsel %vm6812_vm4, %v6805_v10, %v12755_v17  ;;  %v6905_v46 = vsel %vm6897_vm9, %v6888_v28, %v10745_v57  ;;  %v12762_v62 = vcombine.high %v12639_v1, %v12640_v53  ;;  %v12764_v10 = vld [vmem:[#allocation276_spill] sm:$0xff]  ;;  %v12767_v20 = vld [vmem:[#allocation102_spill] sm:$0xff]  ;;  %v12771_v28 = vld [vmem:[#allocation27_spill] sm:$0xff] }
 0x42a   :  { %v6756_v44 = vsel %vm6744_vm0, %v12754_v2, %v12751_v56  ;;  %v6839_v13 = vsel %vm6829_vm5, %v6822_v34, %v12757_v59  ;;  %v6922_v8 = vsel %vm6914_vm10, %v6905_v46, %v6455_v3  ;;  %v12766_v63 = vcombine.low %v12764_v10, %v12765_v58  ;;  %v12768_v56 = vld [vmem:[#allocation221_spill] sm:$0xff]  ;;  %v12773_v3 = vld [vmem:[#allocation204_spill] sm:$0xff] }
 0x42b   :  { %v6773_v29 = vsel %vm6761_vm1, %v6756_v44, %v12756_v41  ;;  %v6856_v43 = vsel %vm6846_vm6, %v6839_v13, %v12759_v48  ;;  %v12770_v44 = vld [vmem:[#allocation125_spill] sm:$0xff]  ;;  %v6459_v53 = vpop.permute.xlu1 %6458  ;;  %v6521_v34 = vpop.permute.xlu0 %6520  ;;  %v12779_v10 = vld [vmem:[#allocation52_spill] sm:$0xff] }
 0x42c   :  { %v6790_v25 = vsel %vm6778_vm2, %v6773_v29, %v12758_v47  ;;  %v6873_v57 = vsel %vm6863_vm7, %v6856_v43, %v12761_v38  ;;  %6698 = vrot.lane.b32.xlu1 %v12762_v62, %s7135_s22  ;;  %v6758_v36 = vsel %vm6744_vm0, %v12766_v63, %v12763_v16  ;;  %v12772_v29 = vld [vmem:[#allocation46_spill] sm:$0xff]  ;;  %v11078_v46 = vsel %vm6931_vm11, %v10788_v18, %v6521_v34  ;;  %v12774_v47 = vld [vmem:[#allocation179_spill] sm:$0xff]  ;;  %v12776_v48 = vld [vmem:[#allocation145_spill] sm:$0xff] }
 0x42d   :  { %v6807_v23 = vsel %vm6795_vm3, %v6790_v25, %v12760_v49  ;;  %v6890_v15 = vsel %vm6880_vm8, %v6873_v57, %v12768_v56  ;;  %v6775_v2 = vsel %vm6761_vm1, %v6758_v36, %v12769_v33  ;;  %v12775_v25 = vcombine.high %v12655_v4, %v12656_v11  ;;  %v12777_v49 = vld [vmem:[#allocation255_spill] sm:$0xff]  ;;  %v12778_v38 = vld [vmem:[#allocation168_spill] sm:$0xff]  ;;  %v12780_v63 = vld [vmem:[#allocation217_spill] sm:$0xff] }
 0x42e   :  { %v6824_v21 = vsel %vm6812_vm4, %v6807_v23, %v12767_v20  ;;  %v6907_v1 = vsel %vm6897_vm9, %v6890_v15, %v10781_v27  ;;  %v6792_v41 = vsel %vm6778_vm2, %v6775_v2, %v12771_v28  ;;  %v12781_v20 = vcombine.high %v12670_v19, %v12671_v61 }
 0x42f   :  { %v6841_v17 = vsel %vm6829_vm5, %v6824_v21, %v12770_v44  ;;  %v6924_v13 = vsel %vm6914_vm10, %v6907_v1, %v6459_v53  ;;  %v6809_v54 = vsel %vm6795_vm3, %v6792_v41, %v12773_v3  ;;  %v6463_v62 = vpop.permute.xlu1 %6462  ;;  %v6525_v16 = vpop.permute.xlu0 %6524  ;;  %v12782_v2 = vcombine.high %v12686_v12, %v12687_v26 }
 0x430   :  { %v6858_v59 = vsel %vm6846_vm6, %v6841_v17, %v12772_v29  ;;  %6702 = vrot.lane.b32.xlu1 %v12775_v25, %s7135_s22  ;;  %v6826_v43 = vsel %vm6812_vm4, %v6809_v54, %v12776_v48  ;;  %v11101_v11 = vsel %vm6931_vm11, %v10822_v6, %v6525_v16  ;;  %v12783_v44 = vcombine.high %v12702_v55, %v12703_v51 }
 0x431   :  { %v6875_v27 = vsel %vm6863_vm7, %v6858_v59, %v12774_v47  ;;  %v6843_v18 = vsel %vm6829_vm5, %v6826_v43, %v12778_v38  ;;  %v12784_v26 = vcombine.high %v12717_v60, %v12718_v52  ;;  %v12785_v55 = vcombine.high %v12732_v32, %v12733_v22 }
 0x432   :  { %v6892_v23 = vsel %vm6880_vm8, %v6875_v27, %v12777_v49  ;;  %v6860_v58 = vsel %vm6846_vm6, %v6843_v18, %v12779_v10  ;;  %v12786_v60 = vcombine.high %v12747_v14, %v12748_v5  ;;  %vm7080_vm0 = vcmask 523264  }
 0x433   :  { %v6909_v57 = vsel %vm6897_vm9, %v6892_v23, %v10815_v40  ;;  %v6877_v36 = vsel %vm6863_vm7, %v6860_v58, %v12780_v63  ;;  %v6467_v56 = vpop.permute.xlu1 %6466  ;;  %v6529_v15 = vpop.permute.xlu0 %6528 }
 0x434   :  { %v6926_v4 = vsel %vm6914_vm10, %v6909_v57, %v6463_v62  ;;  %6706 = vrot.lane.b32.xlu1 %v12781_v20, %s7135_s22  ;;  %v6894_v40 = vsel %vm6880_vm8, %v6877_v36, %v10571_v30  ;;  %v11116_v6 = vsel %vm6931_vm11, %v10858_v45, %v6529_v15 }
 0x435   :  { %v6911_v21 = vsel %vm6897_vm9, %v6894_v40, %v10851_v31 }
 0x436   :  { %v6928_v33 = vsel %vm6914_vm10, %v6911_v21, %v6467_v56 }
 0x437   :  { %v6471_v19 = vpop.permute.xlu1 %6470  ;;  %v6533_v61 = vpop.permute.xlu0 %6532 }
 0x438   :  { %6710 = vrot.lane.b32.xlu1 %v12782_v2, %s7135_s22  ;;  %v6930_v30 = vsel %vm6914_vm10, %v10892_v24, %v6471_v19  ;;  %v11126_v31 = vsel %vm6931_vm11, %v10896_v35, %v6533_v61 }
 0x43b   :  { %v6507_v45 = vpop.permute.xlu1 %6506  ;;  %v6569_v17 = vpop.permute.xlu0 %6568 }
 0x43c   :  { %6714 = vrot.lane.b32.xlu1 %v12783_v44, %s7135_s22  ;;  %v11134_v12 = vsel %vm6931_vm11, %v10930_v7, %v6507_v45  ;;  %v6949_v63 = vsel %vm6948_vm12, %v10934_v42, %v6569_v17 }
 0x43f   :  { %v6511_v24 = vpop.permute.xlu1 %6510  ;;  %v6573_v1 = vpop.permute.xlu0 %6572 }
 0x440   :  { %6718 = vrot.lane.b32.xlu1 %v12784_v26, %s7135_s22  ;;  %v11142_v35 = vsel %vm6931_vm11, %v10968_v39, %v6511_v24  ;;  %v6951_v56 = vsel %vm6948_vm12, %v10972_v9, %v6573_v1 }
 0x443   :  { %v6515_v51 = vpop.permute.xlu1 %6514  ;;  %v6577_v53 = vpop.permute.xlu0 %6576 }
 0x444   :  { %6722 = vrot.lane.b32.xlu1 %v12785_v55, %s7135_s22  ;;  %v11150_v7 = vsel %vm6931_vm11, %v11006_v0, %v6515_v51  ;;  %v6953_v19 = vsel %vm6948_vm12, %v11010_v37, %v6577_v53 }
 0x447   :  { %v6519_v52 = vpop.permute.xlu1 %6518  ;;  %v6581_v34 = vpop.permute.xlu0 %6580 }
 0x448   :  { %6726 = vrot.lane.b32.xlu1 %v12786_v60, %s7135_s22  ;;  %v11157_v39 = vsel %vm6931_vm11, %v6922_v8, %v6519_v52  ;;  %v6955_v9 = vsel %vm6948_vm12, %v11046_v50, %v6581_v34 }
 0x44b   :  { %v6523_v28 = vpop.permute.xlu1 %6522  ;;  %v6585_v41 = vpop.permute.xlu0 %6584 }
 0x44c   :  { %v11160_v32 = vsel %vm6931_vm11, %v6924_v13, %v6523_v28  ;;  %v6957_v37 = vsel %vm6948_vm12, %v11078_v46, %v6585_v41 }
 0x44f   :  { %v6527_v22 = vpop.permute.xlu1 %6526  ;;  %v6589_v29 = vpop.permute.xlu0 %6588 }
 0x450   :  { %v11163_v0 = vsel %vm6931_vm11, %v6926_v4, %v6527_v22  ;;  %v6959_v50 = vsel %vm6948_vm12, %v11101_v11, %v6589_v29 }
 0x453   :  { %v6531_v59 = vpop.permute.xlu1 %6530  ;;  %v6593_v3 = vpop.permute.xlu0 %6592 }
 0x454   :  { %v11166_v14 = vsel %vm6931_vm11, %v6928_v33, %v6531_v59  ;;  %v6961_v46 = vsel %vm6948_vm12, %v11116_v6, %v6593_v3 }
 0x457   :  { %v6535_v5 = vpop.permute.xlu1 %6534  ;;  %v11168_v54 = vpop.permute.xlu0 %6596 }
 0x458   :  { %v11171_v8 = vsel %vm6931_vm11, %v6930_v30, %v6535_v5  ;;  %v6963_v11 = vsel %vm6948_vm12, %v11126_v31, %v11168_v54 }
 0x45b   :  { %v11173_v47 = vpop.permute.xlu1 %6570  ;;  %v6633_v13 = vpop.permute.xlu0 %6632 }
 0x45c   :  { %v6966_v36 = vsel %vm6965_vm13, %v6949_v63, %v6633_v13  ;;  %v6950_v3 = vsel %vm6948_vm12, %v11134_v12, %v11173_v47 }
 0x45f   :  { %v11175_v27 = vpop.permute.xlu1 %6574  ;;  %v6637_v25 = vpop.permute.xlu0 %6636 }
 0x460   :  { %v6968_v15 = vsel %vm6965_vm13, %v6951_v56, %v6637_v25  ;;  %v6952_v31 = vsel %vm6948_vm12, %v11142_v35, %v11175_v27 }
 0x463   :  { %v11177_v48 = vpop.permute.xlu1 %6578  ;;  %v6641_v43 = vpop.permute.xlu0 %6640 }
 0x464   :  { %v6970_v61 = vsel %vm6965_vm13, %v6953_v19, %v6641_v43  ;;  %v6954_v12 = vsel %vm6948_vm12, %v11150_v7, %v11177_v48 }
 0x467   :  { %v11179_v49 = vpop.permute.xlu1 %6582  ;;  %v6645_v23 = vpop.permute.xlu0 %6644 }
 0x468   :  { %v6972_v17 = vsel %vm6965_vm13, %v6955_v9, %v6645_v23  ;;  %v6956_v35 = vsel %vm6948_vm12, %v11157_v39, %v11179_v49 }
 0x46b   :  { %v11181_v38 = vpop.permute.xlu1 %6586  ;;  %v6649_v18 = vpop.permute.xlu0 %6648 }
 0x46c   :  { %v6974_v55 = vsel %vm6965_vm13, %v6957_v37, %v6649_v18  ;;  %v6958_v7 = vsel %vm6948_vm12, %v11160_v32, %v11181_v38 }
 0x46f   :  { %v11183_v57 = vpop.permute.xlu1 %6590  ;;  %v6653_v62 = vpop.permute.xlu0 %6652 }
 0x470   :  { %v6976_v52 = vsel %vm6965_vm13, %v6959_v50, %v6653_v62  ;;  %v6960_v39 = vsel %vm6948_vm12, %v11163_v0, %v11183_v57 }
 0x473   :  { %v11185_v16 = vpop.permute.xlu1 %6594  ;;  %v6657_v10 = vpop.permute.xlu0 %6656 }
 0x474   :  { %v6978_v41 = vsel %vm6965_vm13, %v6961_v46, %v6657_v10  ;;  %v6962_v32 = vsel %vm6948_vm12, %v11166_v14, %v11185_v16 }
 0x477   :  { %v11187_v58 = vpop.permute.xlu1 %6598  ;;  %v6661_v4 = vpop.permute.xlu0 %6660 }
 0x478   :  { %v6980_v29 = vsel %vm6965_vm13, %v6963_v11, %v6661_v4  ;;  %v6964_v0 = vsel %vm6948_vm12, %v11171_v8, %v11187_v58 }
 0x47b   :  { %v6635_v20 = vpop.permute.xlu1 %6634  ;;  %v6697_v40 = vpop.permute.xlu0 %6696 }
 0x47c   :  { %v11193_v21 = vsel %vm6982_vm14, %v6966_v36, %v6697_v40  ;;  %v6967_v23 = vsel %vm6965_vm13, %v6950_v3, %v6635_v20 }
 0x47d   :  { %7015 = vrot.lane.b32.xlu0 %v11193_v21, %s7136_s23 }
 0x47f   :  { %v6701_v2 = vpop.permute.xlu0 %6700 }
 0x480   :  { %v6639_v33 = vpop.permute.xlu1 %6638  ;;  %v11201_v42 = vsel %vm6982_vm14, %v6968_v15, %v6701_v2 }
 0x481   :  { %7019 = vrot.lane.b32.xlu0 %v11201_v42, %s7136_s23  ;;  %v6969_v54 = vsel %vm6965_vm13, %v6952_v31, %v6639_v33 }
 0x483   :  { %v6705_v44 = vpop.permute.xlu0 %6704 }
 0x484   :  { %v11209_v45 = vsel %vm6982_vm14, %v6970_v61, %v6705_v44 }
 0x485   :  { %v6643_v30 = vpop.permute.xlu1 %6642  ;;  %7023 = vrot.lane.b32.xlu0 %v11209_v45, %s7136_s23 }
 0x486   :  { %v6971_v47 = vsel %vm6965_vm13, %v6954_v12, %v6643_v30 }
 0x487   :  { %v6709_v24 = vpop.permute.xlu0 %6708 }
 0x488   :  { %v11217_v1 = vsel %vm6982_vm14, %v6972_v17, %v6709_v24 }
 0x489   :  { %v6647_v26 = vpop.permute.xlu1 %6646  ;;  %7027 = vrot.lane.b32.xlu0 %v11217_v1, %s7136_s23 }
 0x48a   :  { %v6973_v27 = vsel %vm6965_vm13, %v6956_v35, %v6647_v26 }
 0x48b   :  { %v6713_v53 = vpop.permute.xlu0 %6712 }
 0x48c   :  { %v11225_v60 = vsel %vm6982_vm14, %v6974_v55, %v6713_v53 }
 0x48d   :  { %v6651_v51 = vpop.permute.xlu1 %6650  ;;  %7031 = vrot.lane.b32.xlu0 %v11225_v60, %s7136_s23 }
 0x48e   :  { %v6975_v48 = vsel %vm6965_vm13, %v6958_v7, %v6651_v51 }
 0x48f   :  { %v6717_v28 = vpop.permute.xlu0 %6716 }
 0x490   :  { %v11233_v22 = vsel %vm6982_vm14, %v6976_v52, %v6717_v28 }
 0x491   :  { %v6655_v34 = vpop.permute.xlu1 %6654  ;;  %7035 = vrot.lane.b32.xlu0 %v11233_v22, %s7136_s23 }
 0x492   :  { %v6977_v49 = vsel %vm6965_vm13, %v6960_v39, %v6655_v34 }
 0x493   :  { %v6721_v5 = vpop.permute.xlu0 %6720 }
 0x494   :  { %v11241_v13 = vsel %vm6982_vm14, %v6978_v41, %v6721_v5 }
 0x495   :  { %7039 = vrot.lane.b32.xlu0 %v11241_v13, %s7136_s23 }
 0x496   :  { %v6659_v59 = vpop.permute.xlu1 %6658 }
 0x497   :  { %v6979_v38 = vsel %vm6965_vm13, %v6962_v32, %v6659_v59 }
 0x49a   :  { %v6663_v25 = vpop.permute.xlu1 %6662 }
 0x49b   :  { %v6725_v43 = vpop.permute.xlu0 %6724  ;;  %v6981_v57 = vsel %vm6965_vm13, %v6964_v0, %v6663_v25 }
 0x49c   :  { %v11250_v6 = vsel %vm6982_vm14, %v6980_v29, %v6725_v43 }
 0x49d   :  { %7043 = vrot.lane.b32.xlu0 %v11250_v6, %s7136_s23 }
 0x49e   :  { %v6699_v18 = vpop.permute.xlu1 %6698 }
 0x49f   :  { %v11259_v62 = vsel %vm6982_vm14, %v6967_v23, %v6699_v18 }
 0x4a0   :  { %7017 = vrot.lane.b32.xlu1 %v11259_v62, %s7136_s23 }
 0x4a2   :  { %v6703_v10 = vpop.permute.xlu1 %6702 }
 0x4a3   :  { %v11268_v4 = vsel %vm6982_vm14, %v6969_v54, %v6703_v10 }
 0x4a4   :  { %7021 = vrot.lane.b32.xlu1 %v11268_v4, %s7136_s23 }
 0x4a6   :  { %v6707_v63 = vpop.permute.xlu1 %6706 }
 0x4a7   :  { %v6988_v36 = vsel %vm6982_vm14, %v6971_v47, %v6707_v63 }
 0x4a8   :  { %7025 = vrot.lane.b32.xlu1 %v6988_v36, %s7136_s23 }
 0x4aa   :  { %v6711_v20 = vpop.permute.xlu1 %6710 }
 0x4ab   :  { %v6990_v40 = vsel %vm6982_vm14, %v6973_v27, %v6711_v20 }
 0x4ac   :  { %7029 = vrot.lane.b32.xlu1 %v6990_v40, %s7136_s23 }
 0x4ae   :  { %v6715_v56 = vpop.permute.xlu1 %6714 }
 0x4af   :  { %v6992_v15 = vsel %vm6982_vm14, %v6975_v48, %v6715_v56 }
 0x4b0   :  { %7033 = vrot.lane.b32.xlu1 %v6992_v15, %s7136_s23 }
 0x4b2   :  { %v6719_v33 = vpop.permute.xlu1 %6718 }
 0x4b3   :  { %v6994_v2 = vsel %vm6982_vm14, %v6977_v49, %v6719_v33 }
 0x4b4   :  { %7037 = vrot.lane.b32.xlu1 %v6994_v2, %s7136_s23 }
 0x4b6   :  { %v6723_v19 = vpop.permute.xlu1 %6722 }
 0x4b7   :  { %v6996_v61 = vsel %vm6982_vm14, %v6979_v38, %v6723_v19 }
 0x4b8   :  { %7041 = vrot.lane.b32.xlu1 %v6996_v61, %s7136_s23 }
 0x4ba   :  { %v6727_v30 = vpop.permute.xlu1 %6726 }
 0x4bb   :  { %v6998_v44 = vsel %vm6982_vm14, %v6981_v57, %v6727_v30 }
 0x4bc   :  { %7045 = vrot.lane.b32.xlu1 %v6998_v44, %s7136_s23 }
 0x4ef   :  { %v7016_v14 = vpop.permute.xlu0 %7015 }
 0x4f0   :  { %v7064_v16 = vsel %vm7063_vm15, %v11193_v21, %v7016_v14 }
 0x4f1   :  { %7081 = vst.msk [vmem:[%s11399_s1] sm:$0xff] %vm7080_vm0, %v7064_v16 }
 0x4f3   :  { %v7020_v9 = vpop.permute.xlu0 %7019 }
 0x4f4   :  { %v7066_v8 = vsel %vm7063_vm15, %v11201_v42, %v7020_v9 }
 0x4f5   :  { %7083 = vst.msk [vmem:[%s11399_s1 + $0x10] sm:$0xff] %vm7080_vm0, %v7066_v8 }
 0x4f7   :  { %v7024_v58 = vpop.permute.xlu0 %7023 }
 0x4f8   :  { %v7068_v17 = vsel %vm7063_vm15, %v11209_v45, %v7024_v58 }
 0x4f9   :  { %7085 = vst.msk [vmem:[%s11399_s1 + $0x20] sm:$0xff] %vm7080_vm0, %v7068_v17 }
 0x4fb   :  { %v7028_v21 = vpop.permute.xlu0 %7027 }
 0x4fc   :  { %v7070_v26 = vsel %vm7063_vm15, %v11217_v1, %v7028_v21 }
 0x4fd   :  { %7087 = vst.msk [vmem:[%s11399_s1 + $0x30] sm:$0xff] %vm7080_vm0, %v7070_v26 }
 0x4ff   :  { %v7032_v42 = vpop.permute.xlu0 %7031 }
 0x500   :  { %v7072_v24 = vsel %vm7063_vm15, %v11225_v60, %v7032_v42 }
 0x501   :  { %7089 = vst.msk [vmem:[%s11399_s1 + $0x40] sm:$0xff] %vm7080_vm0, %v7072_v24 }
 0x503   :  { %v7036_v45 = vpop.permute.xlu0 %7035 }
 0x504   :  { %v7074_v37 = vsel %vm7063_vm15, %v11233_v22, %v7036_v45 }
 0x505   :  { %7091 = vst.msk [vmem:[%s11399_s1 + $0x50] sm:$0xff] %vm7080_vm0, %v7074_v37 }
 0x507   :  { %v7040_v1 = vpop.permute.xlu0 %7039 }
 0x508   :  { %v7076_v55 = vsel %vm7063_vm15, %v11241_v13, %v7040_v1 }
 0x509   :  { %7093 = vst.msk [vmem:[%s11399_s1 + $0x60] sm:$0xff] %vm7080_vm0, %v7076_v55 }
 0x50f   :  { %v7044_v51 = vpop.permute.xlu0 %7043 }
 0x510   :  { %v7078_v53 = vsel %vm7063_vm15, %v11250_v6, %v7044_v51 }
 0x511   :  { %7095 = vst.msk [vmem:[%s11399_s1 + $0x70] sm:$0xff] %vm7080_vm0, %v7078_v53 }
 0x512   :  { %v7018_v60 = vpop.permute.xlu1 %7017 }
 0x513   :  { %v7065_v50 = vsel %vm7063_vm15, %v11259_v62, %v7018_v60 }
 0x514   :  { %7082 = vst.msk [vmem:[%s11399_s1 + $0x8] sm:$0xff] %vm7080_vm0, %v7065_v50 }
 0x516   :  { %v7022_v52 = vpop.permute.xlu1 %7021 }
 0x517   :  { %v7067_v34 = vsel %vm7063_vm15, %v11268_v4, %v7022_v52 }
 0x518   :  { %7084 = vst.msk [vmem:[%s11399_s1 + $0x18] sm:$0xff] %vm7080_vm0, %v7067_v34 }
 0x51a   :  { %v7026_v28 = vpop.permute.xlu1 %7025 }
 0x51b   :  { %v7069_v22 = vsel %vm7063_vm15, %v6988_v36, %v7026_v28 }
 0x51c   :  { %7086 = vst.msk [vmem:[%s11399_s1 + $0x28] sm:$0xff] %vm7080_vm0, %v7069_v22 }
 0x51e   :  { %v7030_v46 = vpop.permute.xlu1 %7029 }
 0x51f   :  { %v7071_v41 = vsel %vm7063_vm15, %v6990_v40, %v7030_v46 }
 0x520   :  { %7088 = vst.msk [vmem:[%s11399_s1 + $0x38] sm:$0xff] %vm7080_vm0, %v7071_v41 }
 0x522   :  { %v7034_v59 = vpop.permute.xlu1 %7033 }
 0x523   :  { %v7073_v5 = vsel %vm7063_vm15, %v6992_v15, %v7034_v59 }
 0x524   :  { %7090 = vst.msk [vmem:[%s11399_s1 + $0x48] sm:$0xff] %vm7080_vm0, %v7073_v5 }
 0x526   :  { %v7038_v13 = vpop.permute.xlu1 %7037 }
 0x527   :  { %v7075_v11 = vsel %vm7063_vm15, %v6994_v2, %v7038_v13 }
 0x528   :  { %7092 = vst.msk [vmem:[%s11399_s1 + $0x58] sm:$0xff] %vm7080_vm0, %v7075_v11 }
 0x52a   :  { %v7042_v29 = vpop.permute.xlu1 %7041 }
 0x52b   :  { %v7077_v25 = vsel %vm7063_vm15, %v6996_v61, %v7042_v29 }
 0x52c   :  { %7094 = vst.msk [vmem:[%s11399_s1 + $0x68] sm:$0xff] %vm7080_vm0, %v7077_v25 }
 0x52e   :  { %v7046_v43 = vpop.permute.xlu1 %7045 }
 0x52f   :  { %v7079_v6 = vsel %vm7063_vm15, %v6998_v44, %v7046_v43 }
 0x530   :  { %7096 = vst.msk [vmem:[%s11399_s1 + $0x78] sm:$0xff] %vm7080_vm0, %v7079_v6 }

</bundles_post_ra>
